<compile_context>
chip_gen: v7x
topology: tpu7x:2x2x1
jax: 0.10.0
libtpu: 0.0.40
codegen_flags: <defaults>
</compile_context>

<pallas_src>
import jax
import jax.numpy as jnp
from jax import lax
from jax.experimental import pallas as pl
from jax.experimental.pallas import tpu as pltpu

EPS = 1e-5
NEG_SLOPE = 0.01  # torch.nn.LeakyReLU default negative_slope


def _leaky(x):
    return jnp.where(x >= 0, x, NEG_SLOPE * x)


def _bn(x, gamma, beta):
    # Training-mode BatchNorm over all rows per feature (last dim), biased
    # variance, eps=1e-5.  One-pass stats: var = E[x^2] - mean^2.
    mean = jnp.mean(x, axis=0, keepdims=True)
    meansq = jnp.mean(x * x, axis=0, keepdims=True)
    var = meansq - mean * mean
    return (x - mean) * lax.rsqrt(var + EPS) * gamma + beta


def fused_kernel(xe_ref, xo_ref,
                 w1_ref, b1_ref, g1_ref, be1_ref,
                 w2_ref, b2_ref, g2_ref, be2_ref,
                 wf1_ref, bf1_ref, g3_ref, be3_ref,
                 wf2_ref, bf2_ref,
                 o_ref, h2s_ref):
    B = o_ref.shape[0]
    R1 = xe_ref.shape[0]          # B * 64  conv1 output rows, (b, l) order
    R2 = R1 // 4                  # B * 16  conv2 output rows, (b, m) order

    # ---------------- conv1: Cin=1, K=5, stride 2, pad 2 -> 5 VPU MACs ------
    xe = xe_ref[...]                                   # (R1, 1) = x[b, 2l]
    xo = xo_ref[...]                                   # (R1, 1) = x[b, 2l+1]

    row1 = lax.broadcasted_iota(jnp.int32, (R1, 1), 0)
    l_in_b = row1 % 64
    first_l = l_in_b == 0
    last_l = l_in_b == 63

    xem1 = jnp.where(first_l, 0.0, pltpu.roll(xe, shift=1, axis=0))        # x[b, 2l-2]
    xom1 = jnp.where(first_l, 0.0, pltpu.roll(xo, shift=1, axis=0))        # x[b, 2l-1]
    xep1 = jnp.where(last_l, 0.0, pltpu.roll(xe, shift=R1 - 1, axis=0))    # x[b, 2l+2]

    h1 = (xem1 * w1_ref[0:1, :] + xom1 * w1_ref[1:2, :] + xe * w1_ref[2:3, :]
          + xo * w1_ref[3:4, :] + xep1 * w1_ref[4:5, :]) + b1_ref[...]
    h1 = _leaky(_bn(h1, g1_ref[...], be1_ref[...]))    # (R1, 64) f32

    # ----- MaxPool1d(2,2) fused with even/odd split for the stride-2 conv2 --
    # rows (b, m); t = l - 4m.  pooled[b,2m]=max over t in {0,1}; pooled[b,2m+1]
    # = max over t in {2,3}.  Static slices + 2-wide max (no -inf masking).
    h1g = h1.reshape(R2, 4, 64)
    a_e = jnp.max(h1g[:, 0:2, :], axis=1)              # (R2, 64)  pooled[b, 2m]
    a_o = jnp.max(h1g[:, 2:4, :], axis=1)              # (R2, 64)  pooled[b, 2m+1]

    # ---------------- conv2: ONE (R2,320)@(320,128) bf16 MXU matmul ---------
    row2 = lax.broadcasted_iota(jnp.int32, (R2, 1), 0)
    m_in_b = row2 % 16
    first_m = m_in_b == 0
    last_m = m_in_b == 15

    a_em1 = jnp.where(first_m, 0.0, pltpu.roll(a_e, shift=1, axis=0))       # pooled[b, 2m-2]
    a_om1 = jnp.where(first_m, 0.0, pltpu.roll(a_o, shift=1, axis=0))       # pooled[b, 2m-1]
    a_ep1 = jnp.where(last_m, 0.0, pltpu.roll(a_e, shift=R2 - 1, axis=0))   # pooled[b, 2m+2]

    A = jnp.concatenate([a_em1, a_om1, a_e, a_o, a_ep1], axis=1)            # (R2, 320)
    h2 = (jnp.dot(A.astype(jnp.bfloat16), w2_ref[...],
                  preferred_element_type=jnp.float32) + b2_ref[...])
    h2 = _leaky(_bn(h2, g2_ref[...], be2_ref[...]))    # (R2, 128) f32

    # ------ fc1: regroup rows (b,m) -> lane-dense (B, 2048), ONE matmul -----
    # a2f[b, m*128 + c] = h2[b*16 + m, c]; weight is pre-flattened to match.
    h2s_ref[...] = h2
    pieces = [h2s_ref[pl.ds(m, B, stride=16), :] for m in range(16)]        # 16 x (B,128)
    a2f = jnp.concatenate(pieces, axis=1)                                   # (B, 2048)

    h3 = (jnp.dot(a2f.astype(jnp.bfloat16), wf1_ref[...],
                  preferred_element_type=jnp.float32) + bf1_ref[...])
    h3 = _leaky(_bn(h3, g3_ref[...], be3_ref[...]))    # (B, 256) f32

    # ------------- fc2 (output padded to 128 lanes: dense vst) --------------
    h4 = (jnp.dot(h3.astype(jnp.bfloat16), wf2_ref[...],
                  preferred_element_type=jnp.float32) + bf2_ref[...])
    o_ref[...] = _leaky(h4)                            # (B, 128); logits in cols :10


# ------------------------------------------------------------------ parameters
def init_params(key):
    ks = jax.random.split(key, 8)

    def norm(k, shape, scale):
        return (scale * jax.random.normal(k, shape)).astype(jnp.float32)

    w1 = norm(ks[0], (64, 1, 5), 0.3)      # Conv1d(1, 64, 5)   (Cout, Cin, K)
    b1 = norm(ks[1], (64,), 0.1)
    w2 = norm(ks[2], (128, 64, 5), 0.05)   # Conv1d(64, 128, 5)
    b2 = norm(ks[3], (128,), 0.1)
    wf1 = norm(ks[4], (256, 2048), 0.02)   # Linear(128*16, 256) (out, in)
    bf1 = norm(ks[5], (256,), 0.1)
    wf2 = norm(ks[6], (10, 256), 0.05)     # Linear(256, 10)
    bf2 = norm(ks[7], (10,), 0.1)

    # conv2 weight as one (320, 128) bf16 matrix, rows = (tap k)*64 + cin.
    w2cat = jnp.transpose(w2, (2, 1, 0)).reshape(5 * 64, 128).astype(jnp.bfloat16)

    # fc1 weight pre-flattened (m, c)-major so it matches the in-kernel
    # (B, 2048) regroup:  wf1_flat[m*128 + c, o] = wf1[o, c*16 + m].
    wf1_flat = (wf1.reshape(256, 128, 16).transpose(2, 1, 0)
                .reshape(2048, 256).astype(jnp.bfloat16))

    # fc2 padded to 128 output lanes (cols 10..127 zero, sliced off later).
    wf2_pad = jnp.zeros((256, 128), jnp.float32).at[:, :10].set(wf2.T).astype(jnp.bfloat16)
    bf2_pad = jnp.zeros((1, 128), jnp.float32).at[0, :10].set(bf2)

    return dict(
        w1=w1[:, 0, :].T,                                     # (5, 64) f32 [tap, cout]
        b1=b1.reshape(1, 64),
        g1=jnp.ones((1, 64), jnp.float32),
        be1=jnp.zeros((1, 64), jnp.float32),
        w2=w2cat,                                             # (320, 128) bf16
        b2=b2.reshape(1, 128),
        g2=jnp.ones((1, 128), jnp.float32),
        be2=jnp.zeros((1, 128), jnp.float32),
        wf1=wf1_flat,                                         # (2048, 256) bf16
        bf1=bf1.reshape(1, 256),
        g3=jnp.ones((1, 256), jnp.float32),
        be3=jnp.zeros((1, 256), jnp.float32),
        wf2=wf2_pad,                                          # (256, 128) bf16
        bf2=bf2_pad,
    )


# --------------------------------------------------------------------- forward
def latent_clf_forward(x, params):
    B, c_in, L = x.shape
    assert c_in == 1 and L == 128, "fc1 (128*16) implies input length 128"

    # Wrapper-side even/odd split of the stride-2 conv1 input (no in-kernel
    # lane extraction).  Rows are (b, l), l = conv1 output position.
    # TODO(synk): for large B, feed a lane-dense per-tile input together with
    #             the batch-tiled grid to keep the resident VMEM slab small.
    x2 = x[:, 0, :].astype(jnp.float32)                  # (B, 128)
    xe = x2[:, 0::2].reshape(B * 64, 1)                  # x[b, 2l]
    xo = x2[:, 1::2].reshape(B * 64, 1)                  # x[b, 2l+1]

    operands = (xe, xo,
                params["w1"], params["b1"], params["g1"], params["be1"],
                params["w2"], params["b2"], params["g2"], params["be2"],
                params["wf1"], params["bf1"], params["g3"], params["be3"],
                params["wf2"], params["bf2"])

    macs = B * (64 * 5 * 64            # conv1
                + 16 * 320 * 128       # conv2
                + 2048 * 256           # fc1
                + 256 * 128)           # fc2 (padded)
    bytes_accessed = sum(int(a.size) * a.dtype.itemsize for a in operands) + B * 128 * 4
    cost = pl.CostEstimate(flops=2 * macs, transcendentals=448,
                           bytes_accessed=int(bytes_accessed))

    # Single gridless block: BN batch statistics are global by construction.
    out = pl.pallas_call(
        fused_kernel,
        out_shape=jax.ShapeDtypeStruct((B, 128), jnp.float32),
        in_specs=[pl.BlockSpec(memory_space=pltpu.MemorySpace.VMEM)] * len(operands),
        out_specs=pl.BlockSpec(memory_space=pltpu.MemorySpace.VMEM),
        scratch_shapes=[pltpu.VMEM((B * 16, 128), jnp.float32)],
        cost_estimate=cost,
    )(*operands)
    return out[:, :10]


if __name__ == "__main__":
    key = jax.random.PRNGKey(0)
    k_x, k_p = jax.random.split(key)
    x = jax.random.normal(k_x, (2, 1, 128), dtype=jnp.float32)   # (B, 1, L)
    params = init_params(k_p)

    fwd = jax.jit(latent_clf_forward)
    out = fwd(x, params)
    jax.block_until_ready(out)
    assert out.shape == (2, 10) and out.dtype == jnp.float32
    print("KERNEL_OK")
</pallas_src>

<mosaic_0001>
module attributes {stable_mosaic.version = 11 : i64} {
  func.func @fused_kernel(%arg0: memref<128x1xf32, #tpu.memory_space<vmem>>, %arg1: memref<128x1xf32, #tpu.memory_space<vmem>>, %arg2: memref<5x64xf32, #tpu.memory_space<vmem>>, %arg3: memref<1x64xf32, #tpu.memory_space<vmem>>, %arg4: memref<1x64xf32, #tpu.memory_space<vmem>>, %arg5: memref<1x64xf32, #tpu.memory_space<vmem>>, %arg6: memref<320x128xbf16, #tpu.memory_space<vmem>>, %arg7: memref<1x128xf32, #tpu.memory_space<vmem>>, %arg8: memref<1x128xf32, #tpu.memory_space<vmem>>, %arg9: memref<1x128xf32, #tpu.memory_space<vmem>>, %arg10: memref<2048x256xbf16, #tpu.memory_space<vmem>>, %arg11: memref<1x256xf32, #tpu.memory_space<vmem>>, %arg12: memref<1x256xf32, #tpu.memory_space<vmem>>, %arg13: memref<1x256xf32, #tpu.memory_space<vmem>>, %arg14: memref<256x128xbf16, #tpu.memory_space<vmem>>, %arg15: memref<1x128xf32, #tpu.memory_space<vmem>>, %arg16: memref<2x128xf32, #tpu.memory_space<vmem>>, %arg17: memref<32x128xf32, #tpu.memory_space<vmem>>) attributes {dimension_semantics = [], scalar_prefetch = 0 : i64, scratch_operands = 1 : i64, tpu.core_type = #tpu.core_type<tc>} {
    %c0 = arith.constant 0 : index
    %c0_0 = arith.constant 0 : index
    %0 = vector.load %arg0[%c0, %c0_0] : memref<128x1xf32, #tpu.memory_space<vmem>>, vector<128x1xf32>
    %c0_1 = arith.constant 0 : index
    %c0_2 = arith.constant 0 : index
    %1 = vector.load %arg1[%c0_1, %c0_2] : memref<128x1xf32, #tpu.memory_space<vmem>>, vector<128x1xf32>
    %2 = tpu.iota {dimensions = array<i32: 0>} : vector<128x1xi32>
    %c64_i32 = arith.constant 64 : i32
    %c0_i32 = arith.constant 0 : i32
    %3 = arith.cmpi eq, %c64_i32, %c0_i32 : i32
    %c1_i32 = arith.constant 1 : i32
    %4 = arith.select %3, %c1_i32, %c64_i32 : i32
    %5 = vector.broadcast %4 : i32 to vector<128x1xi32>
    %6 = arith.remsi %2, %5 : vector<128x1xi32>
    %c0_i32_3 = arith.constant 0 : i32
    %7 = vector.broadcast %c0_i32_3 : i32 to vector<128x1xi32>
    %8 = arith.cmpi ne, %6, %7 : vector<128x1xi32>
    %c0_i32_4 = arith.constant 0 : i32
    %9 = vector.broadcast %c0_i32_4 : i32 to vector<128x1xi32>
    %10 = arith.cmpi slt, %6, %9 : vector<128x1xi32>
    %c0_i32_5 = arith.constant 0 : i32
    %11 = arith.cmpi slt, %4, %c0_i32_5 : i32
    %12 = vector.broadcast %11 : i1 to vector<128x1xi1>
    %13 = vector.broadcast %12 : vector<128x1xi1> to vector<128x1xi1>
    %14 = arith.xori %10, %13 : vector<128x1xi1>
    %15 = arith.andi %14, %8 : vector<128x1xi1>
    %16 = vector.broadcast %4 : i32 to vector<128x1xi32>
    %17 = arith.addi %6, %16 : vector<128x1xi32>
    %18 = arith.select %15, %17, %6 : vector<128x1xi1>, vector<128x1xi32>
    %c0_i32_6 = arith.constant 0 : i32
    %19 = vector.broadcast %c0_i32_6 : i32 to vector<128x1xi32>
    %20 = arith.cmpi eq, %18, %19 : vector<128x1xi32>
    %c63_i32 = arith.constant 63 : i32
    %21 = vector.broadcast %c63_i32 : i32 to vector<128x1xi32>
    %22 = arith.cmpi eq, %18, %21 : vector<128x1xi32>
    %c1_i32_7 = arith.constant 1 : i32
    %23 = tpu.dynamic_rotate %0 by %c1_i32_7 dim 0 : vector<128x1xf32>, i32 -> vector<128x1xf32>
    %cst = arith.constant 0.000000e+00 : f32
    %24 = vector.broadcast %cst : f32 to vector<128x1xf32>
    %25 = arith.select %20, %24, %23 : vector<128x1xi1>, vector<128x1xf32>
    %c1_i32_8 = arith.constant 1 : i32
    %26 = tpu.dynamic_rotate %1 by %c1_i32_8 dim 0 : vector<128x1xf32>, i32 -> vector<128x1xf32>
    %cst_9 = arith.constant 0.000000e+00 : f32
    %27 = vector.broadcast %cst_9 : f32 to vector<128x1xf32>
    %28 = arith.select %20, %27, %26 : vector<128x1xi1>, vector<128x1xf32>
    %c127_i32 = arith.constant 127 : i32
    %29 = tpu.dynamic_rotate %0 by %c127_i32 dim 0 : vector<128x1xf32>, i32 -> vector<128x1xf32>
    %cst_10 = arith.constant 0.000000e+00 : f32
    %30 = vector.broadcast %cst_10 : f32 to vector<128x1xf32>
    %31 = arith.select %22, %30, %29 : vector<128x1xi1>, vector<128x1xf32>
    %c0_11 = arith.constant 0 : index
    %c0_12 = arith.constant 0 : index
    %32 = vector.load %arg2[%c0_11, %c0_12] : memref<5x64xf32, #tpu.memory_space<vmem>>, vector<1x64xf32>
    %33 = vector.broadcast %25 : vector<128x1xf32> to vector<128x64xf32>
    %34 = vector.broadcast %32 : vector<1x64xf32> to vector<128x64xf32>
    %35 = arith.mulf %33, %34 : vector<128x64xf32>
    %c1 = arith.constant 1 : index
    %c0_13 = arith.constant 0 : index
    %36 = vector.load %arg2[%c1, %c0_13] : memref<5x64xf32, #tpu.memory_space<vmem>>, vector<1x64xf32>
    %37 = vector.broadcast %28 : vector<128x1xf32> to vector<128x64xf32>
    %38 = vector.broadcast %36 : vector<1x64xf32> to vector<128x64xf32>
    %39 = arith.mulf %37, %38 : vector<128x64xf32>
    %40 = arith.addf %35, %39 : vector<128x64xf32>
    %c2 = arith.constant 2 : index
    %c0_14 = arith.constant 0 : index
    %41 = vector.load %arg2[%c2, %c0_14] : memref<5x64xf32, #tpu.memory_space<vmem>>, vector<1x64xf32>
    %42 = vector.broadcast %0 : vector<128x1xf32> to vector<128x64xf32>
    %43 = vector.broadcast %41 : vector<1x64xf32> to vector<128x64xf32>
    %44 = arith.mulf %42, %43 : vector<128x64xf32>
    %45 = arith.addf %40, %44 : vector<128x64xf32>
    %c3 = arith.constant 3 : index
    %c0_15 = arith.constant 0 : index
    %46 = vector.load %arg2[%c3, %c0_15] : memref<5x64xf32, #tpu.memory_space<vmem>>, vector<1x64xf32>
    %47 = vector.broadcast %1 : vector<128x1xf32> to vector<128x64xf32>
    %48 = vector.broadcast %46 : vector<1x64xf32> to vector<128x64xf32>
    %49 = arith.mulf %47, %48 : vector<128x64xf32>
    %50 = arith.addf %45, %49 : vector<128x64xf32>
    %c4 = arith.constant 4 : index
    %c0_16 = arith.constant 0 : index
    %51 = vector.load %arg2[%c4, %c0_16] : memref<5x64xf32, #tpu.memory_space<vmem>>, vector<1x64xf32>
    %52 = vector.broadcast %31 : vector<128x1xf32> to vector<128x64xf32>
    %53 = vector.broadcast %51 : vector<1x64xf32> to vector<128x64xf32>
    %54 = arith.mulf %52, %53 : vector<128x64xf32>
    %55 = arith.addf %50, %54 : vector<128x64xf32>
    %c0_17 = arith.constant 0 : index
    %c0_18 = arith.constant 0 : index
    %56 = vector.load %arg3[%c0_17, %c0_18] : memref<1x64xf32, #tpu.memory_space<vmem>>, vector<1x64xf32>
    %57 = vector.broadcast %56 : vector<1x64xf32> to vector<128x64xf32>
    %58 = arith.addf %55, %57 : vector<128x64xf32>
    %c0_19 = arith.constant 0 : index
    %c0_20 = arith.constant 0 : index
    %59 = vector.load %arg4[%c0_19, %c0_20] : memref<1x64xf32, #tpu.memory_space<vmem>>, vector<1x64xf32>
    %c0_21 = arith.constant 0 : index
    %c0_22 = arith.constant 0 : index
    %60 = vector.load %arg5[%c0_21, %c0_22] : memref<1x64xf32, #tpu.memory_space<vmem>>, vector<1x64xf32>
    %cst_23 = arith.constant dense<0.000000e+00> : vector<64xf32>
    %61 = vector.multi_reduction <add>, %58, %cst_23 [0] : vector<128x64xf32> to vector<64xf32>
    %62 = vector.shape_cast %61 : vector<64xf32> to vector<1x64xf32>
    %cst_24 = arith.constant 1.280000e+02 : f32
    %63 = vector.broadcast %cst_24 : f32 to vector<1x64xf32>
    %64 = arith.divf %62, %63 : vector<1x64xf32>
    %65 = arith.mulf %58, %58 : vector<128x64xf32>
    %cst_25 = arith.constant dense<0.000000e+00> : vector<64xf32>
    %66 = vector.multi_reduction <add>, %65, %cst_25 [0] : vector<128x64xf32> to vector<64xf32>
    %67 = vector.shape_cast %66 : vector<64xf32> to vector<1x64xf32>
    %cst_26 = arith.constant 1.280000e+02 : f32
    %68 = vector.broadcast %cst_26 : f32 to vector<1x64xf32>
    %69 = arith.divf %67, %68 : vector<1x64xf32>
    %70 = arith.mulf %64, %64 : vector<1x64xf32>
    %71 = arith.subf %69, %70 : vector<1x64xf32>
    %72 = vector.broadcast %64 : vector<1x64xf32> to vector<128x64xf32>
    %73 = arith.subf %58, %72 : vector<128x64xf32>
    %cst_27 = arith.constant 9.99999974E-6 : f32
    %74 = vector.broadcast %cst_27 : f32 to vector<1x64xf32>
    %75 = arith.addf %71, %74 : vector<1x64xf32>
    %76 = math.rsqrt %75 : vector<1x64xf32>
    %77 = vector.broadcast %76 : vector<1x64xf32> to vector<128x64xf32>
    %78 = arith.mulf %73, %77 : vector<128x64xf32>
    %79 = vector.broadcast %59 : vector<1x64xf32> to vector<128x64xf32>
    %80 = arith.mulf %78, %79 : vector<128x64xf32>
    %81 = vector.broadcast %60 : vector<1x64xf32> to vector<128x64xf32>
    %82 = arith.addf %80, %81 : vector<128x64xf32>
    %cst_28 = arith.constant 0.000000e+00 : f32
    %83 = vector.broadcast %cst_28 : f32 to vector<128x64xf32>
    %84 = arith.cmpf oge, %82, %83 : vector<128x64xf32>
    %cst_29 = arith.constant 0.00999999977 : f32
    %85 = vector.broadcast %cst_29 : f32 to vector<128x64xf32>
    %86 = arith.mulf %85, %82 : vector<128x64xf32>
    %87 = arith.select %84, %82, %86 : vector<128x64xi1>, vector<128x64xf32>
    %88 = vector.shape_cast %87 : vector<128x64xf32> to vector<32x4x64xf32>
    %89 = vector.extract_strided_slice %88 {offsets = [0, 0, 0], sizes = [32, 2, 64], strides = [1, 1, 1]} : vector<32x4x64xf32> to vector<32x2x64xf32>
    %cst_30 = arith.constant dense<0xFF800000> : vector<32x64xf32>
    %90 = vector.multi_reduction <maximumf>, %89, %cst_30 [1] : vector<32x2x64xf32> to vector<32x64xf32>
    %91 = vector.extract_strided_slice %88 {offsets = [0, 2, 0], sizes = [32, 2, 64], strides = [1, 1, 1]} : vector<32x4x64xf32> to vector<32x2x64xf32>
    %cst_31 = arith.constant dense<0xFF800000> : vector<32x64xf32>
    %92 = vector.multi_reduction <maximumf>, %91, %cst_31 [1] : vector<32x2x64xf32> to vector<32x64xf32>
    %93 = tpu.iota {dimensions = array<i32: 0>} : vector<32x1xi32>
    %c16_i32 = arith.constant 16 : i32
    %c0_i32_32 = arith.constant 0 : i32
    %94 = arith.cmpi eq, %c16_i32, %c0_i32_32 : i32
    %c1_i32_33 = arith.constant 1 : i32
    %95 = arith.select %94, %c1_i32_33, %c16_i32 : i32
    %96 = vector.broadcast %95 : i32 to vector<32x1xi32>
    %97 = arith.remsi %93, %96 : vector<32x1xi32>
    %c0_i32_34 = arith.constant 0 : i32
    %98 = vector.broadcast %c0_i32_34 : i32 to vector<32x1xi32>
    %99 = arith.cmpi ne, %97, %98 : vector<32x1xi32>
    %c0_i32_35 = arith.constant 0 : i32
    %100 = vector.broadcast %c0_i32_35 : i32 to vector<32x1xi32>
    %101 = arith.cmpi slt, %97, %100 : vector<32x1xi32>
    %c0_i32_36 = arith.constant 0 : i32
    %102 = arith.cmpi slt, %95, %c0_i32_36 : i32
    %103 = vector.broadcast %102 : i1 to vector<32x1xi1>
    %104 = vector.broadcast %103 : vector<32x1xi1> to vector<32x1xi1>
    %105 = arith.xori %101, %104 : vector<32x1xi1>
    %106 = arith.andi %105, %99 : vector<32x1xi1>
    %107 = vector.broadcast %95 : i32 to vector<32x1xi32>
    %108 = arith.addi %97, %107 : vector<32x1xi32>
    %109 = arith.select %106, %108, %97 : vector<32x1xi1>, vector<32x1xi32>
    %c0_i32_37 = arith.constant 0 : i32
    %110 = vector.broadcast %c0_i32_37 : i32 to vector<32x1xi32>
    %111 = arith.cmpi eq, %109, %110 : vector<32x1xi32>
    %c15_i32 = arith.constant 15 : i32
    %112 = vector.broadcast %c15_i32 : i32 to vector<32x1xi32>
    %113 = arith.cmpi eq, %109, %112 : vector<32x1xi32>
    %c1_i32_38 = arith.constant 1 : i32
    %114 = tpu.dynamic_rotate %90 by %c1_i32_38 dim 0 : vector<32x64xf32>, i32 -> vector<32x64xf32>
    %cst_39 = arith.constant 0.000000e+00 : f32
    %115 = vector.shape_cast %111 : vector<32x1xi1> to vector<32x1xi1>
    %116 = vector.broadcast %115 : vector<32x1xi1> to vector<32x64xi1>
    %117 = vector.broadcast %cst_39 : f32 to vector<32x64xf32>
    %118 = arith.select %116, %117, %114 : vector<32x64xi1>, vector<32x64xf32>
    %c1_i32_40 = arith.constant 1 : i32
    %119 = tpu.dynamic_rotate %92 by %c1_i32_40 dim 0 : vector<32x64xf32>, i32 -> vector<32x64xf32>
    %cst_41 = arith.constant 0.000000e+00 : f32
    %120 = vector.shape_cast %111 : vector<32x1xi1> to vector<32x1xi1>
    %121 = vector.broadcast %120 : vector<32x1xi1> to vector<32x64xi1>
    %122 = vector.broadcast %cst_41 : f32 to vector<32x64xf32>
    %123 = arith.select %121, %122, %119 : vector<32x64xi1>, vector<32x64xf32>
    %c31_i32 = arith.constant 31 : i32
    %124 = tpu.dynamic_rotate %90 by %c31_i32 dim 0 : vector<32x64xf32>, i32 -> vector<32x64xf32>
    %cst_42 = arith.constant 0.000000e+00 : f32
    %125 = vector.shape_cast %113 : vector<32x1xi1> to vector<32x1xi1>
    %126 = vector.broadcast %125 : vector<32x1xi1> to vector<32x64xi1>
    %127 = vector.broadcast %cst_42 : f32 to vector<32x64xf32>
    %128 = arith.select %126, %127, %124 : vector<32x64xi1>, vector<32x64xf32>
    %129 = tpu.concatenate %118, %123, %90, %92, %128 in 1 : vector<32x64xf32>, vector<32x64xf32>, vector<32x64xf32>, vector<32x64xf32>, vector<32x64xf32> -> vector<32x320xf32>
    %130 = arith.truncf %129 : vector<32x320xf32> to vector<32x320xbf16>
    %c0_43 = arith.constant 0 : index
    %c0_44 = arith.constant 0 : index
    %131 = vector.load %arg6[%c0_43, %c0_44] : memref<320x128xbf16, #tpu.memory_space<vmem>>, vector<320x128xbf16>
    %cst_45 = arith.constant dense<0.000000e+00> : vector<32x128xf32>
    %132 = tpu.matmul %130, %131, %cst_45 {dimension_numbers = #tpu.dot_dimension_numbers<[1], [0], [0], [1], [0, 0, 1, 1], [], []>} : vector<32x320xbf16>, vector<320x128xbf16>, vector<32x128xf32> -> vector<32x128xf32>
    %c0_46 = arith.constant 0 : index
    %c0_47 = arith.constant 0 : index
    %133 = vector.load %arg7[%c0_46, %c0_47] : memref<1x128xf32, #tpu.memory_space<vmem>>, vector<1x128xf32>
    %134 = vector.broadcast %133 : vector<1x128xf32> to vector<32x128xf32>
    %135 = arith.addf %132, %134 : vector<32x128xf32>
    %c0_48 = arith.constant 0 : index
    %c0_49 = arith.constant 0 : index
    %136 = vector.load %arg8[%c0_48, %c0_49] : memref<1x128xf32, #tpu.memory_space<vmem>>, vector<1x128xf32>
    %c0_50 = arith.constant 0 : index
    %c0_51 = arith.constant 0 : index
    %137 = vector.load %arg9[%c0_50, %c0_51] : memref<1x128xf32, #tpu.memory_space<vmem>>, vector<1x128xf32>
    %cst_52 = arith.constant dense<0.000000e+00> : vector<128xf32>
    %138 = vector.multi_reduction <add>, %135, %cst_52 [0] : vector<32x128xf32> to vector<128xf32>
    %139 = vector.shape_cast %138 : vector<128xf32> to vector<1x128xf32>
    %cst_53 = arith.constant 3.200000e+01 : f32
    %140 = vector.broadcast %cst_53 : f32 to vector<1x128xf32>
    %141 = arith.divf %139, %140 : vector<1x128xf32>
    %142 = arith.mulf %135, %135 : vector<32x128xf32>
    %cst_54 = arith.constant dense<0.000000e+00> : vector<128xf32>
    %143 = vector.multi_reduction <add>, %142, %cst_54 [0] : vector<32x128xf32> to vector<128xf32>
    %144 = vector.shape_cast %143 : vector<128xf32> to vector<1x128xf32>
    %cst_55 = arith.constant 3.200000e+01 : f32
    %145 = vector.broadcast %cst_55 : f32 to vector<1x128xf32>
    %146 = arith.divf %144, %145 : vector<1x128xf32>
    %147 = arith.mulf %141, %141 : vector<1x128xf32>
    %148 = arith.subf %146, %147 : vector<1x128xf32>
    %149 = vector.broadcast %141 : vector<1x128xf32> to vector<32x128xf32>
    %150 = arith.subf %135, %149 : vector<32x128xf32>
    %cst_56 = arith.constant 9.99999974E-6 : f32
    %151 = vector.broadcast %cst_56 : f32 to vector<1x128xf32>
    %152 = arith.addf %148, %151 : vector<1x128xf32>
    %153 = math.rsqrt %152 : vector<1x128xf32>
    %154 = vector.broadcast %153 : vector<1x128xf32> to vector<32x128xf32>
    %155 = arith.mulf %150, %154 : vector<32x128xf32>
    %156 = vector.broadcast %136 : vector<1x128xf32> to vector<32x128xf32>
    %157 = arith.mulf %155, %156 : vector<32x128xf32>
    %158 = vector.broadcast %137 : vector<1x128xf32> to vector<32x128xf32>
    %159 = arith.addf %157, %158 : vector<32x128xf32>
    %cst_57 = arith.constant 0.000000e+00 : f32
    %160 = vector.broadcast %cst_57 : f32 to vector<32x128xf32>
    %161 = arith.cmpf oge, %159, %160 : vector<32x128xf32>
    %cst_58 = arith.constant 0.00999999977 : f32
    %162 = vector.broadcast %cst_58 : f32 to vector<32x128xf32>
    %163 = arith.mulf %162, %159 : vector<32x128xf32>
    %164 = arith.select %161, %159, %163 : vector<32x128xi1>, vector<32x128xf32>
    %c0_59 = arith.constant 0 : index
    %c0_60 = arith.constant 0 : index
    %165 = vector.load %arg17[%c0_59, %c0_60] : memref<32x128xf32, #tpu.memory_space<vmem>>, vector<32x128xf32>
    tpu.vector_store %arg17[%c0_59, %c0_60], %164 {strides = array<i32>} : memref<32x128xf32, #tpu.memory_space<vmem>>, vector<32x128xf32>,
    %c0_61 = arith.constant 0 : index
    %c0_62 = arith.constant 0 : index
    %166 = tpu.strided_load %arg17[%c0_61, %c0_62] {strides = array<i32: 16, 1>} : memref<32x128xf32, #tpu.memory_space<vmem>>, vector<2x128xf32>
    %c1_63 = arith.constant 1 : index
    %c0_64 = arith.constant 0 : index
    %167 = tpu.strided_load %arg17[%c1_63, %c0_64] {strides = array<i32: 16, 1>} : memref<32x128xf32, #tpu.memory_space<vmem>>, vector<2x128xf32>
    %c2_65 = arith.constant 2 : index
    %c0_66 = arith.constant 0 : index
    %168 = tpu.strided_load %arg17[%c2_65, %c0_66] {strides = array<i32: 16, 1>} : memref<32x128xf32, #tpu.memory_space<vmem>>, vector<2x128xf32>
    %c3_67 = arith.constant 3 : index
    %c0_68 = arith.constant 0 : index
    %169 = tpu.strided_load %arg17[%c3_67, %c0_68] {strides = array<i32: 16, 1>} : memref<32x128xf32, #tpu.memory_space<vmem>>, vector<2x128xf32>
    %c4_69 = arith.constant 4 : index
    %c0_70 = arith.constant 0 : index
    %170 = tpu.strided_load %arg17[%c4_69, %c0_70] {strides = array<i32: 16, 1>} : memref<32x128xf32, #tpu.memory_space<vmem>>, vector<2x128xf32>
    %c5 = arith.constant 5 : index
    %c0_71 = arith.constant 0 : index
    %171 = tpu.strided_load %arg17[%c5, %c0_71] {strides = array<i32: 16, 1>} : memref<32x128xf32, #tpu.memory_space<vmem>>, vector<2x128xf32>
    %c6 = arith.constant 6 : index
    %c0_72 = arith.constant 0 : index
    %172 = tpu.strided_load %arg17[%c6, %c0_72] {strides = array<i32: 16, 1>} : memref<32x128xf32, #tpu.memory_space<vmem>>, vector<2x128xf32>
    %c7 = arith.constant 7 : index
    %c0_73 = arith.constant 0 : index
    %173 = tpu.strided_load %arg17[%c7, %c0_73] {strides = array<i32: 16, 1>} : memref<32x128xf32, #tpu.memory_space<vmem>>, vector<2x128xf32>
    %c8 = arith.constant 8 : index
    %c0_74 = arith.constant 0 : index
    %174 = tpu.strided_load %arg17[%c8, %c0_74] {strides = array<i32: 16, 1>} : memref<32x128xf32, #tpu.memory_space<vmem>>, vector<2x128xf32>
    %c9 = arith.constant 9 : index
    %c0_75 = arith.constant 0 : index
    %175 = tpu.strided_load %arg17[%c9, %c0_75] {strides = array<i32: 16, 1>} : memref<32x128xf32, #tpu.memory_space<vmem>>, vector<2x128xf32>
    %c10 = arith.constant 10 : index
    %c0_76 = arith.constant 0 : index
    %176 = tpu.strided_load %arg17[%c10, %c0_76] {strides = array<i32: 16, 1>} : memref<32x128xf32, #tpu.memory_space<vmem>>, vector<2x128xf32>
    %c11 = arith.constant 11 : index
    %c0_77 = arith.constant 0 : index
    %177 = tpu.strided_load %arg17[%c11, %c0_77] {strides = array<i32: 16, 1>} : memref<32x128xf32, #tpu.memory_space<vmem>>, vector<2x128xf32>
    %c12 = arith.constant 12 : index
    %c0_78 = arith.constant 0 : index
    %178 = tpu.strided_load %arg17[%c12, %c0_78] {strides = array<i32: 16, 1>} : memref<32x128xf32, #tpu.memory_space<vmem>>, vector<2x128xf32>
    %c13 = arith.constant 13 : index
    %c0_79 = arith.constant 0 : index
    %179 = tpu.strided_load %arg17[%c13, %c0_79] {strides = array<i32: 16, 1>} : memref<32x128xf32, #tpu.memory_space<vmem>>, vector<2x128xf32>
    %c14 = arith.constant 14 : index
    %c0_80 = arith.constant 0 : index
    %180 = tpu.strided_load %arg17[%c14, %c0_80] {strides = array<i32: 16, 1>} : memref<32x128xf32, #tpu.memory_space<vmem>>, vector<2x128xf32>
    %c15 = arith.constant 15 : index
    %c0_81 = arith.constant 0 : index
    %181 = tpu.strided_load %arg17[%c15, %c0_81] {strides = array<i32: 16, 1>} : memref<32x128xf32, #tpu.memory_space<vmem>>, vector<2x128xf32>
    %182 = tpu.concatenate %166, %167, %168, %169, %170, %171, %172, %173, %174, %175, %176, %177, %178, %179, %180, %181 in 1 : vector<2x128xf32>, vector<2x128xf32>, vector<2x128xf32>, vector<2x128xf32>, vector<2x128xf32>, vector<2x128xf32>, vector<2x128xf32>, vector<2x128xf32>, vector<2x128xf32>, vector<2x128xf32>, vector<2x128xf32>, vector<2x128xf32>, vector<2x128xf32>, vector<2x128xf32>, vector<2x128xf32>, vector<2x128xf32> -> vector<2x2048xf32>
    %183 = arith.truncf %182 : vector<2x2048xf32> to vector<2x2048xbf16>
    %c0_82 = arith.constant 0 : index
    %c0_83 = arith.constant 0 : index
    %184 = vector.load %arg10[%c0_82, %c0_83] : memref<2048x256xbf16, #tpu.memory_space<vmem>>, vector<2048x256xbf16>
    %cst_84 = arith.constant dense<0.000000e+00> : vector<2x256xf32>
    %185 = tpu.matmul %183, %184, %cst_84 {dimension_numbers = #tpu.dot_dimension_numbers<[1], [0], [0], [1], [0, 0, 1, 1], [], []>} : vector<2x2048xbf16>, vector<2048x256xbf16>, vector<2x256xf32> -> vector<2x256xf32>
    %c0_85 = arith.constant 0 : index
    %c0_86 = arith.constant 0 : index
    %186 = vector.load %arg11[%c0_85, %c0_86] : memref<1x256xf32, #tpu.memory_space<vmem>>, vector<1x256xf32>
    %187 = vector.broadcast %186 : vector<1x256xf32> to vector<2x256xf32>
    %188 = arith.addf %185, %187 : vector<2x256xf32>
    %c0_87 = arith.constant 0 : index
    %c0_88 = arith.constant 0 : index
    %189 = vector.load %arg12[%c0_87, %c0_88] : memref<1x256xf32, #tpu.memory_space<vmem>>, vector<1x256xf32>
    %c0_89 = arith.constant 0 : index
    %c0_90 = arith.constant 0 : index
    %190 = vector.load %arg13[%c0_89, %c0_90] : memref<1x256xf32, #tpu.memory_space<vmem>>, vector<1x256xf32>
    %cst_91 = arith.constant dense<0.000000e+00> : vector<256xf32>
    %191 = vector.multi_reduction <add>, %188, %cst_91 [0] : vector<2x256xf32> to vector<256xf32>
    %192 = vector.shape_cast %191 : vector<256xf32> to vector<1x256xf32>
    %cst_92 = arith.constant 2.000000e+00 : f32
    %193 = vector.broadcast %cst_92 : f32 to vector<1x256xf32>
    %194 = arith.divf %192, %193 : vector<1x256xf32>
    %195 = arith.mulf %188, %188 : vector<2x256xf32>
    %cst_93 = arith.constant dense<0.000000e+00> : vector<256xf32>
    %196 = vector.multi_reduction <add>, %195, %cst_93 [0] : vector<2x256xf32> to vector<256xf32>
    %197 = vector.shape_cast %196 : vector<256xf32> to vector<1x256xf32>
    %cst_94 = arith.constant 2.000000e+00 : f32
    %198 = vector.broadcast %cst_94 : f32 to vector<1x256xf32>
    %199 = arith.divf %197, %198 : vector<1x256xf32>
    %200 = arith.mulf %194, %194 : vector<1x256xf32>
    %201 = arith.subf %199, %200 : vector<1x256xf32>
    %202 = vector.broadcast %194 : vector<1x256xf32> to vector<2x256xf32>
    %203 = arith.subf %188, %202 : vector<2x256xf32>
    %cst_95 = arith.constant 9.99999974E-6 : f32
    %204 = vector.broadcast %cst_95 : f32 to vector<1x256xf32>
    %205 = arith.addf %201, %204 : vector<1x256xf32>
    %206 = math.rsqrt %205 : vector<1x256xf32>
    %207 = vector.broadcast %206 : vector<1x256xf32> to vector<2x256xf32>
    %208 = arith.mulf %203, %207 : vector<2x256xf32>
    %209 = vector.broadcast %189 : vector<1x256xf32> to vector<2x256xf32>
    %210 = arith.mulf %208, %209 : vector<2x256xf32>
    %211 = vector.broadcast %190 : vector<1x256xf32> to vector<2x256xf32>
    %212 = arith.addf %210, %211 : vector<2x256xf32>
    %cst_96 = arith.constant 0.000000e+00 : f32
    %213 = vector.broadcast %cst_96 : f32 to vector<2x256xf32>
    %214 = arith.cmpf oge, %212, %213 : vector<2x256xf32>
    %cst_97 = arith.constant 0.00999999977 : f32
    %215 = vector.broadcast %cst_97 : f32 to vector<2x256xf32>
    %216 = arith.mulf %215, %212 : vector<2x256xf32>
    %217 = arith.select %214, %212, %216 : vector<2x256xi1>, vector<2x256xf32>
    %218 = arith.truncf %217 : vector<2x256xf32> to vector<2x256xbf16>
    %c0_98 = arith.constant 0 : index
    %c0_99 = arith.constant 0 : index
    %219 = vector.load %arg14[%c0_98, %c0_99] : memref<256x128xbf16, #tpu.memory_space<vmem>>, vector<256x128xbf16>
    %cst_100 = arith.constant dense<0.000000e+00> : vector<2x128xf32>
    %220 = tpu.matmul %218, %219, %cst_100 {dimension_numbers = #tpu.dot_dimension_numbers<[1], [0], [0], [1], [0, 0, 1, 1], [], []>} : vector<2x256xbf16>, vector<256x128xbf16>, vector<2x128xf32> -> vector<2x128xf32>
    %c0_101 = arith.constant 0 : index
    %c0_102 = arith.constant 0 : index
    %221 = vector.load %arg15[%c0_101, %c0_102] : memref<1x128xf32, #tpu.memory_space<vmem>>, vector<1x128xf32>
    %222 = vector.broadcast %221 : vector<1x128xf32> to vector<2x128xf32>
    %223 = arith.addf %220, %222 : vector<2x128xf32>
    %cst_103 = arith.constant 0.000000e+00 : f32
    %224 = vector.broadcast %cst_103 : f32 to vector<2x128xf32>
    %225 = arith.cmpf oge, %223, %224 : vector<2x128xf32>
    %cst_104 = arith.constant 0.00999999977 : f32
    %226 = vector.broadcast %cst_104 : f32 to vector<2x128xf32>
    %227 = arith.mulf %226, %223 : vector<2x128xf32>
    %228 = arith.select %225, %223, %227 : vector<2x128xi1>, vector<2x128xf32>
    %c0_105 = arith.constant 0 : index
    %c0_106 = arith.constant 0 : index
    %229 = vector.load %arg16[%c0_105, %c0_106] : memref<2x128xf32, #tpu.memory_space<vmem>>, vector<2x128xf32>
    tpu.vector_store %arg16[%c0_105, %c0_106], %228 {strides = array<i32>} : memref<2x128xf32, #tpu.memory_space<vmem>>, vector<2x128xf32>,
    return
  }
}

</mosaic_0001>

<bundles_post_ra>
// kernel: latent_clf_forward.1
= control target key start
LH: loop header
LB: loop body
LE: loop exit
PB: predicated region body
PF: predicated region fallthrough
CT: control target
= control target key end

     0   :  { %s7036_s0 = inlined_call_operand.vmem [shape: f32[128,1], index: 0, kind: input, shape index: {}]   ;;  %s7037_s1 = inlined_call_operand.vmem [shape: f32[128,1], index: 1, kind: input, shape index: {}]   ;;  %s7038_s2 = inlined_call_operand.vmem [shape: f32[5,64], index: 2, kind: input, shape index: {}]   ;;  %s7039_s3 = inlined_call_operand.vmem [shape: f32[1,64], index: 3, kind: input, shape index: {}]   ;;  %s7040_s4 = inlined_call_operand.vmem [shape: f32[1,64], index: 4, kind: input, shape index: {}]   ;;  %s7041_s5 = inlined_call_operand.vmem [shape: f32[1,64], index: 5, kind: input, shape index: {}]   ;;  %s7042_s6 = inlined_call_operand.vmem [shape: bf16[320,128], index: 6, kind: input, shape index: {}]   ;;  %s7043_s7 = inlined_call_operand.vmem [shape: f32[1,128], index: 7, kind: input, shape index: {}]   ;;  %s7044_s8 = inlined_call_operand.vmem [shape: f32[1,128], index: 8, kind: input, shape index: {}]   ;;  %s7045_s9 = inlined_call_operand.vmem [shape: f32[1,128], index: 9, kind: input, shape index: {}]   ;;  %s7046_s10 = inlined_call_operand.hbm [shape: bf16[2048,256], index: 10, kind: input, shape index: {}]   ;;  %s7047_s11 = inlined_call_operand.vmem [shape: f32[1,256], index: 11, kind: input, shape index: {}]   ;;  %s7048_s12 = inlined_call_operand.vmem [shape: f32[1,256], index: 12, kind: input, shape index: {}]   ;;  %s7049_s13 = inlined_call_operand.vmem [shape: f32[1,256], index: 13, kind: input, shape index: {}]   ;;  %s7050_s14 = inlined_call_operand.vmem [shape: bf16[256,128], index: 14, kind: input, shape index: {}]   ;;  %s7051_s15 = inlined_call_operand.vmem [shape: f32[1,128], index: 15, kind: input, shape index: {}]   ;;  %s7052_s16 = inlined_call_operand.hbm [shape: f32[2,128], index: 16, kind: output, shape index: {}]  }
   0x1   :  { %7072 = sst [smem:[#allocation24_spill]] %s7036_s0 }
   0x2   :  { %21 = vsyncpa [#allocation4], 0 }
   0x3   :  { %22 = vsyncpa [#allocation5], 0  ;;  %s5542_s21 = smov [#allocation3]   ;;  %s5494_s25 = scalar_lea.hbm %s7046_s10, 32768 }
   0x4   :  { %s48_s22 = sshll.u32 %s5542_s21, 4  ;;  %p5495_p0 = scmp.ne.s32.totalorder %s7046_s10, %s5494_s25  ;;  %s49_s22 = int_to_ptr.vmem [resolvable:$true] %s48_s22 }
   0x5   :  { %p5498_p1 = scmp.lt.u32.totalorder %s5494_s25, %s7046_s10 }
   0x7   :  { %p5500_p2 = pnand %p5498_p1, %p5495_p0 }
   0x9   :  { %5503 = shalt.err (!%p5500_p2)
}
   0xa   :  { %s5504_s30 = scalar_lea.vmem %s49_s22, 32768  ;;  %p5509_p4 = scmp.lt.s32.totalorder %s49_s22, %s49_s22 }
   0xb   :  { %p5505_p3 = scmp.ne.s32.totalorder %s49_s22, %s5504_s30  ;;  %p5510_p5 = scmp.lt.s32.totalorder %s5504_s30, %s5504_s30 }
   0xd   :  { %p5511_p6 = por %p5510_p5, %p5509_p4 }
   0xf   :  { %p5512_p7 = pnand %p5511_p6, %p5505_p3 }
  0x11   :  { %5515 = shalt.err (!%p5512_p7)
}
  0x12   :  { %s5543_s0 = smov 128   ;;  %s5544_s17 = smov 8  }
  0x13   :  { %54 = dma.hbm_to_vmem [thread:$0]  %s7046_s10, 32768, %s49_s22, [#allocation4], %s5543_s0, %s5543_s0, %s5544_s17  }
  0x14   :  { %5538 = dma.done.wait [#allocation4], 32768  }
  0x15   :  { %5539 = vsyncadd [#allocation4], 4294934528  ;;  %v101_v0 = vlaneseq  ;;  %v5545_v1 = vmov 0   ;;  %v85_v3 = vld [vmem:[%s7037_s1] sm:$0xff]  ;;  %v86_v4 = vld [vmem:[%s7037_s1 + $0x8] sm:$0xff]  ;;  %s7073_s22 = sld [smem:[#allocation24_spill]] }
  0x16   :  { %5043 = vset.pattern.permute.xlu1 %v5545_v1  ;;  %5042 = vset.pattern.permute.xlu0 %v5545_v1  ;;  %v391_v6 = vrot.slane %v85_v3, 7  ;;  %v392_v7 = vrot.slane %v86_v4, 7  ;;  %v87_v10 = vld [vmem:[%s7037_s1 + $0x10] sm:$0xff]  ;;  %v5677_v16 = vld [vmem:[%s7037_s1 + $0x78] sm:$0xff]  ;;  %v89_v36 = vld [vmem:[%s7037_s1 + $0x20] sm:$0xff]  ;;  %vm7056_vm6 = vcmask 523264  }
  0x17   :  { %v5645_v2 = vshrl.u32 %v101_v0, 7  ;;  %v393_v13 = vrot.slane %v87_v10, 7  ;;  %v406_v22 = vrot.slane %v5677_v16, 7  ;;  %v88_v25 = vld [vmem:[%s7037_s1 + $0x18] sm:$0xff]  ;;  %v395_v38 = vrot.slane %v89_v36, 7  ;;  %v90_v46 = vld [vmem:[%s7037_s1 + $0x28] sm:$0xff] }
  0x18   :  { %v394_v29 = vrot.slane %v88_v25, 7  ;;  %v396_v49 = vrot.slane %v90_v46, 7  ;;  %v91_v50 = vld [vmem:[%s7037_s1 + $0x30] sm:$0xff]  ;;  %v92_v61 = vld [vmem:[%s7037_s1 + $0x38] sm:$0xff]  ;;  %v93_v0 = vld [vmem:[%s7037_s1 + $0x40] sm:$0xff]  ;;  %vm1352_vm7 = vcmask 517120  }
  0x19   :  { %vm358_vm0 = vcmp.lt.s32.totalorder %v5645_v2, 1  ;;  %v122_v21 = vand.u32 63, %v5645_v2  ;;  %vm7057_vm2 = vcmp.lt.s32.totalorder %v5645_v2, 7  ;;  %v397_v55 = vrot.slane %v91_v50, 7  ;;  %s5546_s17 = smov 64   ;;  %s5547_s20 = smov [#allocation6]  }
  0x1a   :  { %v421_v15 = vsel %vm358_vm0, %v391_v6, %v392_v7  ;;  %v420_v19 = vsel %vm358_vm0, %v392_v7, %v393_v13  ;;  %v422_v24 = vsel %vm358_vm0, %v406_v22, %v391_v6  ;;  %v419_v32 = vsel %vm358_vm0, %v393_v13, %v394_v29  ;;  %s4625_s21 = sshll.u32 %s5547_s20, 4  ;;  %s4626_s21 = int_to_ptr.vmem [resolvable:$true] %s4625_s21 }
  0x1b   :  { %v5657_v5 = vld [vmem:[%s7073_s22] sm:$0xff]  ;;  %v70_v8 = vld [vmem:[%s7073_s22 + $0x8] sm:$0xff]  ;;  %v5669_v11 = vld [vmem:[%s7073_s22 + $0x10] sm:$0xff]  ;;  %597 = vperm.xlu1 %5043, %v421_v15   ;;  %vm310_vm1 = vcmp.eq.s32.totalorder %v122_v21, 0  ;;  %v418_v42 = vsel %vm358_vm0, %v394_v29, %v395_v38  ;;  %v417_v53 = vsel %vm358_vm0, %v395_v38, %v396_v49  ;;  %v416_v58 = vsel %vm358_vm0, %v396_v49, %v397_v55  ;;  %s5516_s23 = scalar_lea.vmem %s4626_s21, 32  ;;  %p5521_p9 = scmp.lt.s32.totalorder %s4626_s21, %s4626_s21 }
  0x1c   :  { %v342_v9 = vrot.slane %v5657_v5, 7  ;;  %v343_v12 = vrot.slane %v70_v8, 7  ;;  %v344_v14 = vrot.slane %v5669_v11, 7  ;;  %v5684_v18 = vld [vmem:[%s7073_s22 + $0x78] sm:$0xff]  ;;  %v423_v28 = vsel %vm310_vm1, 0.0, %v422_v24  ;;  %v5718_v34 = vld [vmem:[%s7073_s22 + $0x20] sm:$0xff]  ;;  %p5517_p8 = scmp.ne.s32.totalorder %s4626_s21, %s5516_s23  ;;  %p5522_p10 = scmp.lt.s32.totalorder %s5516_s23, %s5516_s23 }
  0x1d   :  { %v357_v23 = vrot.slane %v5684_v18, 7  ;;  %v5707_v27 = vld [vmem:[%s7073_s22 + $0x18] sm:$0xff]  ;;  %v346_v35 = vrot.slane %v5718_v34, 7  ;;  %v5731_v39 = vld [vmem:[%s7073_s22 + $0x28] sm:$0xff]  ;;  %v439_v40 = vrot.slane %v5657_v5, 1  ;;  %v440_v41 = vrot.slane %v70_v8, 1 }
  0x1e   :  { %v373_v17 = vsel %vm358_vm0, %v342_v9, %v343_v12  ;;  %v372_v20 = vsel %vm358_vm0, %v343_v12, %v344_v14  ;;  %v345_v31 = vrot.slane %v5707_v27, 7  ;;  %v347_v44 = vrot.slane %v5731_v39, 7  ;;  %v5757_v52 = vld [vmem:[%s7073_s22 + $0x30] sm:$0xff]  ;;  %v5768_v57 = vld [vmem:[%s7073_s22 + $0x38] sm:$0xff]  ;;  %v5791_v6 = vld [vmem:[%s7073_s22 + $0x40] sm:$0xff]  ;;  %p5523_p11 = por %p5522_p10, %p5521_p9 }
  0x1f   :  { %496 = vperm.xlu0 %5042, %v373_v17   ;;  %602 = vperm.xlu1 %5043, %v420_v19   ;;  %v374_v26 = vsel %vm358_vm0, %v357_v23, %v342_v9  ;;  %v470_v43 = vsel %vm7057_vm2, %v439_v40, %v440_v41  ;;  %v441_v45 = vrot.slane %v5669_v11, 1  ;;  %v442_v51 = vrot.slane %v5707_v27, 1  ;;  %v5807_v15 = vld [vmem:[%s7073_s22 + $0x48] sm:$0xff] }
  0x20   :  { %v375_v30 = vsel %vm310_vm1, 0.0, %v374_v26  ;;  %v371_v33 = vsel %vm358_vm0, %v344_v14, %v345_v31  ;;  %v370_v37 = vsel %vm358_vm0, %v345_v31, %v346_v35  ;;  %v369_v47 = vsel %vm358_vm0, %v346_v35, %v347_v44  ;;  %v94_v21 = vld [vmem:[%s7037_s1 + $0x48] sm:$0xff]  ;;  %p5524_p12 = pnand %p5523_p11, %p5517_p8 }
  0x21   :  { %v469_v48 = vsel %vm7057_vm2, %v440_v41, %v441_v45  ;;  %v468_v54 = vsel %vm7057_vm2, %v441_v45, %v442_v51  ;;  %v348_v56 = vrot.slane %v5757_v52, 7  ;;  %v349_v60 = vrot.slane %v5768_v57, 7 }
  0x22   :  { %v443_v62 = vrot.slane %v5718_v34, 1  ;;  %v444_v7 = vrot.slane %v5731_v39, 1  ;;  %v445_v24 = vrot.slane %v5757_v52, 1  ;;  %v446_v29 = vrot.slane %v5768_v57, 1 }
  0x23   :  { %501 = vperm.xlu0 %5042, %v372_v20   ;;  %714 = vperm.xlu1 %5043, %v70_v8   ;;  %v368_v59 = vsel %vm358_vm0, %v347_v44, %v348_v56  ;;  %v367_v63 = vsel %vm358_vm0, %v348_v56, %v349_v60  ;;  %v351_v20 = vrot.slane %v5807_v15, 7  ;;  %v109_v35 = vadd.s32 56, %v5645_v2 }
  0x24   :  { %v467_v1 = vsel %vm7057_vm2, %v442_v51, %v443_v62  ;;  %v466_v12 = vsel %vm7057_vm2, %v443_v62, %v444_v7  ;;  %v465_v26 = vsel %vm7057_vm2, %v444_v7, %v445_v24  ;;  %v447_v41 = vrot.slane %v5791_v6, 1 }
  0x25   :  { %v448_v49 = vrot.slane %v5807_v15, 1 }
  0x26   :  { %v463_v44 = vsel %vm7057_vm2, %v446_v29, %v447_v41 }
  0x27   :  { %709 = vperm.xlu0 %5042, %v5657_v5   ;;  %592 = vperm.xlu1 %5043, %v423_v28   ;;  %v95_v28 = vld [vmem:[%s7037_s1 + $0x50] sm:$0xff] }
  0x2b   :  { %491 = vperm.xlu0 %5042, %v375_v30   ;;  %607 = vperm.xlu1 %5043, %v419_v32   ;;  %v5826_v30 = vld [vmem:[%s7073_s22 + $0x50] sm:$0xff]  ;;  %v464_v32 = vsel %vm7057_vm2, %v445_v24, %v446_v29 }
  0x2f   :  { %506 = vperm.xlu0 %5042, %v371_v33   ;;  %826 = vperm.xlu1 %5043, %v85_v3   ;;  %v398_v3 = vrot.slane %v92_v61, 7  ;;  %v401_v33 = vrot.slane %v95_v28, 7 }
  0x31   :  { %v415_v8 = vsel %vm358_vm0, %v397_v55, %v398_v3  ;;  %v5872_v55 = vld [vmem:[%s7073_s22 + $0x68] sm:$0xff] }
  0x33   :  { %719 = vperm.xlu0 %5042, %v5669_v11   ;;  %511 = vperm.xlu1 %5043, %v370_v37   ;;  %v350_v11 = vrot.slane %v5791_v6, 7 }
  0x35   :  { %v366_v14 = vsel %vm358_vm0, %v349_v60, %v350_v11  ;;  %v355_v60 = vrot.slane %v5872_v55, 7 }
  0x37   :  { %831 = vperm.xlu0 %5042, %v86_v4   ;;  %724 = vperm.xlu1 %5043, %v5707_v27   ;;  %v110_v4 = vadd.s32 64, %v5645_v2  ;;  %v400_v27 = vrot.slane %v94_v21, 7 }
  0x39   :  { %v178_v9 = vand.u32 63, %v110_v4  ;;  %v412_v37 = vsel %vm358_vm0, %v400_v27, %v401_v33  ;;  %v5901_v4 = vld [vmem:[%s7073_s22 + $0x70] sm:$0xff] }
  0x3b   :  { %612 = vperm.xlu0 %5042, %v418_v42   ;;  %943 = vperm.xlu1 %5043, %v470_v43   ;;  %vm318_vm3 = vcmp.eq.s32.totalorder %v178_v9, 0  ;;  %v96_v43 = vld [vmem:[%s7037_s1 + $0x58] sm:$0xff]  ;;  %v5912_v9 = vld [vmem:[%s7038_s2 + $0x1] ss:$0 sm:$0xff] }
  0x3c   :  { %v383_v19 = vsel %vm318_vm3, 0.0, %v366_v14 }
  0x3f   :  { %836 = vperm.xlu0 %5042, %v87_v10   ;;  %516 = vperm.xlu1 %5043, %v369_v47   ;;  %v399_v10 = vrot.slane %v93_v0, 7  ;;  %v402_v47 = vrot.slane %v96_v43, 7 }
  0x41   :  { %v414_v13 = vsel %vm358_vm0, %v398_v3, %v399_v10  ;;  %v413_v31 = vsel %vm358_vm0, %v399_v10, %v400_v27  ;;  %v411_v51 = vsel %vm358_vm0, %v401_v33, %v402_v47  ;;  %v5932_v27 = vld [vmem:[%s7038_s2 + $0x2] ss:$0 sm:$0xff] }
  0x42   :  { %v431_v17 = vsel %vm318_vm3, 0.0, %v414_v13  ;;  %vm1577_vm3 = vcmask 519170  }
  0x43   :  { %948 = vperm.xlu0 %5042, %v469_v48   ;;  %729 = vperm.xlu1 %5043, %v5718_v34   ;;  %v352_v34 = vrot.slane %v5826_v30, 7  ;;  %v97_v48 = vld [vmem:[%s7037_s1 + $0x60] sm:$0xff] }
  0x45   :  { %v364_v38 = vsel %vm358_vm0, %v351_v20, %v352_v34 }
  0x47   :  { %617 = vperm.xlu0 %5042, %v417_v53   ;;  %953 = vperm.xlu1 %5043, %v468_v54   ;;  %v403_v53 = vrot.slane %v97_v48, 7 }
  0x49   :  { %v410_v56 = vsel %vm358_vm0, %v402_v47, %v403_v53 }
  0x4b   :  { %841 = vperm.xlu0 %5042, %v88_v25   ;;  %622 = vperm.xlu1 %5043, %v416_v58   ;;  %v365_v25 = vsel %vm358_vm0, %v350_v11, %v351_v20  ;;  %v5919_v11 = vld [vmem:[%s7038_s2] ss:$0 sm:$0xff] }
  0x4f   :  { %521 = vperm.xlu0 %5042, %v368_v59   ;;  %846 = vperm.xlu1 %5043, %v89_v36   ;;  %v5838_v36 = vld [vmem:[%s7073_s22 + $0x58] sm:$0xff]  ;;  %v5886_v59 = vld [vmem:[%s7037_s1 + $0x70] sm:$0xff] }
  0x50   :  { %v353_v42 = vrot.slane %v5838_v36, 7 }
  0x52   :  { %v363_v45 = vsel %vm358_vm0, %v352_v34, %v353_v42  ;;  %v452_v34 = vrot.slane %v5872_v55, 1 }
  0x53   :  { %734 = vperm.xlu0 %5042, %v5731_v39   ;;  %526 = vperm.xlu1 %5043, %v367_v63   ;;  %v171_v39 = vand.u32 63, %v109_v35  ;;  %v450_v63 = vrot.slane %v5838_v36, 1 }
  0x55   :  { %vm333_vm4 = vcmp.eq.s32.totalorder %v171_v39, 63 }
  0x57   :  { %958 = vperm.xlu0 %5042, %v467_v1   ;;  %739 = vperm.xlu1 %5043, %v5757_v52   ;;  %v462_v52 = vsel %vm7057_vm2, %v447_v41, %v448_v49  ;;  %v117_v41 = vadd.s32 120, %v5645_v2 }
  0x5b   :  { %627 = vperm.xlu0 %5042, %v415_v8   ;;  %963 = vperm.xlu1 %5043, %v466_v12   ;;  %v356_v8 = vrot.slane %v5901_v4, 7 }
  0x5d   :  { %v360_v12 = vsel %vm358_vm0, %v355_v60, %v356_v8 }
  0x5f   :  { %851 = vperm.xlu0 %5042, %v90_v46   ;;  %632 = vperm.xlu1 %5043, %v431_v17   ;;  %v479_v46 = vsel %vm333_vm4, 0.0, %v463_v44  ;;  %vm1890_vm4 = vcmask 1041409  }
  0x63   :  { %531 = vperm.xlu0 %5042, %v383_v19   ;;  %856 = vperm.xlu1 %5043, %v91_v50   ;;  %v5861_v50 = vld [vmem:[%s7073_s22 + $0x60] sm:$0xff] }
  0x64   :  { %v354_v54 = vrot.slane %v5861_v50, 7  ;;  %v451_v19 = vrot.slane %v5861_v50, 1 }
  0x66   :  { %v362_v58 = vsel %vm358_vm0, %v353_v42, %v354_v54  ;;  %v361_v1 = vsel %vm358_vm0, %v354_v54, %v355_v60  ;;  %v459_v29 = vsel %vm7057_vm2, %v450_v63, %v451_v19  ;;  %v458_v39 = vsel %vm7057_vm2, %v451_v19, %v452_v34 }
  0x67   :  { %744 = vperm.xlu0 %5042, %v5768_v57   ;;  %536 = vperm.xlu1 %5043, %v365_v25   ;;  %v5879_v57 = vld [vmem:[%s7037_s1 + $0x68] sm:$0xff] }
  0x68   :  { %v404_v62 = vrot.slane %v5879_v57, 7 }
  0x6b   :  { %968 = vperm.xlu0 %5042, %v465_v26   ;;  %749 = vperm.xlu1 %5043, %v5791_v6   ;;  %v409_v6 = vsel %vm358_vm0, %v403_v53, %v404_v62 }
  0x6f   :  { %637 = vperm.xlu0 %5042, %v413_v31   ;;  %973 = vperm.xlu1 %5043, %v464_v32  }
  0x73   :  { %861 = vperm.xlu0 %5042, %v92_v61   ;;  %642 = vperm.xlu1 %5043, %v412_v37   ;;  %v449_v61 = vrot.slane %v5826_v30, 1 }
  0x75   :  { %v461_v3 = vsel %vm7057_vm2, %v448_v49, %v449_v61  ;;  %v460_v7 = vsel %vm7057_vm2, %v449_v61, %v450_v63  ;;  %v227_v49 = vand.u32 63, %v117_v41 }
  0x77   :  { %541 = vperm.xlu0 %5042, %v364_v38   ;;  %866 = vperm.xlu1 %5043, %v93_v0   ;;  %v405_v0 = vrot.slane %v5886_v59, 7  ;;  %vm341_vm5 = vcmp.eq.s32.totalorder %v227_v49, 63 }
  0x79   :  { %v408_v10 = vsel %vm358_vm0, %v404_v62, %v405_v0  ;;  %v407_v18 = vsel %vm358_vm0, %v405_v0, %v406_v22 }
  0x7b   :  { %754 = vperm.xlu0 %5042, %v5807_v15   ;;  %546 = vperm.xlu1 %5043, %v363_v45  }
  0x7f   :  { %978 = vperm.xlu0 %5042, %v479_v46   ;;  %759 = vperm.xlu1 %5043, %v5826_v30   ;;  %v5959_v46 = vld [vmem:[%s7038_s2 + $0x3] ss:$0 sm:$0xff] }
  0x83   :  { %647 = vperm.xlu0 %5042, %v411_v51   ;;  %983 = vperm.xlu1 %5043, %v462_v52  }
  0x87   :  { %871 = vperm.xlu0 %5042, %v94_v21   ;;  %652 = vperm.xlu1 %5043, %v410_v56  }
  0x8b   :  { %551 = vperm.xlu0 %5042, %v362_v58   ;;  %876 = vperm.xlu1 %5043, %v95_v28   ;;  %v359_v28 = vsel %vm358_vm0, %v356_v8, %v357_v23 }
  0x8f   :  { %764 = vperm.xlu0 %5042, %v5838_v36   ;;  %556 = vperm.xlu1 %5043, %v361_v1  }
  0x93   :  { %988 = vperm.xlu0 %5042, %v461_v3   ;;  %769 = vperm.xlu1 %5043, %v5861_v50   ;;  %v5492_v50 = vld [vmem:[%s7073_s22 + $0x78] sm:$0xff] }
  0x94   :  { %v454_v51 = vrot.slane %v5492_v50, 1 }
  0x96   :  { %v471_v60 = vsel %vm7057_vm2, %v454_v51, %v439_v40 }
  0x97   :  { %657 = vperm.xlu0 %5042, %v409_v6   ;;  %993 = vperm.xlu1 %5043, %v460_v7   ;;  %v487_v1 = vsel %vm341_vm5, 0.0, %v471_v60  ;;  %vm1892_vm5 = vcmask 1042434  }
  0x9a   :  { %v598_v13 = vpop.permute.xlu1 %597 }
  0x9b   :  { %881 = vperm.xlu0 %5042, %v96_v43   ;;  %v675_v14 = vmul.f32 %v5912_v9, %v598_v13  ;;  %662 = vperm.xlu1 %5043, %v408_v10   ;;  %v5986_v10 = vld [vmem:[%s7038_s2 + $0x4] ss:$0 sm:$0xff] }
  0x9e   :  { %v497_v15 = vpop.permute.xlu0 %496  ;;  %v603_v21 = vpop.permute.xlu1 %602 }
  0x9f   :  { %v574_v17 = vmul.f32 %v5919_v11, %v497_v15  ;;  %561 = vperm.xlu0 %5042, %v360_v12   ;;  %v676_v24 = vmul.f32 %v5912_v9, %v603_v21  ;;  %886 = vperm.xlu1 %5043, %v97_v48   ;;  %v453_v48 = vrot.slane %v5901_v4, 1 }
  0xa1   :  { %v691_v20 = vadd.f32 %v675_v14, %v574_v17  ;;  %v457_v58 = vsel %vm7057_vm2, %v452_v34, %v453_v48  ;;  %v456_v3 = vsel %vm7057_vm2, %v453_v48, %v454_v51 }
  0xa2   :  { %v502_v25 = vpop.permute.xlu0 %501  ;;  %v715_v31 = vpop.permute.xlu1 %714 }
  0xa3   :  { %v575_v26 = vmul.f32 %v5919_v11, %v502_v25  ;;  %774 = vperm.xlu0 %5042, %v5872_v55   ;;  %v792_v32 = vmul.f32 %v5932_v27, %v715_v31  ;;  %566 = vperm.xlu1 %5043, %v359_v28  }
  0xa5   :  { %v692_v30 = vadd.f32 %v676_v24, %v575_v26  ;;  %v808_v35 = vadd.f32 %v792_v32, %v691_v20  ;;  %v5993_v20 = vld [vmem:[%s7039_s3] ss:$0 sm:$0xff] }
  0xa6   :  { %v710_v33 = vpop.permute.xlu0 %709  ;;  %v593_v36 = vpop.permute.xlu1 %592 }
  0xa7   :  { %998 = vperm.xlu0 %5042, %v459_v29   ;;  %v674_v23 = vmul.f32 %v5912_v9, %v593_v36  ;;  %779 = vperm.xlu1 %5043, %v5901_v4   ;;  %v791_v42 = vmul.f32 %v5932_v27, %v710_v33 }
  0xaa   :  { %v492_v37 = vpop.permute.xlu0 %491  ;;  %v608_v43 = vpop.permute.xlu1 %607 }
  0xab   :  { %v573_v38 = vmul.f32 %v5919_v11, %v492_v37  ;;  %667 = vperm.xlu0 %5042, %v407_v18   ;;  %v677_v22 = vmul.f32 %v5912_v9, %v608_v43  ;;  %1003 = vperm.xlu1 %5043, %v458_v39  }
  0xad   :  { %v690_v16 = vadd.f32 %v674_v23, %v573_v38 }
  0xae   :  { %v507_v44 = vpop.permute.xlu0 %506  ;;  %v827_v53 = vpop.permute.xlu1 %826 }
  0xaf   :  { %v576_v45 = vmul.f32 %v5919_v11, %v507_v44  ;;  %891 = vperm.xlu0 %5042, %v5879_v57   ;;  %v807_v47 = vadd.f32 %v791_v42, %v690_v16  ;;  %v908_v54 = vmul.f32 %v5959_v46, %v827_v53  ;;  %896 = vperm.xlu1 %5043, %v5886_v59   ;;  %v5493_v59 = vld [vmem:[%s7037_s1 + $0x78] sm:$0xff] }
  0xb1   :  { %v693_v52 = vadd.f32 %v677_v22, %v576_v45  ;;  %v924_v57 = vadd.f32 %v908_v54, %v807_v47 }
  0xb2   :  { %v720_v55 = vpop.permute.xlu0 %719  ;;  %v512_v62 = vpop.permute.xlu1 %511 }
  0xb3   :  { %v793_v56 = vmul.f32 %v5932_v27, %v720_v55  ;;  %784 = vperm.xlu0 %5042, %v5492_v50   ;;  %901 = vperm.xlu1 %5043, %v5493_v59   ;;  %v577_v7 = vmul.f32 %v5919_v11, %v512_v62 }
  0xb5   :  { %v809_v61 = vadd.f32 %v793_v56, %v692_v30 }
  0xb6   :  { %v832_v63 = vpop.permute.xlu0 %831  ;;  %v725_v5 = vpop.permute.xlu1 %724 }
  0xb7   :  { %v909_v0 = vmul.f32 %v5959_v46, %v832_v63  ;;  %1008 = vperm.xlu0 %5042, %v457_v58   ;;  %v794_v6 = vmul.f32 %v5932_v27, %v725_v5  ;;  %1018 = vperm.xlu1 %5043, %v487_v1  }
  0xb9   :  { %v925_v4 = vadd.f32 %v909_v0, %v808_v35  ;;  %v810_v12 = vadd.f32 %v794_v6, %v693_v52 }
  0xba   :  { %v613_v40 = vpop.permute.xlu0 %612  ;;  %v944_v14 = vpop.permute.xlu1 %943 }
  0xbb   :  { %v678_v8 = vmul.f32 %v5912_v9, %v613_v40  ;;  %1013 = vperm.xlu0 %5042, %v456_v3   ;;  %v1025_v15 = vmul.f32 %v5986_v10, %v944_v14 }
  0xbd   :  { %v694_v13 = vadd.f32 %v678_v8, %v577_v7  ;;  %v1041_v21 = vadd.f32 %v1025_v15, %v924_v57 }
  0xbe   :  { %v837_v17 = vpop.permute.xlu0 %836  ;;  %v517_v25 = vpop.permute.xlu1 %516 }
  0xbf   :  { %v910_v19 = vmul.f32 %v5959_v46, %v837_v17  ;;  %v5996_v28 = vadd.f32 %v5993_v20, %v1041_v21  ;;  %v578_v35 = vmul.f32 %v5919_v11, %v517_v25 }
  0xc1   :  { %v926_v24 = vadd.f32 %v910_v19, %v809_v61  ;;  %v1122_v34 = vmul.f32 %v5996_v28, %v5996_v28  ;;  %v1083_v37 = vsel %vm7056_vm6, %v5996_v28, 0.0 }
  0xc2   :  { %v949_v26 = vpop.permute.xlu0 %948  ;;  %v730_v31 = vpop.permute.xlu1 %729 }
  0xc3   :  { %v1026_v29 = vmul.f32 %v5986_v10, %v949_v26  ;;  %v795_v32 = vmul.f32 %v5932_v27, %v730_v31  ;;  %v1138_v44 = vsel %vm7056_vm6, %v1122_v34, 0.0 }
  0xc5   :  { %v1042_v30 = vadd.f32 %v1026_v29, %v925_v4  ;;  %v811_v23 = vadd.f32 %v795_v32, %v694_v13 }
  0xc6   :  { %v618_v33 = vpop.permute.xlu0 %617  ;;  %v954_v42 = vpop.permute.xlu1 %953 }
  0xc7   :  { %v6004_v18 = vadd.f32 %v5993_v20, %v1042_v30  ;;  %v679_v36 = vmul.f32 %v5912_v9, %v618_v33  ;;  %v1027_v43 = vmul.f32 %v5986_v10, %v954_v42 }
  0xc9   :  { %v1084_v38 = vsel %vm7056_vm6, %v6004_v18, 0.0  ;;  %v1123_v39 = vmul.f32 %v6004_v18, %v6004_v18  ;;  %v695_v41 = vadd.f32 %v679_v36, %v578_v35  ;;  %v1043_v49 = vadd.f32 %v1027_v43, %v926_v24 }
  0xca   :  { %v1085_v16 = vadd.f32 %v1084_v38, %v1083_v37  ;;  %v842_v22 = vpop.permute.xlu0 %841  ;;  %v623_v51 = vpop.permute.xlu1 %622 }
  0xcb   :  { %v1139_v45 = vsel %vm7056_vm6, %v1123_v39, 0.0  ;;  %v911_v47 = vmul.f32 %v5959_v46, %v842_v22  ;;  %v6018_v52 = vadd.f32 %v5993_v20, %v1043_v49  ;;  %v680_v53 = vmul.f32 %v5912_v9, %v623_v51 }
  0xcc   :  { %v1140_v48 = vadd.f32 %v1139_v45, %v1138_v44 }
  0xcd   :  { %v927_v50 = vadd.f32 %v911_v47, %v810_v12  ;;  %v1086_v56 = vsel %vm7056_vm6, %v6018_v52, 0.0  ;;  %v1124_v57 = vmul.f32 %v6018_v52, %v6018_v52 }
  0xce   :  { %v522_v54 = vpop.permute.xlu0 %521  ;;  %v1087_v58 = vadd.f32 %v1086_v56, %v1085_v16  ;;  %v847_v61 = vpop.permute.xlu1 %846 }
  0xcf   :  { %v579_v55 = vmul.f32 %v5919_v11, %v522_v54  ;;  %v1141_v62 = vsel %vm7056_vm6, %v1124_v57, 0.0  ;;  %v912_v63 = vmul.f32 %v5959_v46, %v847_v61 }
  0xd0   :  { %v1142_v0 = vadd.f32 %v1141_v62, %v1140_v48 }
  0xd1   :  { %v696_v60 = vadd.f32 %v680_v53, %v579_v55  ;;  %v928_v3 = vadd.f32 %v912_v63, %v811_v23 }
  0xd2   :  { %v735_v59 = vpop.permute.xlu0 %734  ;;  %v527_v5 = vpop.permute.xlu1 %526 }
  0xd3   :  { %v796_v1 = vmul.f32 %v5932_v27, %v735_v59  ;;  %v580_v14 = vmul.f32 %v5919_v11, %v527_v5 }
  0xd5   :  { %v812_v4 = vadd.f32 %v796_v1, %v695_v41 }
  0xd6   :  { %v959_v6 = vpop.permute.xlu0 %958  ;;  %v740_v8 = vpop.permute.xlu1 %739 }
  0xd7   :  { %v1028_v40 = vmul.f32 %v5986_v10, %v959_v6  ;;  %v797_v12 = vmul.f32 %v5932_v27, %v740_v8 }
  0xd9   :  { %v1044_v7 = vadd.f32 %v1028_v40, %v927_v50  ;;  %v813_v19 = vadd.f32 %v797_v12, %v696_v60 }
  0xda   :  { %v628_v13 = vpop.permute.xlu0 %627  ;;  %v964_v26 = vpop.permute.xlu1 %963 }
  0xdb   :  { %v6033_v15 = vadd.f32 %v5993_v20, %v1044_v7  ;;  %v681_v17 = vmul.f32 %v5912_v9, %v628_v13  ;;  %v1029_v30 = vmul.f32 %v5986_v10, %v964_v26 }
  0xdd   :  { %v1088_v21 = vsel %vm7056_vm6, %v6033_v15, 0.0  ;;  %v1125_v24 = vmul.f32 %v6033_v15, %v6033_v15  ;;  %v697_v25 = vadd.f32 %v681_v17, %v580_v14  ;;  %v1045_v35 = vadd.f32 %v1029_v30, %v928_v3 }
  0xde   :  { %v1089_v29 = vadd.f32 %v1088_v21, %v1087_v58  ;;  %v852_v31 = vpop.permute.xlu0 %851  ;;  %v633_v23 = vpop.permute.xlu1 %632 }
  0xdf   :  { %v1143_v32 = vsel %vm7056_vm6, %v1125_v24, 0.0  ;;  %v913_v33 = vmul.f32 %v5959_v46, %v852_v31  ;;  %v6044_v37 = vadd.f32 %v5993_v20, %v1045_v35  ;;  %v682_v38 = vmul.f32 %v5912_v9, %v633_v23 }
  0xe0   :  { %v1144_v34 = vadd.f32 %v1143_v32, %v1142_v0 }
  0xe1   :  { %v929_v36 = vadd.f32 %v913_v33, %v812_v4  ;;  %v1090_v42 = vsel %vm7056_vm6, %v6044_v37, 0.0  ;;  %v1126_v16 = vmul.f32 %v6044_v37, %v6044_v37 }
  0xe2   :  { %v532_v39 = vpop.permute.xlu0 %531  ;;  %v1091_v43 = vadd.f32 %v1090_v42, %v1089_v29  ;;  %v857_v44 = vpop.permute.xlu1 %856 }
  0xe3   :  { %v581_v41 = vmul.f32 %v5919_v11, %v532_v39  ;;  %v1145_v45 = vsel %vm7056_vm6, %v1126_v16, 0.0  ;;  %v914_v47 = vmul.f32 %v5959_v46, %v857_v44 }
  0xe4   :  { %v1146_v49 = vadd.f32 %v1145_v45, %v1144_v34 }
  0xe5   :  { %v6052_v22 = vadd.f32 %v682_v38, %v581_v41  ;;  %v930_v51 = vadd.f32 %v914_v47, %v813_v19 }
  0xe6   :  { %v745_v48 = vpop.permute.xlu0 %744  ;;  %v537_v54 = vpop.permute.xlu1 %536 }
  0xe7   :  { %v798_v50 = vmul.f32 %v5932_v27, %v745_v48 }
  0xe9   :  { %v814_v53 = vadd.f32 %v798_v50, %v697_v25 }
  0xea   :  { %v969_v55 = vpop.permute.xlu0 %968  ;;  %v750_v58 = vpop.permute.xlu1 %749 }
  0xeb   :  { %v1030_v56 = vmul.f32 %v5986_v10, %v969_v55 }
  0xed   :  { %v1046_v57 = vadd.f32 %v1030_v56, %v929_v36  ;;  %v799_v56 = vmul.f32 %v5932_v27, %v750_v58 }
  0xee   :  { %v638_v60 = vpop.permute.xlu0 %637  ;;  %v974_v59 = vpop.permute.xlu1 %973 }
  0xef   :  { %v6059_v61 = vadd.f32 %v5993_v20, %v1046_v57  ;;  %v1031_v1 = vmul.f32 %v5986_v10, %v974_v59  ;;  %v815_v59 = vadd.f32 %v799_v56, %v6052_v22 }
  0xf1   :  { %v1092_v62 = vsel %vm7056_vm6, %v6059_v61, 0.0  ;;  %v1127_v63 = vmul.f32 %v6059_v61, %v6059_v61  ;;  %v1047_v6 = vadd.f32 %v1031_v1, %v930_v51 }
  0xf2   :  { %v1093_v0 = vadd.f32 %v1092_v62, %v1091_v43  ;;  %v862_v3 = vpop.permute.xlu0 %861  ;;  %v643_v40 = vpop.permute.xlu1 %642 }
  0xf3   :  { %v1147_v4 = vsel %vm7056_vm6, %v1127_v63, 0.0  ;;  %v6068_v7 = vadd.f32 %v5993_v20, %v1047_v6  ;;  %v915_v25 = vmul.f32 %v5959_v46, %v862_v3  ;;  %v582_v3 = vmul.f32 %v5919_v11, %v537_v54 }
  0xf4   :  { %v1148_v5 = vadd.f32 %v1147_v4, %v1146_v49  ;;  %v684_v58 = vmul.f32 %v5912_v9, %v643_v40 }
  0xf5   :  { %v1094_v12 = vsel %vm7056_vm6, %v6068_v7, 0.0  ;;  %v1128_v13 = vmul.f32 %v6068_v7, %v6068_v7  ;;  %v931_v30 = vadd.f32 %v915_v25, %v814_v53 }
  0xf6   :  { %v542_v8 = vpop.permute.xlu0 %541  ;;  %v1095_v14 = vadd.f32 %v1094_v12, %v1093_v0  ;;  %v867_v17 = vpop.permute.xlu1 %866  ;;  %v683_v0 = vmul.f32 %v5912_v9, %v638_v60 }
  0xf7   :  { %v1149_v19 = vsel %vm7056_vm6, %v1128_v13, 0.0  ;;  %v916_v57 = vmul.f32 %v5959_v46, %v867_v17  ;;  %v583_v12 = vmul.f32 %v5919_v11, %v542_v8 }
  0xf8   :  { %v1150_v24 = vadd.f32 %v1149_v19, %v1148_v5 }
  0xf9   :  { %v932_v4 = vadd.f32 %v916_v57, %v815_v59 }
  0xfa   :  { %v755_v21 = vpop.permute.xlu0 %754  ;;  %v547_v26 = vpop.permute.xlu1 %546 }
  0xfb   :  { %v800_v5 = vmul.f32 %v5932_v27, %v755_v21  ;;  %v584_v21 = vmul.f32 %v5919_v11, %v547_v26 }
  0xfe   :  { %v979_v29 = vpop.permute.xlu0 %978  ;;  %v760_v33 = vpop.permute.xlu1 %759 }
  0xff   :  { %v1032_v31 = vmul.f32 %v5986_v10, %v979_v29  ;;  %v801_v22 = vmul.f32 %v5932_v27, %v760_v33  ;;  %v700_v29 = vadd.f32 %v684_v58, %v583_v12 }
 0x101   :  { %v1048_v32 = vadd.f32 %v1032_v31, %v931_v30 }
 0x102   :  { %v648_v34 = vpop.permute.xlu0 %647  ;;  %v984_v38 = vpop.permute.xlu1 %983 }
 0x103   :  { %v6078_v35 = vadd.f32 %v5993_v20, %v1048_v32  ;;  %v1033_v1 = vmul.f32 %v5986_v10, %v984_v38  ;;  %v685_v60 = vmul.f32 %v5912_v9, %v648_v34 }
 0x105   :  { %v1096_v36 = vsel %vm7056_vm6, %v6078_v35, 0.0  ;;  %v1129_v23 = vmul.f32 %v6078_v35, %v6078_v35  ;;  %v1049_v17 = vadd.f32 %v1033_v1, %v932_v4 }
 0x106   :  { %v6084_v39 = vadd.f32 %v1096_v36, %v1095_v14  ;;  %v872_v41 = vpop.permute.xlu0 %871  ;;  %v653_v43 = vpop.permute.xlu1 %652  ;;  %v699_v14 = vadd.f32 %v683_v0, %v582_v3  ;;  %v817_v36 = vadd.f32 %v801_v22, %v700_v29 }
 0x107   :  { %v1151_v42 = vsel %vm7056_vm6, %v1129_v23, 0.0  ;;  %v917_v19 = vmul.f32 %v5959_v46, %v872_v41  ;;  %v6112_v31 = vadd.f32 %v5993_v20, %v1049_v17  ;;  %v686_v33 = vmul.f32 %v5912_v9, %v653_v43 }
 0x108   :  { %v6087_v16 = vadd.f32 %v1151_v42, %v1150_v24  ;;  %v816_v24 = vadd.f32 %v800_v5, %v699_v14  ;;  %v701_v23 = vadd.f32 %v685_v60, %v584_v21 }
 0x109   :  { %v1130_v43 = vmul.f32 %v6112_v31, %v6112_v31  ;;  %v1098_v58 = vsel %vm7056_vm6, %v6112_v31, 0.0 }
 0x10a   :  { %v552_v44 = vpop.permute.xlu0 %551  ;;  %v877_v45 = vpop.permute.xlu1 %876  ;;  %v933_v32 = vadd.f32 %v917_v19, %v816_v24  ;;  %v1099_v29 = vadd.f32 %v1098_v58, %v6084_v39 }
 0x10b   :  { %v918_v40 = vmul.f32 %v5959_v46, %v877_v45  ;;  %v585_v34 = vmul.f32 %v5919_v11, %v552_v44  ;;  %v1153_v12 = vsel %vm7056_vm6, %v1130_v43, 0.0 }
 0x10c   :  { %v1154_v21 = vadd.f32 %v1153_v12, %v6087_v16 }
 0x10d   :  { %v702_v59 = vadd.f32 %v686_v33, %v585_v34 }
 0x10e   :  { %v765_v47 = vpop.permute.xlu0 %764  ;;  %v6089_v48 = vpop.permute.xlu1 %556 }
 0x10f   :  { %v802_v8 = vmul.f32 %v5932_v27, %v765_v47  ;;  %v934_v47 = vadd.f32 %v918_v40, %v817_v36  ;;  %v586_v19 = vmul.f32 %v5919_v11, %v6089_v48 }
 0x112   :  { %v989_v49 = vpop.permute.xlu0 %988  ;;  %v770_v50 = vpop.permute.xlu1 %769 }
 0x113   :  { %v1034_v54 = vmul.f32 %v5986_v10, %v989_v49  ;;  %v803_v42 = vmul.f32 %v5932_v27, %v770_v50  ;;  %v818_v49 = vadd.f32 %v802_v8, %v701_v23 }
 0x115   :  { %v1050_v26 = vadd.f32 %v1034_v54, %v933_v32 }
 0x116   :  { %v658_v51 = vpop.permute.xlu0 %657  ;;  %v994_v53 = vpop.permute.xlu1 %993 }
 0x117   :  { %v1035_v38 = vmul.f32 %v5986_v10, %v994_v53  ;;  %v6124_v53 = vadd.f32 %v5993_v20, %v1050_v26  ;;  %v687_v14 = vmul.f32 %v5912_v9, %v658_v51 }
 0x119   :  { %v1051_v0 = vadd.f32 %v1035_v38, %v934_v47  ;;  %v1131_v22 = vmul.f32 %v6124_v53, %v6124_v53  ;;  %v1100_v39 = vsel %vm7056_vm6, %v6124_v53, 0.0 }
 0x11a   :  { %v882_v55 = vpop.permute.xlu0 %881  ;;  %v6093_v62 = vpop.permute.xlu1 %662 }
 0x11b   :  { %v919_v41 = vmul.f32 %v5959_v46, %v882_v55  ;;  %v819_v55 = vadd.f32 %v803_v42, %v702_v59  ;;  %v688_v48 = vmul.f32 %v5912_v9, %v6093_v62  ;;  %v1155_v36 = vsel %vm7056_vm6, %v1131_v22, 0.0 }
 0x11d   :  { %v935_v1 = vadd.f32 %v919_v41, %v818_v49 }
 0x11e   :  { %v6095_v63 = vpop.permute.xlu0 %561  ;;  %v887_v6 = vpop.permute.xlu1 %886 }
 0x11f   :  { %v920_v44 = vmul.f32 %v5959_v46, %v887_v6  ;;  %v6132_v6 = vadd.f32 %v5993_v20, %v1051_v0  ;;  %v587_v32 = vmul.f32 %v5919_v11, %v6095_v63 }
 0x121   :  { %v936_v17 = vadd.f32 %v920_v44, %v819_v55  ;;  %v1132_v16 = vmul.f32 %v6132_v6, %v6132_v6  ;;  %v1102_v38 = vsel %vm7056_vm6, %v6132_v6, 0.0  ;;  %v704_v42 = vadd.f32 %v688_v48, %v587_v32 }
 0x122   :  { %v775_v13 = vpop.permute.xlu0 %774  ;;  %v567_v25 = vpop.permute.xlu1 %566 }
 0x123   :  { %v804_v60 = vmul.f32 %v5932_v27, %v775_v13  ;;  %v588_v33 = vmul.f32 %v5919_v11, %v567_v25 }
 0x126   :  { %v999_v30 = vpop.permute.xlu0 %998  ;;  %v780_v45 = vpop.permute.xlu1 %779 }
 0x127   :  { %v1036_v56 = vmul.f32 %v5986_v10, %v999_v30  ;;  %v703_v30 = vadd.f32 %v687_v14, %v586_v19 }
 0x129   :  { %v1052_v50 = vadd.f32 %v1036_v56, %v935_v1  ;;  %v820_v23 = vadd.f32 %v804_v60, %v703_v30  ;;  %v1156_v56 = vadd.f32 %v1155_v36, %v1154_v21 }
 0x12a   :  { %v668_v57 = vpop.permute.xlu0 %667  ;;  %v1004_v3 = vpop.permute.xlu1 %1003 }
 0x12b   :  { %v1037_v4 = vmul.f32 %v5986_v10, %v1004_v3  ;;  %v6142_v51 = vadd.f32 %v5993_v20, %v1052_v50  ;;  %v689_v40 = vmul.f32 %v5912_v9, %v668_v57  ;;  %v805_v9 = vmul.f32 %v5932_v27, %v780_v45 }
 0x12c   :  { %v1101_v45 = vadd.f32 %v1100_v39, %v1099_v29  ;;  %v1157_v57 = vsel %vm7056_vm6, %v1132_v16, 0.0 }
 0x12d   :  { %v1053_v24 = vadd.f32 %v1037_v4, %v936_v17  ;;  %v1133_v41 = vmul.f32 %v6142_v51, %v6142_v51  ;;  %v705_v26 = vadd.f32 %v689_v40, %v588_v33  ;;  %v1104_v59 = vsel %vm7056_vm6, %v6142_v51, 0.0 }
 0x12e   :  { %v892_v5 = vpop.permute.xlu0 %891  ;;  %v897_v54 = vpop.permute.xlu1 %896  ;;  %v821_v44 = vadd.f32 %v805_v9, %v704_v42  ;;  %v1103_v3 = vadd.f32 %v1102_v38, %v1101_v45  ;;  %v1158_v19 = vadd.f32 %v1157_v57, %v1156_v56 }
 0x12f   :  { %v921_v13 = vmul.f32 %v5959_v46, %v892_v5  ;;  %v6159_v62 = vadd.f32 %v5993_v20, %v1053_v24  ;;  %v922_v49 = vmul.f32 %v5959_v46, %v897_v54  ;;  %v1159_v50 = vsel %vm7056_vm6, %v1133_v41, 0.0 }
 0x130   :  { %v1105_v22 = vadd.f32 %v1104_v59, %v1103_v3  ;;  %v1160_v40 = vadd.f32 %v1159_v50, %v1158_v19 }
 0x131   :  { %v937_v47 = vadd.f32 %v921_v13, %v820_v23  ;;  %v1134_v0 = vmul.f32 %v6159_v62, %v6159_v62  ;;  %v1106_v58 = vsel %vm7056_vm6, %v6159_v62, 0.0  ;;  %v938_v12 = vadd.f32 %v922_v49, %v821_v44 }
 0x132   :  { %v785_v8 = vpop.permute.xlu0 %784  ;;  %v902_v63 = vpop.permute.xlu1 %901 }
 0x133   :  { %v806_v34 = vmul.f32 %v5932_v27, %v785_v8  ;;  %v923_v11 = vmul.f32 %v5959_v46, %v902_v63  ;;  %v1161_v24 = vsel %vm7056_vm6, %v1134_v0, 0.0  ;;  %v1107_v8 = vadd.f32 %v1106_v58, %v1105_v22  ;;  %v5065_v22 = vld [vmem:[%s7042_s6] sm:$0xff]  }
 0x134   :  { %v1162_v32 = vadd.f32 %v1161_v24, %v1160_v40  ;;  %v5067_v24 = vld [vmem:[%s7042_s6 + $0x8] sm:$0xff]   ;;  %v5071_v40 = vld [vmem:[%s7042_s6 + $0x18] sm:$0xff]  }
 0x135   :  { %v822_v43 = vadd.f32 %v806_v34, %v705_v26 }
 0x136   :  { %v1009_v25 = vpop.permute.xlu0 %1008  ;;  %v1019_v55 = vpop.permute.xlu1 %1018 }
 0x137   :  { %v1038_v27 = vmul.f32 %v5986_v10, %v1009_v25  ;;  %v939_v46 = vadd.f32 %v923_v11, %v822_v43  ;;  %v1040_v4 = vmul.f32 %v5986_v10, %v1019_v55 }
 0x139   :  { %v1054_v1 = vadd.f32 %v1038_v27, %v937_v47  ;;  %v1056_v60 = vadd.f32 %v1040_v4, %v939_v46 }
 0x13a   :  { %v1014_v5 = vpop.permute.xlu0 %1013 }
 0x13b   :  { %v6178_v14 = vadd.f32 %v5993_v20, %v1054_v1  ;;  %v1039_v17 = vmul.f32 %v5986_v10, %v1014_v5  ;;  %v6187_v30 = vadd.f32 %v5993_v20, %v1056_v60  ;;  %v5066_v60 = vld [vmem:[%s7042_s6 + $0x48] sm:$0xff]  }
 0x13d   :  { %v1108_v54 = vsel %vm7056_vm6, %v6178_v14, 0.0  ;;  %v1135_v29 = vmul.f32 %v6178_v14, %v6178_v14  ;;  %v1055_v21 = vadd.f32 %v1039_v17, %v938_v12  ;;  %v1137_v39 = vmul.f32 %v6187_v30, %v6187_v30 }
 0x13e   :  { %v1109_v13 = vadd.f32 %v1108_v54, %v1107_v8  ;;  %v1112_v23 = vsel %vm7056_vm6, %v6187_v30, 0.0  ;;  %v5068_v54 = vld [vmem:[%s7042_s6 + $0x50] sm:$0xff]  }
 0x13f   :  { %v1163_v48 = vsel %vm7056_vm6, %v1135_v29, 0.0  ;;  %v6191_v10 = vadd.f32 %v5993_v20, %v1055_v21  ;;  %v1167_v38 = vsel %vm7056_vm6, %v1137_v39, 0.0  ;;  %v5069_v29 = vld [vmem:[%s7042_s6 + $0x10] sm:$0xff]   ;;  %v5070_v21 = vld [vmem:[%s7042_s6 + $0x58] sm:$0xff]  }
 0x140   :  { %v1164_v34 = vadd.f32 %v1163_v48, %v1162_v32  ;;  %v6266_v48 = vld [vmem:[%s7040_s4] ss:$0 sm:$0xff] }
 0x141   :  { %v1110_v16 = vsel %vm7056_vm6, %v6191_v10, 0.0  ;;  %v1136_v33 = vmul.f32 %v6191_v10, %v6191_v10  ;;  %v5072_v32 = vld [vmem:[%s7042_s6 + $0x60] sm:$0xff]  }
 0x142   :  { %v1111_v36 = vadd.f32 %v1110_v16, %v1109_v13 }
 0x143   :  { %v1165_v9 = vsel %vm7056_vm6, %v1136_v33, 0.0 }
 0x144   :  { %v1113_v20 = vadd.f32 %v1112_v23, %v1111_v36  ;;  %v1166_v63 = vadd.f32 %v1165_v9, %v1164_v34  ;;  %v6280_v34 = vld [vmem:[%s7041_s5] ss:$0 sm:$0xff] }
 0x146   :  { %v1114_v41 = vrot.slane %v1113_v20, 4  ;;  %v1168_v26 = vadd.f32 %v1167_v38, %v1166_v63 }
 0x148   :  { %v1115_v11 = vadd.f32 %v1114_v41, %v1113_v20  ;;  %v1169_v25 = vrot.slane %v1168_v26, 4 }
 0x14a   :  { %v1116_v42 = vrot.slane %v1115_v11, 2  ;;  %v1170_v47 = vadd.f32 %v1169_v25, %v1168_v26  ;;  %v5073_v26 = vld [vmem:[%s7042_s6 + $0x20] sm:$0xff]  }
 0x14c   :  { %v1117_v49 = vadd.f32 %v1116_v42, %v1115_v11  ;;  %v1171_v27 = vrot.slane %v1170_v47, 2 }
 0x14e   :  { %v1118_v45 = vrot.slane %v1117_v49, 1  ;;  %v1172_v56 = vadd.f32 %v1171_v27, %v1170_v47 }
 0x150   :  { %v1119_v57 = vadd.f32 %v1118_v45, %v1117_v49  ;;  %v1173_v43 = vrot.slane %v1172_v56, 1  ;;  %v5074_v49 = vld [vmem:[%s7042_s6 + $0x68] sm:$0xff]  }
 0x152   :  { %v6203_v59 = vmul.f32 0.0078125, %v1119_v57  ;;  %v1174_v44 = vadd.f32 %v1173_v43, %v1172_v56 }
 0x154   :  { %v1175_v0 = vmul.f32 0.0078125, %v1174_v44  ;;  %v1176_v1 = vmul.f32 %v6203_v59, %v6203_v59  ;;  %v1192_v55 = vsub.f32 %v6191_v10, %v6203_v59  ;;  %v1178_v3 = vsub.f32 %v5996_v28, %v6203_v59 }
 0x155   :  { %v1179_v50 = vsub.f32 %v6004_v18, %v6203_v59  ;;  %v1180_v46 = vsub.f32 %v6018_v52, %v6203_v59  ;;  %v1181_v4 = vsub.f32 %v6033_v15, %v6203_v59  ;;  %v1182_v5 = vsub.f32 %v6044_v37, %v6203_v59 }
 0x156   :  { %v1177_v58 = vsub.f32 %v1175_v0, %v1176_v1  ;;  %v1183_v12 = vsub.f32 %v6059_v61, %v6203_v59  ;;  %v1184_v17 = vsub.f32 %v6068_v7, %v6203_v59  ;;  %v1185_v28 = vsub.f32 %v6078_v35, %v6203_v59  ;;  %v5064_v35 = vld [vmem:[%s7042_s6 + $0x40] sm:$0xff]  }
 0x157   :  { %4940 = vmatprep.subr.bf16.mxu0 %v5064_v35  ;;  %v1186_v10 = vsub.f32 %v6112_v31, %v6203_v59 }
 0x158   :  { %v1194_v37 = vadd.f32 1e-05, %v1177_v58  ;;  %4941 = vmatpush3.bf16.msra.mxu0 %v5065_v22 }
 0x159   :  { %4942 = vmatprep.subr.bf16.mxu0 %v5066_v60 }
 0x15a   :  { %5484 = vrsqrt.f32 %v1194_v37 }
 0x15c   :  { %4943 = vmatpush3.bf16.msra.mxu0 %v5067_v24 }
 0x15d   :  { %4944 = vmatprep.subr.bf16.mxu0 %v5068_v54 }
 0x160   :  { %4945 = vmatpush3.bf16.msra.mxu0 %v5069_v29 }
 0x161   :  { %4946 = vmatprep.subr.bf16.mxu0 %v5070_v21 }
 0x164   :  { %v6261_v8 = vpop.eup %5484  ;;  %4947 = vmatpush3.bf16.msra.mxu0 %v5071_v40 }
 0x165   :  { %v1210_v13 = vmul.f32 %v6261_v8, %v1192_v55  ;;  %v1196_v39 = vmul.f32 %v6261_v8, %v1178_v3  ;;  %v1197_v16 = vmul.f32 %v6261_v8, %v1179_v50  ;;  %v1198_v33 = vmul.f32 %v6261_v8, %v1180_v46  ;;  %4948 = vmatprep.subr.bf16.mxu0 %v5072_v32  ;;  %v5075_v46 = vld [vmem:[%s7042_s6 + $0x28] sm:$0xff]  }
 0x166   :  { %v1199_v31 = vmul.f32 %v6261_v8, %v1181_v4  ;;  %v1200_v36 = vmul.f32 %v6261_v8, %v1182_v5  ;;  %v1201_v23 = vmul.f32 %v6261_v8, %v1183_v12  ;;  %v1202_v9 = vmul.f32 %v6261_v8, %v1184_v17 }
 0x167   :  { %v1232_v20 = vmul.f32 %v6266_v48, %v1210_v13  ;;  %v1203_v63 = vmul.f32 %v6261_v8, %v1185_v28  ;;  %v1218_v38 = vmul.f32 %v6266_v48, %v1196_v39  ;;  %v1219_v41 = vmul.f32 %v6266_v48, %v1197_v16 }
 0x168   :  { %v1220_v11 = vmul.f32 %v6266_v48, %v1198_v33  ;;  %v1221_v25 = vmul.f32 %v6266_v48, %v1199_v31  ;;  %v1222_v42 = vmul.f32 %v6266_v48, %v1200_v36  ;;  %v1223_v47 = vmul.f32 %v6266_v48, %v1201_v23  ;;  %4949 = vmatpush3.bf16.msra.mxu0 %v5073_v26 }
 0x169   :  { %v1254_v27 = vadd.f32 %v6280_v34, %v1232_v20  ;;  %v1224_v45 = vmul.f32 %v6266_v48, %v1202_v9  ;;  %v1225_v56 = vmul.f32 %v6266_v48, %v1203_v63  ;;  %v1240_v57 = vadd.f32 %v6280_v34, %v1218_v38  ;;  %4950 = vmatprep.subr.bf16.mxu0 %v5074_v49 }
 0x16a   :  { %v1241_v43 = vadd.f32 %v6280_v34, %v1219_v41  ;;  %v1242_v44 = vadd.f32 %v6280_v34, %v1220_v11  ;;  %v1243_v0 = vadd.f32 %v6280_v34, %v1221_v25  ;;  %v1244_v1 = vadd.f32 %v6280_v34, %v1222_v42 }
 0x16b   :  { %vm1270_vm8 = vcmp.ge.f32.partialorder %v1254_v27, 0.0  ;;  %v1286_v55 = vmul.f32 0.01, %v1254_v27  ;;  %v1245_v3 = vadd.f32 %v6280_v34, %v1223_v47  ;;  %v1246_v50 = vadd.f32 %v6280_v34, %v1224_v45 }
 0x16c   :  { %v1247_v4 = vadd.f32 %v6280_v34, %v1225_v56  ;;  %vm1256_vm9 = vcmp.ge.f32.partialorder %v1240_v57, 0.0  ;;  %vm1257_vm10 = vcmp.ge.f32.partialorder %v1241_v43, 0.0  ;;  %vm1258_vm11 = vcmp.ge.f32.partialorder %v1242_v44, 0.0  ;;  %4951 = vmatpush3.bf16.msra.mxu0 %v5075_v46 }
 0x16d   :  { %v6314_v5 = vsel %vm1270_vm8, %v1254_v27, %v1286_v55  ;;  %vm1259_vm12 = vcmp.ge.f32.partialorder %v1243_v0, 0.0  ;;  %vm1260_vm13 = vcmp.ge.f32.partialorder %v1244_v1, 0.0  ;;  %vm1261_vm14 = vcmp.ge.f32.partialorder %v1245_v3, 0.0 }
 0x16e   :  { %v1549_v58 = vsel %vm1352_vm7, %v6314_v5, -inf  ;;  %vm1262_vm15 = vcmp.ge.f32.partialorder %v1246_v50, 0.0  ;;  %vm1263_vm1 = vcmp.ge.f32.partialorder %v1247_v4, 0.0  ;;  %v1272_v12 = vmul.f32 0.01, %v1240_v57 }
 0x16f   :  { %v1550_v17 = vrot.slane %v1549_v58, 4  ;;  %v1273_v28 = vmul.f32 0.01, %v1241_v43  ;;  %v1274_v37 = vmul.f32 0.01, %v1242_v44  ;;  %v6319_v35 = vmul.f32 %v6261_v8, %v1186_v10 }
 0x170   :  { %v1275_v22 = vmul.f32 0.01, %v1243_v0  ;;  %v1276_v60 = vmul.f32 0.01, %v1244_v1  ;;  %v1277_v24 = vmul.f32 0.01, %v1245_v3  ;;  %v6322_v54 = vsel %vm1256_vm9, %v1240_v57, %v1272_v12 }
 0x171   :  { %v6324_v29 = vmax.f32 %v1549_v58, %v1550_v17  ;;  %v1278_v21 = vmul.f32 0.01, %v1246_v50  ;;  %v1279_v40 = vmul.f32 0.01, %v1247_v4  ;;  %v6327_v32 = vsel %vm1257_vm10, %v1241_v43, %v1273_v28 }
 0x172   :  { %v6330_v13 = vsel %vm1258_vm11, %v1242_v44, %v1274_v37  ;;  %v6333_v10 = vsel %vm1259_vm12, %v1243_v0, %v1275_v22  ;;  %v6336_v39 = vsel %vm1260_vm13, %v1244_v1, %v1276_v60  ;;  %v6339_v16 = vsel %vm1261_vm14, %v1245_v3, %v1277_v24 }
 0x173   :  { %v6343_v33 = vcombine.high %v6322_v54, %v6322_v54  ;;  %v6347_v36 = vsel %vm1262_vm15, %v1246_v50, %v1278_v21  ;;  %v6351_v23 = vcombine.high %v6327_v32, %v6327_v32  ;;  %v6355_v9 = vcombine.high %v6330_v13, %v6330_v13 }
 0x174   :  { %7074 = vst [vmem:[#allocation9_spill] sm:$0xff] %v6347_v36  ;;  %v6358_v20 = vsel %vm1263_vm1, %v1247_v4, %v1279_v40  ;;  %v6362_v63 = vcombine.high %v6333_v10, %v6333_v10  ;;  %v6366_v38 = vcombine.high %v6336_v39, %v6336_v39  ;;  %v6370_v41 = vcombine.high %v6339_v16, %v6339_v16 }
 0x175   :  { %7075 = vst [vmem:[#allocation10_spill] sm:$0xff] %v6358_v20  ;;  %v1578_v26 = vsel %vm1577_vm3, %v6322_v54, -inf  ;;  %v1585_v11 = vsel %vm1577_vm3, %v6343_v33, -inf  ;;  %v1592_v25 = vsel %vm1577_vm3, %v6327_v32, -inf  ;;  %v1599_v42 = vsel %vm1577_vm3, %v6351_v23, -inf }
 0x176   :  { %7076 = vst [vmem:[#allocation11_spill] sm:$0xff] %v6362_v63  ;;  %v6382_v47 = vcombine.high %v6347_v36, %v6347_v36  ;;  %v1579_v49 = vrot.slane %v1578_v26, 4  ;;  %v1586_v27 = vrot.slane %v1585_v11, 4  ;;  %v1593_v45 = vrot.slane %v1592_v25, 4 }
 0x177   :  { %v1600_v56 = vrot.slane %v1599_v42, 4  ;;  %v1606_v57 = vsel %vm1577_vm3, %v6330_v13, -inf  ;;  %v1613_v43 = vsel %vm1577_vm3, %v6355_v9, -inf  ;;  %v1620_v44 = vsel %vm1577_vm3, %v6333_v10, -inf }
 0x178   :  { %7077 = vst [vmem:[#allocation12_spill] sm:$0xff] %v6382_v47  ;;  %v6392_v0 = vcombine.high %v6358_v20, %v6358_v20  ;;  %v1580_v1 = vmax.f32 %v1578_v26, %v1579_v49  ;;  %v1587_v55 = vmax.f32 %v1585_v11, %v1586_v27  ;;  %v1594_v3 = vmax.f32 %v1592_v25, %v1593_v45 }
 0x179   :  { %v1601_v50 = vmax.f32 %v1599_v42, %v1600_v56  ;;  %v1607_v46 = vrot.slane %v1606_v57, 4  ;;  %v1614_v4 = vrot.slane %v1613_v43, 4  ;;  %v1621_v58 = vrot.slane %v1620_v44, 4 }
 0x17a   :  { %7078 = vst [vmem:[#allocation13_spill] sm:$0xff] %v6392_v0  ;;  %v1581_v12 = vrot.slane %v1580_v1, 2  ;;  %v1588_v17 = vrot.slane %v1587_v55, 2  ;;  %v1595_v28 = vrot.slane %v1594_v3, 2  ;;  %v1627_v37 = vsel %vm1577_vm3, %v6362_v63, -inf }
 0x17b   :  { %v1602_v22 = vrot.slane %v1601_v50, 2  ;;  %v1608_v60 = vmax.f32 %v1606_v57, %v1607_v46  ;;  %v1615_v24 = vmax.f32 %v1613_v43, %v1614_v4  ;;  %v1622_v21 = vmax.f32 %v1620_v44, %v1621_v58 }
 0x17c   :  { %v1582_v40 = vmax.f32 %v1580_v1, %v1581_v12  ;;  %v1589_v31 = vmax.f32 %v1587_v55, %v1588_v17  ;;  %v1596_v7 = vmax.f32 %v1594_v3, %v1595_v28  ;;  %v1628_v26 = vrot.slane %v1627_v37, 4 }
 0x17d   :  { %v1603_v11 = vmax.f32 %v1601_v50, %v1602_v22  ;;  %v1609_v25 = vrot.slane %v1608_v60, 2  ;;  %v1616_v42 = vrot.slane %v1615_v24, 2  ;;  %v1623_v49 = vrot.slane %v1622_v21, 2 }
 0x17e   :  { %v1583_v27 = vrot.slane %v1582_v40, 1  ;;  %v1590_v45 = vrot.slane %v1589_v31, 1  ;;  %v1597_v56 = vrot.slane %v1596_v7, 1  ;;  %v1629_v61 = vmax.f32 %v1627_v37, %v1628_v26 }
 0x17f   :  { %v1604_v19 = vrot.slane %v1603_v11, 1  ;;  %v1610_v15 = vmax.f32 %v1608_v60, %v1609_v25  ;;  %v1617_v52 = vmax.f32 %v1615_v24, %v1616_v42  ;;  %v1624_v18 = vmax.f32 %v1622_v21, %v1623_v49 }
 0x180   :  { %v6396_v63 = vmax.f32 %v1582_v40, %v1583_v27  ;;  %v6398_v57 = vmax.f32 %v1589_v31, %v1590_v45  ;;  %v6400_v43 = vmax.f32 %v1596_v7, %v1597_v56  ;;  %v1630_v44 = vrot.slane %v1629_v61, 2 }
 0x181   :  { %v6402_v1 = vmax.f32 %v1603_v11, %v1604_v19  ;;  %v1611_v55 = vrot.slane %v1610_v15, 1  ;;  %v1618_v3 = vrot.slane %v1617_v52, 1  ;;  %v1625_v50 = vrot.slane %v1624_v18, 1 }
 0x182   :  { %v1631_v46 = vmax.f32 %v1629_v61, %v1630_v44  ;;  %v1634_v4 = vsel %vm1577_vm3, %v6336_v39, -inf  ;;  %v1641_v58 = vsel %vm1577_vm3, %v6366_v38, -inf  ;;  %v1648_v12 = vsel %vm1577_vm3, %v6339_v16, -inf }
 0x183   :  { %v6410_v31 = vmax.f32 %v1610_v15, %v1611_v55  ;;  %v6412_v7 = vmax.f32 %v1617_v52, %v1618_v3  ;;  %v6414_v17 = vmax.f32 %v1624_v18, %v1625_v50  ;;  %v1635_v19 = vrot.slane %v1634_v4, 4 }
 0x184   :  { %v1632_v28 = vrot.slane %v1631_v46, 1  ;;  %v1642_v37 = vrot.slane %v1641_v58, 4  ;;  %v1649_v22 = vrot.slane %v1648_v12, 4  ;;  %v1655_v61 = vsel %vm1577_vm3, %v6370_v41, -inf }
 0x185   :  { %v1636_v60 = vmax.f32 %v1634_v4, %v1635_v19  ;;  %v1656_v24 = vrot.slane %v1655_v61, 4  ;;  %v1662_v21 = vsel %vm1577_vm3, %v6347_v36, -inf  ;;  %v1669_v15 = vsel %vm1577_vm3, %v6382_v47, -inf }
 0x186   :  { %v6422_v52 = vmax.f32 %v1631_v46, %v1632_v28  ;;  %v1643_v18 = vmax.f32 %v1641_v58, %v1642_v37  ;;  %v1650_v40 = vmax.f32 %v1648_v12, %v1649_v22  ;;  %v1663_v26 = vrot.slane %v1662_v21, 4 }
 0x187   :  { %vm1894_vm8 = vcmask 1043459   ;;  %v1637_v11 = vrot.slane %v1636_v60, 2  ;;  %v1657_v25 = vmax.f32 %v1655_v61, %v1656_v24  ;;  %v1670_v42 = vrot.slane %v1669_v15, 4 }
 0x188   :  { %v1676_v49 = vsel %vm1577_vm3, %v6358_v20, -inf  ;;  %vm1896_vm9 = vcmask 1044484   ;;  %v1644_v27 = vrot.slane %v1643_v18, 2  ;;  %v1651_v45 = vrot.slane %v1650_v40, 2 }
 0x189   :  { %v1664_v56 = vmax.f32 %v1662_v21, %v1663_v26  ;;  %v1677_v44 = vrot.slane %v1676_v49, 4  ;;  %vm1898_vm10 = vcmask 1045509   ;;  %v1638_v55 = vmax.f32 %v1636_v60, %v1637_v11 }
 0x18a   :  { %v1658_v3 = vrot.slane %v1657_v25, 2  ;;  %v1671_v50 = vmax.f32 %v1669_v15, %v1670_v42  ;;  %v1683_v46 = vsel %vm1577_vm3, %v6392_v0, -inf  ;;  %vm1900_vm11 = vcmask 1046534  }
 0x18b   :  { %v1645_v4 = vmax.f32 %v1643_v18, %v1644_v27  ;;  %v1652_v58 = vmax.f32 %v1650_v40, %v1651_v45  ;;  %v1665_v12 = vrot.slane %v1664_v56, 2  ;;  %v1678_v19 = vmax.f32 %v1676_v49, %v1677_v44  ;;  %v5076_v18 = vld [vmem:[%s7042_s6 + $0x70] sm:$0xff]  }
 0x18c   :  { %vm7058_vm12 = vcmask 1047559   ;;  %v1639_v28 = vrot.slane %v1638_v55, 1  ;;  %v1659_v37 = vmax.f32 %v1657_v25, %v1658_v3  ;;  %v1672_v22 = vrot.slane %v1671_v50, 2  ;;  %v5077_v40 = vld [vmem:[%s7042_s6 + $0x30] sm:$0xff]   ;;  %4952 = vmatprep.subr.bf16.mxu0 %v5076_v18 }
 0x18d   :  { %v1684_v61 = vrot.slane %v1683_v46, 4  ;;  %v1646_v24 = vrot.slane %v1645_v4, 1  ;;  %v1653_v21 = vrot.slane %v1652_v58, 1  ;;  %v1666_v26 = vmax.f32 %v1664_v56, %v1665_v12  ;;  %4953 = vmatpush3.bf16.msra.mxu0 %v5077_v40 }
 0x18e   :  { %v1679_v20 = vrot.slane %v1678_v19, 2  ;;  %v1640_v60 = vmax.f32 %v1638_v55, %v1639_v28  ;;  %v1660_v11 = vrot.slane %v1659_v37, 1  ;;  %v1673_v15 = vmax.f32 %v1671_v50, %v1672_v22 }
 0x18f   :  { %v1685_v42 = vmax.f32 %v1683_v46, %v1684_v61  ;;  %v1647_v49 = vmax.f32 %v1645_v4, %v1646_v24  ;;  %v1654_v25 = vmax.f32 %v1652_v58, %v1653_v21  ;;  %v1667_v27 = vrot.slane %v1666_v26, 1 }
 0x190   :  { %v1680_v45 = vmax.f32 %v1678_v19, %v1679_v20  ;;  %v1661_v44 = vmax.f32 %v1659_v37, %v1660_v11  ;;  %v1674_v3 = vrot.slane %v1673_v15, 1  ;;  %v1981_v55 = vsel %vm1890_vm4, %v6398_v57, %v6396_v63 }
 0x191   :  { %v1686_v56 = vrot.slane %v1685_v42, 2  ;;  %v1668_v50 = vmax.f32 %v1666_v26, %v1667_v27  ;;  %v1982_v12 = vsel %vm1892_vm5, %v6400_v43, %v1981_v55  ;;  %v1988_v28 = vsel %vm1890_vm4, %v1647_v49, %v1640_v60 }
 0x192   :  { %v1681_v46 = vrot.slane %v1680_v45, 1  ;;  %v1675_v4 = vmax.f32 %v1673_v15, %v1674_v3  ;;  %v1983_v20 = vsel %vm1894_vm8, %v6402_v1, %v1982_v12  ;;  %v1989_v19 = vsel %vm1892_vm5, %v1654_v25, %v1988_v28 }
 0x193   :  { %v1687_v58 = vmax.f32 %v1685_v42, %v1686_v56  ;;  %v1984_v63 = vsel %vm1896_vm9, %v6410_v31, %v1983_v20  ;;  %v1990_v57 = vsel %vm1894_vm8, %v1661_v44, %v1989_v19  ;;  %v7079_v22 = vsub.f32 %v6124_v53, %v6203_v59 }
 0x194   :  { %v1682_v37 = vmax.f32 %v1680_v45, %v1681_v46  ;;  %v1985_v24 = vsel %vm1898_vm10, %v6412_v7, %v1984_v63  ;;  %v1991_v21 = vsel %vm1896_vm9, %v1668_v50, %v1990_v57  ;;  %v7080_v1 = vsub.f32 %v6132_v6, %v6203_v59 }
 0x195   :  { %v1205_v43 = vmul.f32 %v6261_v8, %v7079_v22  ;;  %v1688_v61 = vrot.slane %v1687_v58, 1  ;;  %v1986_v31 = vsel %vm1900_vm11, %v6414_v17, %v1985_v24  ;;  %v1992_v60 = vsel %vm1898_vm10, %v1675_v4, %v1991_v21 }
 0x196   :  { %v1206_v26 = vmul.f32 %v6261_v8, %v7080_v1  ;;  %v7081_v53 = vsub.f32 %v6142_v51, %v6203_v59  ;;  %v7082_v7 = vsub.f32 %v6159_v62, %v6203_v59  ;;  %v6470_v6 = vsel %vm7058_vm12, %v6422_v52, %v1986_v31 }
 0x197   :  { %v1689_v42 = vmax.f32 %v1687_v58, %v1688_v61  ;;  %v1993_v18 = vsel %vm1900_vm11, %v1682_v37, %v1992_v60  ;;  %v7083_v17 = vsub.f32 %v6178_v14, %v6203_v59  ;;  %v7084_v51 = vsub.f32 %v6187_v30, %v6203_v59 }
 0x198   :  { %v1207_v11 = vmul.f32 %v6261_v8, %v7081_v53  ;;  %v1208_v15 = vmul.f32 %v6261_v8, %v7082_v7  ;;  %v1226_v62 = vmul.f32 %v6266_v48, %v6319_v35  ;;  %v1227_v25 = vmul.f32 %v6266_v48, %v1205_v43 }
 0x199   :  { %v1209_v40 = vmul.f32 %v6261_v8, %v7083_v17  ;;  %v1211_v49 = vmul.f32 %v6261_v8, %v7084_v51  ;;  %v6485_v52 = vsel %vm7058_vm12, %v1689_v42, %v1993_v18  ;;  %v1228_v27 = vmul.f32 %v6266_v48, %v1206_v26 }
 0x19a   :  { %v1229_v45 = vmul.f32 %v6266_v48, %v1207_v11  ;;  %v1230_v14 = vmul.f32 %v6266_v48, %v1208_v15  ;;  %v7085_v44 = vrot.slane %v6324_v29, 2  ;;  %v5044_v59 = vpack.i.bf16 %v6485_v52, %v6470_v6 }
 0x19b   :  { %v1231_v8 = vmul.f32 %v6266_v48, %v1209_v40  ;;  %v1233_v35 = vmul.f32 %v6266_v48, %v1211_v49  ;;  %v1248_v3 = vadd.f32 %v6280_v34, %v1226_v62  ;;  %v6506_v46 = vadd.s32 16, %v5645_v2 }
 0x19c   :  { %v6493_v30 = vmax.f32 %v6324_v29, %v7085_v44  ;;  %5045 = vrot.lane.b32.xlu0 %v5044_v59, %s5546_s17  ;;  %v1252_v55 = vadd.f32 %v6280_v34, %v1230_v14  ;;  %v1249_v12 = vadd.f32 %v6280_v34, %v1227_v25  ;;  %v1250_v48 = vadd.f32 %v6280_v34, %v1228_v27 }
 0x19d   :  { %v1253_v50 = vadd.f32 %v6280_v34, %v1231_v8  ;;  %v1255_v29 = vadd.f32 %v6280_v34, %v1233_v35  ;;  %v1251_v28 = vadd.f32 %v6280_v34, %v1229_v45  ;;  %v6512_v4 = vadd.s32 24, %v5645_v2 }
 0x19e   :  { %v1554_v58 = vrot.slane %v6493_v30, 1  ;;  %v7060_v20 = vrot.slane %v6485_v52, 7  ;;  %v7059_v19 = vrot.slane %v6470_v6, 7  ;;  %vm1264_vm13 = vcmp.ge.f32.partialorder %v1248_v3, 0.0 }
 0x19f   :  { %7086 = vst [vmem:[#allocation14_spill] sm:$0xff] %v6512_v4  ;;  %vm1268_vm14 = vcmp.ge.f32.partialorder %v1252_v55, 0.0  ;;  %vm1269_vm15 = vcmp.ge.f32.partialorder %v1253_v50, 0.0  ;;  %vm1271_vm1 = vcmp.ge.f32.partialorder %v1255_v29, 0.0  ;;  %v1280_v37 = vmul.f32 0.01, %v1248_v3 }
 0x1a0   :  { %v1284_v63 = vmul.f32 0.01, %v1252_v55  ;;  %v1285_v57 = vmul.f32 0.01, %v1253_v50  ;;  %v1287_v22 = vmul.f32 0.01, %v1255_v29  ;;  %v6519_v34 = vcombine.high %v6314_v5, %v6314_v5 }
 0x1a1   :  { %vm1265_vm6 = vcmp.ge.f32.partialorder %v1249_v12, 0.0  ;;  %vm1266_vm2 = vcmp.ge.f32.partialorder %v1250_v48, 0.0  ;;  %vm1267_vm12 = vcmp.ge.f32.partialorder %v1251_v28, 0.0  ;;  %v1281_v43 = vmul.f32 0.01, %v1249_v12 }
 0x1a2   :  { %v1282_v61 = vmul.f32 0.01, %v1250_v48  ;;  %v6521_v24 = vsel %vm1268_vm14, %v1252_v55, %v1284_v63  ;;  %v6523_v21 = vsel %vm1269_vm15, %v1253_v50, %v1285_v57  ;;  %v6525_v1 = vsel %vm1271_vm1, %v1255_v29, %v1287_v22 }
 0x1a3   :  { %v1283_v26 = vmul.f32 0.01, %v1251_v28  ;;  %v6528_v31 = vsel %vm1264_vm13, %v1248_v3, %v1280_v37  ;;  %v6532_v60 = vcombine.high %v6521_v24, %v6521_v24  ;;  %v6536_v53 = vcombine.high %v6523_v21, %v6523_v21 }
 0x1a4   :  { %7087 = vst [vmem:[#allocation15_spill] sm:$0xff] %v6528_v31  ;;  %v6540_v11 = vcombine.high %v6525_v1, %v6525_v1  ;;  %v1521_v7 = vsel %vm1352_vm7, %v6521_v24, -inf  ;;  %v1535_v15 = vsel %vm1352_vm7, %v6523_v21, -inf  ;;  %v1556_v42 = vsel %vm1352_vm7, %v6519_v34, -inf }
 0x1a5   :  { %v1522_v18 = vrot.slane %v1521_v7, 4  ;;  %v1528_v17 = vsel %vm1352_vm7, %v6532_v60, -inf  ;;  %v1536_v40 = vrot.slane %v1535_v15, 4  ;;  %v1542_v51 = vsel %vm1352_vm7, %v6536_v53, -inf }
 0x1a6   :  { %v1529_v49 = vrot.slane %v1528_v17, 4  ;;  %v1543_v62 = vrot.slane %v1542_v51, 4  ;;  %v1557_v25 = vrot.slane %v1556_v42, 4  ;;  %v1563_v27 = vsel %vm1352_vm7, %v6525_v1, -inf }
 0x1a7   :  { %v6555_v45 = vsel %vm1265_vm6, %v1249_v12, %v1281_v43  ;;  %v6558_v14 = vsel %vm1266_vm2, %v1250_v48, %v1282_v61  ;;  %v6561_v44 = vsel %vm1267_vm12, %v1251_v28, %v1283_v26  ;;  %v6563_v59 = vmax.f32 %v1521_v7, %v1522_v18 }
 0x1a8   :  { %7088 = vst [vmem:[#allocation16_spill] sm:$0xff] %v6555_v45  ;;  %7089 = vst [vmem:[#allocation17_spill] sm:$0xff] %v6558_v14  ;;  %v6565_v8 = vmax.f32 %v1528_v17, %v1529_v49  ;;  %v6567_v35 = vmax.f32 %v1535_v15, %v1536_v40  ;;  %v1564_v3 = vrot.slane %v1563_v27, 4  ;;  %v6571_v55 = vsel %vm1352_vm7, %v6540_v11, -inf }
 0x1a9   :  { %7090 = vst [vmem:[#allocation18_spill] sm:$0xff] %v6561_v44  ;;  %v6575_v50 = vcombine.high %v6528_v31, %v6528_v31  ;;  %v6577_v29 = vmax.f32 %v1542_v51, %v1543_v62  ;;  %v1690_v12 = vsel %vm1577_vm3, %v6528_v31, -inf  ;;  %v6583_v28 = vmax.f32 %v6493_v30, %v1554_v58 }
 0x1aa   :  { %v6587_v37 = vcombine.high %v6555_v45, %v6555_v45  ;;  %v6589_v63 = vmax.f32 %v1556_v42, %v1557_v25  ;;  %v6597_v57 = vsel %vm358_vm0, %v7059_v19, %v7060_v20  ;;  %v6601_v22 = vcombine.high %v6558_v14, %v6558_v14 }
 0x1ab   :  { %7091 = vst [vmem:[#allocation19_spill] sm:$0xff] %v6575_v50  ;;  %7092 = vst [vmem:[#allocation20_spill] sm:$0xff] %v6583_v28  ;;  %v6605_v30 = vcombine.high %v6561_v44, %v6561_v44  ;;  %v1691_v43 = vrot.slane %v1690_v12, 4  ;;  %v6611_v15 = vmax.f32 %v1563_v27, %v1564_v3  ;;  %v1697_v17 = vsel %vm1577_vm3, %v6575_v50, -inf }
 0x1ac   :  { %7093 = vst [vmem:[#allocation21_spill] sm:$0xff] %v6587_v37  ;;  %7094 = vst [vmem:[#allocation22_spill] sm:$0xff] %v6601_v22  ;;  %v1704_v40 = vsel %vm1577_vm3, %v6555_v45, -inf  ;;  %v1698_v49 = vrot.slane %v1697_v17, 4  ;;  %v1711_v25 = vsel %vm1577_vm3, %v6587_v37, -inf  ;;  %v1718_v27 = vsel %vm1577_vm3, %v6558_v14, -inf }
 0x1ad   :  { %7095 = vst [vmem:[#allocation23_spill] sm:$0xff] %v6605_v30  ;;  %v1692_v18 = vmax.f32 %v1690_v12, %v1691_v43  ;;  %v1705_v62 = vrot.slane %v1704_v40, 4  ;;  %v1712_v19 = vrot.slane %v1711_v25, 4  ;;  %v1725_v3 = vsel %vm1577_vm3, %v6601_v22, -inf }
 0x1ae   :  { %v1699_v12 = vmax.f32 %v1697_v17, %v1698_v49  ;;  %v1719_v42 = vrot.slane %v1718_v27, 4  ;;  %v1726_v20 = vrot.slane %v1725_v3, 4  ;;  %v1732_v51 = vsel %vm1577_vm3, %v6561_v44, -inf }
 0x1af   :  { %v1693_v26 = vrot.slane %v1692_v18, 2  ;;  %v1706_v43 = vmax.f32 %v1704_v40, %v1705_v62  ;;  %v1713_v61 = vmax.f32 %v1711_v25, %v1712_v19  ;;  %v1739_v58 = vsel %vm1577_vm3, %v6605_v30, -inf }
 0x1b0   :  { %v1700_v48 = vrot.slane %v1699_v12, 2  ;;  %v1720_v4 = vmax.f32 %v1718_v27, %v1719_v42  ;;  %v1727_v37 = vmax.f32 %v1725_v3, %v1726_v20  ;;  %v1733_v50 = vrot.slane %v1732_v51, 4 }
 0x1b1   :  { %v1694_v7 = vmax.f32 %v1692_v18, %v1693_v26  ;;  %v1707_v56 = vrot.slane %v1706_v43, 2  ;;  %v1714_v45 = vrot.slane %v1713_v61, 2  ;;  %v1740_v22 = vrot.slane %v1739_v58, 4 }
 0x1b2   :  { %v1701_v17 = vmax.f32 %v1699_v12, %v1700_v48  ;;  %v1721_v49 = vrot.slane %v1720_v4, 2  ;;  %v1728_v62 = vrot.slane %v1727_v37, 2  ;;  %v1734_v18 = vmax.f32 %v1732_v51, %v1733_v50 }
 0x1b3   :  { %v1695_v14 = vrot.slane %v1694_v7, 1  ;;  %v1708_v40 = vmax.f32 %v1706_v43, %v1707_v56  ;;  %v1715_v19 = vmax.f32 %v1713_v61, %v1714_v45  ;;  %v1741_v25 = vmax.f32 %v1739_v58, %v1740_v22 }
 0x1b4   :  { %v1702_v44 = vrot.slane %v1701_v17, 1  ;;  %v1722_v30 = vmax.f32 %v1720_v4, %v1721_v49  ;;  %v1729_v31 = vmax.f32 %v1727_v37, %v1728_v62  ;;  %v1735_v42 = vrot.slane %v1734_v18, 2 }
 0x1b5   :  { %v6629_v26 = vmax.f32 %v1694_v7, %v1695_v14  ;;  %v1709_v28 = vrot.slane %v1708_v40, 1  ;;  %v1716_v0 = vrot.slane %v1715_v19, 1  ;;  %v1742_v20 = vrot.slane %v1741_v25, 2 }
 0x1b6   :  { %v1746_v27 = vsel %vm1577_vm3, %v6521_v24, -inf  ;;  %v1703_v3 = vmax.f32 %v1701_v17, %v1702_v44  ;;  %v1723_v56 = vrot.slane %v1722_v30, 1  ;;  %v1730_v12 = vrot.slane %v1729_v31, 1 }
 0x1b7   :  { %v1710_v48 = vmax.f32 %v1708_v40, %v1709_v28  ;;  %v6633_v43 = vmax.f32 %v1715_v19, %v1716_v0  ;;  %v1736_v14 = vmax.f32 %v1734_v18, %v1735_v42  ;;  %v1743_v45 = vmax.f32 %v1741_v25, %v1742_v20 }
 0x1b8   :  { %v1747_v50 = vrot.slane %v1746_v27, 4  ;;  %v6635_v22 = vmax.f32 %v1722_v30, %v1723_v56  ;;  %v6637_v58 = vmax.f32 %v1729_v31, %v1730_v12  ;;  %v1753_v4 = vsel %vm1577_vm3, %v6532_v60, -inf }
 0x1b9   :  { %v1760_v37 = vsel %vm1577_vm3, %v6523_v21, -inf  ;;  %v1737_v24 = vrot.slane %v1736_v14, 1  ;;  %v1744_v44 = vrot.slane %v1743_v45, 1  ;;  %v1754_v61 = vrot.slane %v1753_v4, 4 }
 0x1ba   :  { %v1748_v28 = vmax.f32 %v1746_v27, %v1747_v50  ;;  %v1761_v7 = vrot.slane %v1760_v37, 4  ;;  %v1767_v0 = vsel %vm1577_vm3, %v6536_v53, -inf  ;;  %v1774_v30 = vsel %vm1577_vm3, %v6314_v5, -inf }
 0x1bb   :  { %v1781_v31 = vsel %vm1577_vm3, %v6519_v34, -inf  ;;  %v6649_v51 = vmax.f32 %v1736_v14, %v1737_v24  ;;  %v6651_v60 = vmax.f32 %v1743_v45, %v1744_v44  ;;  %v1755_v21 = vmax.f32 %v1753_v4, %v1754_v61 }
 0x1bc   :  { %v1749_v17 = vrot.slane %v1748_v28, 2  ;;  %v1762_v40 = vmax.f32 %v1760_v37, %v1761_v7  ;;  %v1768_v49 = vrot.slane %v1767_v0, 4  ;;  %v1775_v62 = vrot.slane %v1774_v30, 4 }
 0x1bd   :  { %v1782_v19 = vrot.slane %v1781_v31, 4  ;;  %v1756_v25 = vrot.slane %v1755_v21, 2  ;;  %v1788_v53 = vsel %vm1577_vm3, %v6525_v1, -inf  ;;  %v1795_v5 = vsel %vm1577_vm3, %v6540_v11, -inf }
 0x1be   :  { %v1750_v18 = vmax.f32 %v1748_v28, %v1749_v17  ;;  %v1763_v42 = vrot.slane %v1762_v40, 2  ;;  %v1769_v34 = vmax.f32 %v1767_v0, %v1768_v49  ;;  %v1776_v20 = vmax.f32 %v1774_v30, %v1775_v62 }
 0x1bf   :  { %v1783_v27 = vmax.f32 %v1781_v31, %v1782_v19  ;;  %v1757_v12 = vmax.f32 %v1755_v21, %v1756_v25  ;;  %v1789_v14 = vrot.slane %v1788_v53, 4  ;;  %v1796_v45 = vrot.slane %v1795_v5, 4 }
 0x1c0   :  { %v1751_v56 = vrot.slane %v1750_v18, 1  ;;  %v1764_v50 = vmax.f32 %v1762_v40, %v1763_v42  ;;  %v1770_v4 = vrot.slane %v1769_v34, 2  ;;  %v1777_v37 = vrot.slane %v1776_v20, 2 }
 0x1c1   :  { %v1784_v24 = vrot.slane %v1783_v27, 2  ;;  %v1758_v28 = vrot.slane %v1757_v12, 1  ;;  %v1790_v61 = vmax.f32 %v1788_v53, %v1789_v14  ;;  %v1797_v7 = vmax.f32 %v1795_v5, %v1796_v45 }
 0x1c2   :  { %v1752_v44 = vmax.f32 %v1750_v18, %v1751_v56  ;;  %v1765_v1 = vrot.slane %v1764_v50, 1  ;;  %v1771_v17 = vmax.f32 %v1769_v34, %v1770_v4  ;;  %v1778_v47 = vmax.f32 %v1776_v20, %v1777_v37 }
 0x1c3   :  { %v1785_v11 = vmax.f32 %v1783_v27, %v1784_v24  ;;  %v1759_v36 = vmax.f32 %v1757_v12, %v1758_v28  ;;  %v1791_v0 = vrot.slane %v1790_v61, 2  ;;  %v1798_v30 = vrot.slane %v1797_v7, 2 }
 0x1c4   :  { %v1995_v31 = vsel %vm1890_vm4, %v1703_v3, %v6629_v26  ;;  %v1766_v21 = vmax.f32 %v1764_v50, %v1765_v1  ;;  %v1772_v49 = vrot.slane %v1771_v17, 1  ;;  %v1779_v40 = vrot.slane %v1778_v47, 1  ;;  %v5078_v3 = vld [vmem:[%s7042_s6 + $0x78] sm:$0xff]  }
 0x1c5   :  { %v1786_v62 = vrot.slane %v1785_v11, 1  ;;  %v1792_v19 = vmax.f32 %v1790_v61, %v1791_v0  ;;  %v1799_v25 = vmax.f32 %v1797_v7, %v1798_v30  ;;  %v1996_v18 = vsel %vm1892_vm5, %v1710_v48, %v1995_v31  ;;  %4954 = vmatprep.subr.bf16.mxu0 %v5078_v3 }
 0x1c6   :  { %v2002_v53 = vsel %vm1890_vm4, %v1759_v36, %v1752_v44  ;;  %v7096_v5 = vand.u32 15, %v5645_v2  ;;  %v1773_v34 = vmax.f32 %v1771_v17, %v1772_v49  ;;  %v1780_v20 = vmax.f32 %v1778_v47, %v1779_v40  ;;  %v5079_v36 = vld [vmem:[%s7042_s6 + $0x38] sm:$0xff]  }
 0x1c7   :  { %v1787_v27 = vmax.f32 %v1785_v11, %v1786_v62  ;;  %v1997_v26 = vsel %vm1894_vm8, %v6633_v43, %v1996_v18  ;;  %v1793_v48 = vrot.slane %v1792_v19, 1  ;;  %v1800_v56 = vrot.slane %v1799_v25, 1  ;;  %4955 = vmatpush3.bf16.msra.mxu0 %v5079_v36 }
 0x1c8   :  { %vm6663_vm2 = vcmp.eq.s32.totalorder %v7096_v5, 0  ;;  %v1998_v12 = vsel %vm1896_vm9, %v6635_v22, %v1997_v26  ;;  %v2003_v14 = vsel %vm1892_vm5, %v1766_v21, %v2002_v53  ;;  %v7099_v47 = vand.u32 15, %v6506_v46 }
 0x1c9   :  { %v1999_v43 = vsel %vm1898_vm10, %v6637_v58, %v1998_v12  ;;  %v2004_v50 = vsel %vm1894_vm8, %v1773_v34, %v2003_v14  ;;  %v1353_v4 = vsel %vm1352_vm7, %v6322_v54, -inf  ;;  %v1360_v22 = vsel %vm1352_vm7, %v6343_v33, -inf  ;;  %v6700_v54 = vld [vmem:[%s7042_s6 + $0x80] sm:$0xff]  }
 0x1ca   :  { %vm6680_vm6 = vcmp.eq.s32.totalorder %v7099_v47, 0  ;;  %v1794_v37 = vmax.f32 %v1792_v19, %v1793_v48  ;;  %v1801_v24 = vmax.f32 %v1799_v25, %v1800_v56  ;;  %v2000_v46 = vsel %vm1900_vm11, %v6649_v51, %v1999_v43  ;;  %4996 = vmatprep.subr.bf16.mxu0 %v6700_v54 }
 0x1cb   :  { %v2005_v44 = vsel %vm1896_vm9, %v1780_v20, %v2004_v50  ;;  %vm7102_vm3 = vcmask 1047559   ;;  %v1354_v61 = vrot.slane %v1353_v4, 4  ;;  %v1361_v7 = vrot.slane %v1360_v22, 4 }
 0x1cc   :  { %v2001_v58 = vsel %vm7102_vm3, %v6651_v60, %v2000_v46  ;;  %v2006_v28 = vsel %vm1898_vm10, %v1787_v27, %v2005_v44  ;;  %v1367_v51 = vsel %vm1352_vm7, %v6327_v32, -inf  ;;  %v1374_v17 = vsel %vm1352_vm7, %v6351_v23, -inf  ;;  %vm7103_vm12 = vmmov %vm7102_vm3  ;;  %v7112_v44 = vld [vmem:[#allocation11_spill] sm:$0xff] }
 0x1cd   :  { %v2007_v33 = vsel %vm1900_vm11, %v1794_v37, %v2006_v28  ;;  %v2015_v1 = vrot.slane %v2001_v58, 7  ;;  %v1355_v11 = vmax.f32 %v1353_v4, %v1354_v61  ;;  %v1362_v0 = vmax.f32 %v1360_v22, %v1361_v7  ;;  %vm7118_vm13 = vmmov %vm7102_vm3 }
 0x1ce   :  { %v2008_v60 = vsel %vm7103_vm12, %v1801_v24, %v2007_v33  ;;  %v1368_v30 = vrot.slane %v1367_v51, 4  ;;  %v7104_v31 = vrot.slane %v6571_v55, 4  ;;  %v1375_v62 = vrot.slane %v1374_v17, 4  ;;  %vm7121_vm14 = vmmov %vm7102_vm3 }
 0x1cf   :  { %v2016_v49 = vrot.slane %v2008_v60, 7  ;;  %v5054_v40 = vpack.i.bf16 %v2008_v60, %v2001_v58  ;;  %v7105_v19 = vrot.slane %v6563_v59, 2  ;;  %v7106_v23 = vrot.slane %v6567_v35, 2 }
 0x1d0   :  { %v1572_v21 = vmax.f32 %v6571_v55, %v7104_v31  ;;  %v7107_v18 = vrot.slane %v6485_v52, 7  ;;  %v1369_v5 = vmax.f32 %v1367_v51, %v1368_v30  ;;  %v7108_v55 = vrot.slane %v6470_v6, 7 }
 0x1d1   :  { %v6715_v32 = vmax.f32 %v6563_v59, %v7105_v19  ;;  %v6720_v25 = vmax.f32 %v6567_v35, %v7106_v23  ;;  %5055 = vrot.lane.b32.xlu0 %v5054_v40, %s5546_s17  ;;  %v1356_v59 = vrot.slane %v1355_v11, 2  ;;  %v1363_v20 = vrot.slane %v1362_v0, 2 }
 0x1d2   :  { %v2018_v53 = vsel %vm358_vm0, %v7107_v18, %v2015_v1  ;;  %v2020_v34 = vsel %vm358_vm0, %v2016_v49, %v7108_v55  ;;  %v1381_v27 = vsel %vm1352_vm7, %v6330_v13, -inf  ;;  %v7109_v35 = vrot.slane %v6565_v8, 2 }
 0x1d3   :  { %v1566_v26 = vrot.slane %v6611_v15, 2  ;;  %v2021_v3 = vsel %vm6663_vm2, 0.0, %v2020_v34  ;;  %v1376_v36 = vmax.f32 %v1374_v17, %v1375_v62  ;;  %v7110_v6 = vrot.slane %v6577_v29, 2 }
 0x1d4   :  { %v6736_v52 = vmax.f32 %v6565_v8, %v7109_v35  ;;  %v5049_v56 = vpack.i.bf16 %v6597_v57, %v2021_v3  ;;  %v1370_v12 = vrot.slane %v1369_v5, 2  ;;  %v1382_v13 = vrot.slane %v1381_v27, 4 }
 0x1d5   :  { %v6744_v48 = vmax.f32 %v6577_v29, %v7110_v6  ;;  %v2017_v14 = vsel %vm358_vm0, %v2015_v1, %v2016_v49  ;;  %v2023_v8 = vsel %vm6680_vm6, 0.0, %v2018_v53  ;;  %v1388_v47 = vsel %vm1352_vm7, %v6355_v9, -inf }
 0x1d6   :  { %v1395_v43 = vsel %vm1352_vm7, %v6333_v10, -inf  ;;  %5050 = vrot.lane.b32.xlu1 %v5049_v56, %s5546_s17  ;;  %v1357_v29 = vmax.f32 %v1355_v11, %v1356_v59  ;;  %v1364_v50 = vmax.f32 %v1362_v0, %v1363_v20  ;;  %v1383_v4 = vmax.f32 %v1381_v27, %v1382_v13 }
 0x1d7   :  { %v1389_v57 = vrot.slane %v1388_v47, 4  ;;  %v7111_v22 = vrot.slane %v6589_v63, 2  ;;  %v1377_v24 = vrot.slane %v1376_v36, 2  ;;  %v1396_v46 = vrot.slane %v1395_v43, 4 }
 0x1d8   :  { %v1402_v58 = vsel %vm1352_vm7, %v7112_v44, -inf  ;;  %v5059_v9 = vpack.i.bf16 %v2017_v14, %v2023_v8  ;;  %v1371_v28 = vmax.f32 %v1369_v5, %v1370_v12  ;;  %v1384_v61 = vrot.slane %v1383_v4, 2  ;;  %v7115_v44 = vld [vmem:[#allocation10_spill] sm:$0xff] }
 0x1d9   :  { %v6759_v37 = vmax.f32 %v6589_v63, %v7111_v22  ;;  %v1390_v10 = vmax.f32 %v1388_v47, %v1389_v57  ;;  %v1397_v7 = vmax.f32 %v1395_v43, %v1396_v46  ;;  %v1403_v33 = vrot.slane %v1402_v58, 4  ;;  %v7114_v47 = vld [vmem:[#allocation12_spill] sm:$0xff] }
 0x1da   :  { %v1409_v1 = vsel %vm1352_vm7, %v6336_v39, -inf  ;;  %v1416_v51 = vsel %vm1352_vm7, %v6366_v38, -inf  ;;  %v6768_v63 = vmax.f32 %v6611_v15, %v1566_v26  ;;  %v1573_v17 = vrot.slane %v1572_v21, 2  ;;  %5060 = vrot.lane.b32.xlu1 %v5059_v9, %s5546_s17 }
 0x1db   :  { %v1358_v60 = vrot.slane %v1357_v29, 1  ;;  %v1365_v11 = vrot.slane %v1364_v50, 1  ;;  %v1378_v0 = vmax.f32 %v1376_v36, %v1377_v24  ;;  %v1404_v30 = vmax.f32 %v1402_v58, %v1403_v33  ;;  %v7113_v36 = vld [vmem:[#allocation9_spill] sm:$0xff] }
 0x1dc   :  { %v1410_v31 = vrot.slane %v1409_v1, 4  ;;  %v1417_v49 = vrot.slane %v1416_v51, 4  ;;  %v1372_v40 = vrot.slane %v1371_v28, 1  ;;  %v1385_v62 = vmax.f32 %v1383_v4, %v1384_v61 }
 0x1dd   :  { %v1423_v39 = vsel %vm1352_vm7, %v6339_v16, -inf  ;;  %v1430_v38 = vsel %vm1352_vm7, %v6370_v41, -inf  ;;  %v1391_v19 = vrot.slane %v1390_v10, 2  ;;  %v1398_v15 = vrot.slane %v1397_v7, 2 }
 0x1de   :  { %v1411_v23 = vmax.f32 %v1409_v1, %v1410_v31  ;;  %v1418_v18 = vmax.f32 %v1416_v51, %v1417_v49  ;;  %v6775_v53 = vmax.f32 %v1572_v21, %v1573_v17  ;;  %v6777_v5 = vmax.f32 %v1357_v29, %v1358_v60  ;;  %v7116_v51 = vld [vmem:[#allocation13_spill] sm:$0xff] }
 0x1df   :  { %v1424_v55 = vrot.slane %v1423_v39, 4  ;;  %v1431_v34 = vrot.slane %v1430_v38, 4  ;;  %v6779_v59 = vmax.f32 %v1364_v50, %v1365_v11  ;;  %v1379_v20 = vrot.slane %v1378_v0, 1 }
 0x1e0   :  { %v1405_v27 = vrot.slane %v1404_v30, 2  ;;  %v1412_v35 = vrot.slane %v1411_v23, 2  ;;  %v1419_v26 = vrot.slane %v1418_v18, 2  ;;  %v1437_v41 = vsel %vm1352_vm7, %v7113_v36, -inf }
 0x1e1   :  { %v1425_v16 = vmax.f32 %v1423_v39, %v1424_v55  ;;  %v1432_v3 = vmax.f32 %v1430_v38, %v1431_v34  ;;  %v1373_v6 = vmax.f32 %v1371_v28, %v1372_v40  ;;  %v1386_v56 = vrot.slane %v1385_v62, 1 }
 0x1e2   :  { %v1392_v12 = vmax.f32 %v1390_v10, %v1391_v19  ;;  %v1399_v21 = vmax.f32 %v1397_v7, %v1398_v15  ;;  %v1438_v8 = vrot.slane %v1437_v41, 4  ;;  %v1444_v43 = vsel %vm1352_vm7, %v7114_v47, -inf }
 0x1e3   :  { %v1426_v13 = vrot.slane %v1425_v16, 2  ;;  %v1433_v14 = vrot.slane %v1432_v3, 2  ;;  %v1380_v29 = vmax.f32 %v1378_v0, %v1379_v20  ;;  %v1406_v50 = vmax.f32 %v1404_v30, %v1405_v27 }
 0x1e4   :  { %v1413_v4 = vmax.f32 %v1411_v23, %v1412_v35  ;;  %v1445_v57 = vrot.slane %v1444_v43, 4  ;;  %v1420_v22 = vmax.f32 %v1418_v18, %v1419_v26  ;;  %v1439_v46 = vmax.f32 %v1437_v41, %v1438_v8 }
 0x1e5   :  { %v1427_v24 = vmax.f32 %v1425_v16, %v1426_v13  ;;  %v1451_v58 = vsel %vm1352_vm7, %v7115_v44, -inf  ;;  %v1387_v9 = vmax.f32 %v1385_v62, %v1386_v56  ;;  %v1393_v28 = vrot.slane %v1392_v12, 1 }
 0x1e6   :  { %v1446_v61 = vmax.f32 %v1444_v43, %v1445_v57  ;;  %v1452_v10 = vrot.slane %v1451_v58, 4  ;;  %v1400_v7 = vrot.slane %v1399_v21, 1  ;;  %v1434_v33 = vmax.f32 %v1432_v3, %v1433_v14 }
 0x1e7   :  { %v1440_v1 = vrot.slane %v1439_v46, 2  ;;  %v1458_v17 = vsel %vm1352_vm7, %v7116_v51, -inf  ;;  %v1407_v60 = vrot.slane %v1406_v50, 1  ;;  %v1414_v31 = vrot.slane %v1413_v4, 1 }
 0x1e8   :  { %v1447_v11 = vrot.slane %v1446_v61, 2  ;;  %v1453_v0 = vmax.f32 %v1451_v58, %v1452_v10  ;;  %v1459_v30 = vrot.slane %v1458_v17, 4  ;;  %v1421_v49 = vrot.slane %v1420_v22, 1 }
 0x1e9   :  { %v1428_v40 = vrot.slane %v1427_v24, 1  ;;  %v1441_v39 = vmax.f32 %v1439_v46, %v1440_v1  ;;  %v1533_v15 = vrot.slane %v6736_v52, 1  ;;  %v1394_v23 = vmax.f32 %v1392_v12, %v1393_v28  ;;  %v7117_v28 = vld [vmem:[#allocation15_spill] sm:$0xff]  ;;  %v7119_v1 = vld [vmem:[#allocation20_spill] sm:$0xff] }
 0x1ea   :  { %v1448_v38 = vmax.f32 %v1446_v61, %v1447_v11  ;;  %v1454_v19 = vrot.slane %v1453_v0, 2  ;;  %v1460_v62 = vmax.f32 %v1458_v17, %v1459_v30  ;;  %v1435_v18 = vrot.slane %v1434_v33, 1  ;;  %v7120_v17 = vld [vmem:[#allocation19_spill] sm:$0xff] }
 0x1eb   :  { %v1442_v55 = vrot.slane %v1441_v39, 1  ;;  %v1526_v34 = vrot.slane %v6715_v32, 1  ;;  %v1401_v20 = vmax.f32 %v1399_v21, %v1400_v7  ;;  %v1408_v27 = vmax.f32 %v1406_v50, %v1407_v60 }
 0x1ec   :  { %v1540_v35 = vrot.slane %v6720_v25, 1  ;;  %v1547_v26 = vrot.slane %v6744_v48, 1  ;;  %v1415_v16 = vmax.f32 %v1413_v4, %v1414_v31  ;;  %v1449_v3 = vrot.slane %v1448_v38, 1 }
 0x1ed   :  { %v1455_v36 = vmax.f32 %v1453_v0, %v1454_v19  ;;  %v1461_v41 = vrot.slane %v1460_v62, 2  ;;  %v1422_v56 = vmax.f32 %v1420_v22, %v1421_v49  ;;  %v1429_v13 = vmax.f32 %v1427_v24, %v1428_v40 }
 0x1ee   :  { %v1534_v14 = vmax.f32 %v6736_v52, %v1533_v15  ;;  %v1561_v12 = vrot.slane %v6759_v37, 1  ;;  %v1436_v8 = vmax.f32 %v1434_v33, %v1435_v18  ;;  %v1443_v47 = vmax.f32 %v1441_v39, %v1442_v55 }
 0x1ef   :  { %v1527_v43 = vmax.f32 %v6715_v32, %v1526_v34  ;;  %v1891_v21 = vsel %vm1890_vm4, %v6779_v59, %v6777_v5  ;;  %v1541_v50 = vmax.f32 %v6720_v25, %v1540_v35  ;;  %v1548_v4 = vmax.f32 %v6744_v48, %v1547_v26 }
 0x1f0   :  { %v1568_v57 = vrot.slane %v6768_v63, 1  ;;  %v1893_v22 = vsel %vm1892_vm5, %v1373_v6, %v1891_v21  ;;  %v1450_v24 = vmax.f32 %v1448_v38, %v1449_v3  ;;  %v1456_v52 = vrot.slane %v1455_v36, 1 }
 0x1f1   :  { %v6803_v46 = vmax.f32 %v1460_v62, %v1461_v41  ;;  %v1895_v44 = vsel %vm1894_vm8, %v1380_v29, %v1893_v22  ;;  %v1562_v32 = vmax.f32 %v6759_v37, %v1561_v12  ;;  %v1575_v58 = vrot.slane %v6775_v53, 1  ;;  %v7122_v62 = vld [vmem:[#allocation16_spill] sm:$0xff] }
 0x1f2   :  { %v1897_v5 = vsel %vm1896_vm9, %v1387_v9, %v1895_v44  ;;  %v1918_v25 = vsel %vm1890_vm4, %v1534_v14, %v1527_v43  ;;  %v1904_v59 = vsel %vm1890_vm4, %v1422_v56, %v1415_v16  ;;  %v1465_v61 = vsel %vm1352_vm7, %v7117_v28, -inf  ;;  %v7124_v16 = vld [vmem:[#allocation17_spill] sm:$0xff] }
 0x1f3   :  { %v1899_v48 = vsel %vm1898_vm10, %v1394_v23, %v1897_v5  ;;  %v1919_v6 = vsel %vm1892_vm5, %v1541_v50, %v1918_v25  ;;  %v1569_v10 = vmax.f32 %v6768_v63, %v1568_v57  ;;  %v1466_v7 = vrot.slane %v1465_v61, 4  ;;  %v7123_v23 = vld [vmem:[#allocation21_spill] sm:$0xff]  ;;  %v7126_v57 = vld [vmem:[#allocation22_spill] sm:$0xff] }
 0x1f4   :  { %v1901_v29 = vsel %vm1900_vm11, %v1401_v20, %v1899_v48  ;;  %v1920_v37 = vsel %vm1894_vm8, %v1548_v4, %v1919_v6  ;;  %v6818_v33 = vmax.f32 %v1455_v36, %v1456_v52  ;;  %v1472_v60 = vsel %vm1352_vm7, %v7120_v17, -inf }
 0x1f5   :  { %v6821_v9 = vsel %vm7118_vm13, %v1408_v27, %v1901_v29  ;;  %v1921_v51 = vsel %vm1896_vm9, %v7119_v1, %v1920_v37  ;;  %v1463_v11 = vrot.slane %v6803_v46, 1  ;;  %v1576_v63 = vmax.f32 %v6775_v53, %v1575_v58  ;;  %v7127_v58 = vld [vmem:[#allocation18_spill] sm:$0xff] }
 0x1f6   :  { %v1905_v0 = vsel %vm1892_vm5, %v1429_v13, %v1904_v59  ;;  %v1922_v30 = vsel %vm1898_vm10, %v1562_v32, %v1921_v51  ;;  %v1929_v49 = vrot.slane %v6821_v9, 7  ;;  %v2025_v40 = vrot.slane %v6821_v9, 1 }
 0x1f7   :  { %v1923_v31 = vsel %vm1900_vm11, %v1569_v10, %v1922_v30  ;;  %v1467_v39 = vmax.f32 %v1465_v61, %v1466_v7  ;;  %v1473_v19 = vrot.slane %v1472_v60, 4  ;;  %v1479_v15 = vsel %vm1352_vm7, %v7122_v62, -inf  ;;  %v7128_v10 = vld [vmem:[#allocation23_spill] sm:$0xff] }
 0x1f8   :  { %v6835_v38 = vsel %vm7121_vm14, %v1576_v63, %v1923_v31  ;;  %v1486_v53 = vsel %vm1352_vm7, %v7123_v23, -inf  ;;  %v1906_v18 = vsel %vm1894_vm8, %v1436_v8, %v1905_v0  ;;  %v1480_v35 = vrot.slane %v1479_v15, 4 }
 0x1f9   :  { %v2028_v55 = vrot.slane %v6835_v38, 1  ;;  %v1932_v34 = vrot.slane %v6835_v38, 7  ;;  %v1468_v20 = vrot.slane %v1467_v39, 2  ;;  %v1474_v27 = vmax.f32 %v1472_v60, %v1473_v19  ;;  %v7129_v19 = vld [vmem:[#allocation14_spill] sm:$0xff] }
 0x1fa   :  { %v1487_v26 = vrot.slane %v1486_v53, 4  ;;  %v1493_v3 = vsel %vm1352_vm7, %v7124_v16, -inf  ;;  %vm7125_vm15 = vcmp.lt.s32.totalorder %v5645_v2, 7  ;;  %v1907_v14 = vsel %vm1896_vm9, %v1443_v47, %v1906_v18 }
 0x1fb   :  { %v6852_v36 = vsel %vm7125_vm15, %v2028_v55, %v2025_v40  ;;  %v6860_v41 = vsel %vm358_vm0, %v1932_v34, %v1929_v49  ;;  %v1469_v56 = vmax.f32 %v1467_v39, %v1468_v20  ;;  %v1494_v13 = vrot.slane %v1493_v3, 4 }
 0x1fc   :  { %v1945_v12 = vsel %vm6663_vm2, 0.0, %v6860_v41  ;;  %v1475_v8 = vrot.slane %v1474_v27, 2  ;;  %v1481_v43 = vmax.f32 %v1479_v15, %v1480_v35  ;;  %v1488_v50 = vmax.f32 %v1486_v53, %v1487_v26 }
 0x1fd   :  { %v1470_v21 = vrot.slane %v1469_v56, 1  ;;  %v1495_v4 = vmax.f32 %v1493_v3, %v1494_v13  ;;  %v1500_v22 = vsel %vm1352_vm7, %v7126_v57, -inf  ;;  %v1507_v5 = vsel %vm1352_vm7, %v7127_v58, -inf }
 0x1fe   :  { %v1476_v52 = vmax.f32 %v1474_v27, %v1475_v8  ;;  %v1482_v44 = vrot.slane %v1481_v43, 2  ;;  %v1501_v32 = vrot.slane %v1500_v22, 4  ;;  %v1908_v47 = vsel %vm1898_vm10, %v1450_v24, %v1907_v14 }
 0x1ff   :  { %v1489_v25 = vrot.slane %v1488_v50, 2  ;;  %v1496_v48 = vrot.slane %v1495_v4, 2  ;;  %v1508_v59 = vrot.slane %v1507_v5, 4  ;;  %v1514_v29 = vsel %vm1352_vm7, %v7128_v10, -inf  ;;  %vm7130_vm7 = vmmov %vm7102_vm3 }
 0x200   :  { %v1477_v6 = vrot.slane %v1476_v52, 1  ;;  %v1483_v28 = vmax.f32 %v1481_v43, %v1482_v44  ;;  %v1502_v61 = vmax.f32 %v1500_v22, %v1501_v32  ;;  %v1515_v51 = vrot.slane %v1514_v29, 4  ;;  %v5110_v22 = vld [vmem:[#allocation3 + $0x44] ss:$8 sps:$4 sm:$0xff]  }
 0x201   :  { %v1490_v37 = vmax.f32 %v1488_v50, %v1489_v25  ;;  %v1497_v7 = vmax.f32 %v1495_v4, %v1496_v48  ;;  %v1509_v1 = vmax.f32 %v1507_v5, %v1508_v59  ;;  %v1471_v17 = vmax.f32 %v1469_v56, %v1470_v21 }
 0x202   :  { %v1478_v60 = vmax.f32 %v1476_v52, %v1477_v6  ;;  %v1484_v63 = vrot.slane %v1483_v28, 1  ;;  %v1503_v0 = vrot.slane %v1502_v61, 2  ;;  %v1516_v39 = vmax.f32 %v1514_v29, %v1515_v51 }
 0x203   :  { %v1491_v30 = vrot.slane %v1490_v37, 1  ;;  %v1498_v31 = vrot.slane %v1497_v7, 1  ;;  %v1510_v24 = vrot.slane %v1509_v1, 2  ;;  %v1827_v62 = vand.u32 15, %v7129_v19 }
 0x204   :  { %v1485_v15 = vmax.f32 %v1483_v28, %v1484_v63  ;;  %v1504_v23 = vmax.f32 %v1502_v61, %v1503_v0  ;;  %v1911_v53 = vsel %vm1890_vm4, %v1478_v60, %v1471_v17  ;;  %v1909_v18 = vsel %vm1900_vm11, %v6818_v33, %v1908_v47 }
 0x205   :  { %v1492_v20 = vmax.f32 %v1490_v37, %v1491_v30  ;;  %v1511_v27 = vmax.f32 %v1509_v1, %v1510_v24  ;;  %v1517_v35 = vrot.slane %v1516_v39, 2  ;;  %v1464_v26 = vmax.f32 %v6803_v46, %v1463_v11 }
 0x206   :  { %v1499_v16 = vmax.f32 %v1497_v7, %v1498_v31  ;;  %v1505_v3 = vrot.slane %v1504_v23, 1  ;;  %v1912_v56 = vsel %vm1892_vm5, %v1485_v15, %v1911_v53  ;;  %v103_v43 = vadd.s32 8, %v5645_v2  ;;  %vm7133_vm5 = vmmov %vm7102_vm3 }
 0x207   :  { %v1512_v13 = vrot.slane %v1511_v27, 1  ;;  %v1518_v14 = vmax.f32 %v1516_v39, %v1517_v35  ;;  %v1913_v8 = vsel %vm1894_vm8, %v1492_v20, %v1912_v56  ;;  %v1910_v21 = vsel %vm7130_vm7, %v1464_v26, %v1909_v18  ;;  %v5086_v35 = vld [vmem:[#allocation3 + $0x4] ss:$8 sps:$4 sm:$0xff]   ;;  %v5092_v56 = vld [vmem:[#allocation3 + $0x14] ss:$8 sps:$4 sm:$0xff]  }
 0x208   :  { %v1506_v33 = vmax.f32 %v1504_v23, %v1505_v3  ;;  %v1914_v50 = vsel %vm1896_vm9, %v1499_v16, %v1913_v8  ;;  %vm6885_vm4 = vcmp.eq.s32.totalorder %v1827_v62, 15  ;;  %v2026_v11 = vrot.slane %v1910_v21, 1  ;;  %vm7134_vm9 = vmmov %vm7125_vm15  ;;  %v5087_v26 = vld [vmem:[#allocation3 + $0x304] ss:$8 sps:$4 sm:$0xff]   ;;  %v5089_v16 = vld [vmem:[#allocation3 + $0x300] ss:$8 sps:$4 sm:$0xff]  }
 0x209   :  { %v1513_v4 = vmax.f32 %v1511_v27, %v1512_v13  ;;  %v1519_v57 = vrot.slane %v1518_v14, 1  ;;  %v1813_v32 = vand.u32 15, %v103_v43  ;;  %v1930_v58 = vrot.slane %v1910_v21, 7  ;;  %4151 = vmatprep.subr.bf16.mxu1 %v5087_v26  ;;  %v5090_v3 = vld [vmem:[#allocation3 + $0x10] ss:$8 sps:$4 sm:$0xff]  }
 0x20a   :  { %v1915_v46 = vsel %vm1898_vm10, %v1506_v33, %v1914_v50  ;;  %v2044_v47 = vsel %vm6885_vm4, 0.0, %v6852_v36  ;;  %v2031_v59 = vsel %vm7134_vm9, %v2025_v40, %v2026_v11  ;;  %vm7135_vm10 = vmmov %vm7134_vm9  ;;  %vm7137_vm1 = vcmask 523264   ;;  %4152 = vmatpush1.bf16.msra.mxu1 %v5089_v16  ;;  %v5093_v13 = vld [vmem:[#allocation3 + $0x314] ss:$8 sps:$4 sm:$0xff]   ;;  %v5096_v8 = vld [vmem:[#allocation3 + $0x20] ss:$8 sps:$4 sm:$0xff]  }
 0x20b   :  { %v1520_v52 = vmax.f32 %v1518_v14, %v1519_v57  ;;  %v1916_v44 = vsel %vm1900_vm11, %v1513_v4, %v1915_v46  ;;  %vm1855_vm8 = vcmp.eq.s32.totalorder %v1813_v32, 15  ;;  %vm7136_vm11 = vmmov %vm7134_vm9  ;;  %v1935_v62 = vsel %vm358_vm0, %v1929_v49, %v1930_v58  ;;  %v5082_v49 = vld [vmem:[%s7042_s6 + $0x90] sm:$0xff]   ;;  %4153 = vmatprep.subr.bf16.mxu1 %v5093_v13  ;;  %v5098_v43 = vld [vmem:[#allocation3 + $0x24] ss:$8 sps:$4 sm:$0xff]  }
 0x20c   :  { %vm7138_vm3 = vmmov %vm7137_vm1  ;;  %v5095_v14 = vld [vmem:[#allocation3 + $0x310] ss:$8 sps:$4 sm:$0xff]   ;;  %v5101_v33 = vld [vmem:[#allocation3 + $0x320] ss:$8 sps:$4 sm:$0xff]  }
 0x20d   :  { %v1917_v5 = vsel %vm7133_vm5, %v1520_v52, %v1916_v44  ;;  %vm7139_vm12 = vmmov %vm7137_vm1  ;;  %v5104_v50 = vld [vmem:[#allocation3 + $0x34] ss:$8 sps:$4 sm:$0xff]   ;;  %v5102_v4 = vld [vmem:[#allocation3 + $0x30] ss:$8 sps:$4 sm:$0xff]  }
 0x20e   :  { %v1931_v25 = vrot.slane %v1917_v5, 7  ;;  %v2027_v48 = vrot.slane %v1917_v5, 1  ;;  %v5046_v6 = vpop.permute.xlu0 %5045  ;;  %vm7140_vm13 = vmmov %vm7137_vm1  ;;  %4154 = vmatpush1.bf16.msra.mxu1 %v5095_v14  ;;  %v5105_v57 = vld [vmem:[#allocation3 + $0x334] ss:$8 sps:$4 sm:$0xff]   ;;  %v5107_v46 = vld [vmem:[#allocation3 + $0x330] ss:$8 sps:$4 sm:$0xff]  }
 0x20f   :  { %v5048_v29 = vunpack.i.h.bf16 %v5046_v6  ;;  %v5047_v37 = vunpack.i.l.bf16 %v5046_v6  ;;  %vm7142_vm14 = vmmov %vm7137_vm1  ;;  %v5111_v52 = vld [vmem:[#allocation3 + $0x344] ss:$8 sps:$4 sm:$0xff]   ;;  %v5116_v44 = vld [vmem:[#allocation3 + $0x54] ss:$8 sps:$4 sm:$0xff]  }
 0x210   :  { %v2029_v28 = vsel %vm7135_vm10, %v2027_v48, %v2028_v55  ;;  %v1933_v61 = vsel %vm358_vm0, %v1931_v25, %v1932_v34  ;;  %v1934_v36 = vsel %vm358_vm0, %v1930_v58, %v1931_v25  ;;  %v2030_v10 = vsel %vm7136_vm11, %v2026_v11, %v2027_v48  ;;  %vm7143_vm0 = vmmov %vm7137_vm1  ;;  %v5108_v11 = vld [vmem:[#allocation3 + $0x40] ss:$8 sps:$4 sm:$0xff]   ;;  %v5114_v58 = vld [vmem:[#allocation3 + $0x50] ss:$8 sps:$4 sm:$0xff]  }
 0x211   :  { %v2086_v40 = vpack.c.bf16 %v2044_v47, %v2029_v28  ;;  %v1947_v7 = vsel %vm6680_vm6, 0.0, %v1934_v36  ;;  %v2042_v1 = vsel %vm1855_vm8, 0.0, %v2030_v10  ;;  %v2077_v55 = vsel %vm7137_vm1, %v6821_v9, %v5047_v37  ;;  %vm7141_vm6 = vmmov %vm7137_vm1  ;;  %v5113_v32 = vld [vmem:[#allocation3 + $0x340] ss:$8 sps:$4 sm:$0xff]   ;;  %v5122_v47 = vld [vmem:[#allocation3 + $0x64] ss:$8 sps:$4 sm:$0xff]  }
 0x212   :  { %v2078_v51 = vsel %vm7138_vm3, %v1910_v21, %v5048_v29  ;;  %v2083_v17 = vpack.c.bf16 %v2042_v1, %v2031_v59  ;;  %vm7144_vm15 = vmmov %vm7143_vm0  ;;  %v5099_v21 = vld [vmem:[#allocation3 + $0x324] ss:$8 sps:$4 sm:$0xff]   ;;  %v5119_v25 = vld [vmem:[#allocation3 + $0x350] ss:$8 sps:$4 sm:$0xff]   ;;  %vm4358_vm10 = vcmask 1041408  }
 0x213   :  { %v2082_v34 = vpack.c.bf16 %v2078_v51, %v2077_v55  ;;  %vm7145_vm2 = vmmov %vm7143_vm0  ;;  %4155 = vmatprep.subr.bf16.mxu1 %v5099_v21  ;;  %v5120_v48 = vld [vmem:[#allocation3 + $0x60] ss:$8 sps:$4 sm:$0xff]   ;;  %v5123_v59 = vld [vmem:[#allocation3 + $0x364] ss:$8 sps:$4 sm:$0xff]  }
 0x214   :  { %vm7146_vm7 = vmmov %vm7143_vm0  ;;  %4156 = vmatpush1.bf16.msra.mxu1 %v5101_v33  ;;  %v5128_v6 = vld [vmem:[#allocation3 + $0x74] ss:$8 sps:$4 sm:$0xff]   ;;  %v5125_v28 = vld [vmem:[#allocation3 + $0x360] ss:$8 sps:$4 sm:$0xff]  }
 0x215   :  { %2292 = vmatprep.mubr.bf16.mxu0 %v2082_v34  ;;  %4157 = vmatprep.subr.bf16.mxu1 %v5105_v57  ;;  %v5129_v36 = vld [vmem:[#allocation3 + $0x374] ss:$8 sps:$4 sm:$0xff]   ;;  %v5134_v10 = vld [vmem:[#allocation3 + $0x84] ss:$8 sps:$4 sm:$0xff]   ;;  %v5131_v29 = vld [vmem:[#allocation3 + $0x370] ss:$8 sps:$4 sm:$0xff]  }
 0x216   :  { %v5132_v37 = vld [vmem:[#allocation3 + $0x80] ss:$8 sps:$4 sm:$0xff]   ;;  %v5138_v55 = vld [vmem:[#allocation3 + $0x90] ss:$8 sps:$4 sm:$0xff]   ;;  %v5141_v51 = vld [vmem:[#allocation3 + $0x394] ss:$8 sps:$4 sm:$0xff]  }
 0x217   :  { %v5137_v1 = vld [vmem:[#allocation3 + $0x380] ss:$8 sps:$4 sm:$0xff]   ;;  %v5143_v34 = vld [vmem:[#allocation3 + $0x390] ss:$8 sps:$4 sm:$0xff]   ;;  %v5185_v26 = vld [vmem:[#allocation3 + $0x404] ss:$8 sps:$4 sm:$0xff]  }
 0x218   :  { %4158 = vmatpush1.bf16.msra.mxu1 %v5107_v46 }
 0x219   :  { %4159 = vmatprep.subr.bf16.mxu1 %v5111_v52 }
 0x21c   :  { %4160 = vmatpush1.bf16.msra.mxu1 %v5113_v32 }
 0x243   :  { %v5056_v60 = vpop.permute.xlu0 %5055 }
 0x244   :  { %v5058_v63 = vunpack.i.h.bf16 %v5056_v60  ;;  %v5057_v0 = vunpack.i.l.bf16 %v5056_v60  ;;  %v5144_v60 = vld [vmem:[#allocation3 + $0xa0] ss:$8 sps:$4 sm:$0xff]  }
 0x246   :  { %v2079_v30 = vsel %vm7139_vm12, %v1917_v5, %v5057_v0  ;;  %v2080_v31 = vsel %vm7140_vm13, %v6835_v38, %v5058_v63  ;;  %v5081_v38 = vld [vmem:[%s7042_s6 + $0x88] sm:$0xff]   ;;  %v5117_v5 = vld [vmem:[#allocation3 + $0x354] ss:$8 sps:$4 sm:$0xff]  }
 0x247   :  { %v2085_v45 = vpack.c.bf16 %v2080_v31, %v2079_v30  ;;  %4161 = vmatprep.subr.bf16.mxu1 %v5117_v5  ;;  %v5147_v63 = vld [vmem:[#allocation3 + $0x3a4] ss:$8 sps:$4 sm:$0xff]   ;;  %v5152_v0 = vld [vmem:[#allocation3 + $0xb4] ss:$8 sps:$4 sm:$0xff]   ;;  %v5149_v30 = vld [vmem:[#allocation3 + $0x3a0] ss:$8 sps:$4 sm:$0xff]  }
 0x248   :  { %v5051_v24 = vpop.permute.xlu1 %5050  ;;  %4162 = vmatpush1.bf16.msra.mxu1 %v5119_v25  ;;  %v5150_v31 = vld [vmem:[#allocation3 + $0xb0] ss:$8 sps:$4 sm:$0xff]  }
 0x249   :  { %v5053_v39 = vunpack.i.h.bf16 %v5051_v24  ;;  %v5052_v19 = vunpack.i.l.bf16 %v5051_v24  ;;  %4163 = vmatprep.subr.bf16.mxu1 %v5123_v59  ;;  %v5153_v24 = vld [vmem:[#allocation3 + $0x3b4] ss:$8 sps:$4 sm:$0xff]  }
 0x24b   :  { %v2073_v15 = vsel %vm7141_vm6, %v1945_v12, %v5052_v19  ;;  %v2074_v23 = vsel %vm7142_vm14, %v1935_v62, %v5053_v39  ;;  %v5083_v12 = vld [vmem:[%s7042_s6 + $0x98] sm:$0xff]   ;;  %v5156_v19 = vld [vmem:[#allocation3 + $0xc0] ss:$8 sps:$4 sm:$0xff]   ;;  %v5159_v62 = vld [vmem:[#allocation3 + $0x3c4] ss:$8 sps:$4 sm:$0xff]  }
 0x24c   :  { %v5061_v53 = vpop.permute.xlu1 %5060  ;;  %v2081_v18 = vpack.c.bf16 %v2074_v23, %v2073_v15  ;;  %4164 = vmatpush1.bf16.msra.mxu1 %v5125_v28  ;;  %v5155_v39 = vld [vmem:[#allocation3 + $0x3b0] ss:$8 sps:$4 sm:$0xff]   ;;  %v5164_v15 = vld [vmem:[#allocation3 + $0xd4] ss:$8 sps:$4 sm:$0xff]   ;;  %v5161_v23 = vld [vmem:[#allocation3 + $0x3c0] ss:$8 sps:$4 sm:$0xff]  }
 0x24d   :  { %v5063_v20 = vunpack.i.h.bf16 %v5061_v53  ;;  %v5062_v27 = vunpack.i.l.bf16 %v5061_v53  ;;  %4165 = vmatprep.subr.bf16.mxu1 %v5129_v36  ;;  %v5162_v53 = vld [vmem:[#allocation3 + $0xd0] ss:$8 sps:$4 sm:$0xff]  }
 0x24e   :  { %2293 = vmatmul.mubr.bf16.vlgmr.msra.gmra.mrb[0].mxu0 %v2081_v18  ;;  %v5165_v18 = vld [vmem:[#allocation3 + $0x3d4] ss:$8 sps:$4 sm:$0xff]  }
 0x24f   :  { %4997 = vmatpush3.bf16.msra.mxu0 %v6700_v54  ;;  %2300 = vmatprep.mubr.bf16.mxu0 %v2085_v45  ;;  %v2075_v42 = vsel %vm7143_vm0, %v1947_v7, %v5062_v27  ;;  %v2076_v9 = vsel %vm7144_vm15, %v1933_v61, %v5063_v20  ;;  %v5084_v54 = vld [vmem:[#allocation3] ss:$8 sps:$4 sm:$0xff]   ;;  %v5126_v61 = vld [vmem:[#allocation3 + $0x70] ss:$8 sps:$4 sm:$0xff]   ;;  %v5140_v7 = vld [vmem:[#allocation3 + $0x94] ss:$8 sps:$4 sm:$0xff]  }
 0x250   :  { %4998 = vmatprep.subr.bf16.mxu0 %v5081_v38  ;;  %v2084_v41 = vpack.c.bf16 %v2076_v9, %v2075_v42  ;;  %4166 = vmatpush1.bf16.msra.mxu1 %v5131_v29  ;;  %v5158_v45 = vld [vmem:[#allocation3 + $0xc4] ss:$8 sps:$4 sm:$0xff]   ;;  %v5167_v20 = vld [vmem:[#allocation3 + $0x3d0] ss:$8 sps:$4 sm:$0xff]   ;;  %v5168_v27 = vld [vmem:[#allocation3 + $0xe0] ss:$8 sps:$4 sm:$0xff]  }
 0x251   :  { %v5171_v42 = vld [vmem:[#allocation3 + $0x3e4] ss:$8 sps:$4 sm:$0xff]   ;;  %v5176_v9 = vld [vmem:[#allocation3 + $0xf4] ss:$8 sps:$4 sm:$0xff]  }
 0x253   :  { %4999 = vmatpush3.bf16.msra.mxu0 %v5081_v38  ;;  %v5170_v38 = vld [vmem:[#allocation3 + $0xe4] ss:$8 sps:$4 sm:$0xff]  }
 0x254   :  { %5000 = vmatprep.subr.bf16.mxu0 %v5082_v49 }
 0x256   :  { %2301 = vmatmul.mubr.bf16.gmra.mrb[4].mxu0 %v2084_v41  ;;  %v5174_v41 = vld [vmem:[#allocation3 + $0xf0] ss:$8 sps:$4 sm:$0xff]  }
 0x257   :  { %5001 = vmatpush3.bf16.msra.mxu0 %v5082_v49  ;;  %5004 = vmatprep.mubr.msk.bf16.mxu0 %vm7145_vm2, %v2083_v17  ;;  %v5146_v17 = vld [vmem:[#allocation3 + $0xa4] ss:$8 sps:$4 sm:$0xff]   ;;  %v5173_v49 = vld [vmem:[#allocation3 + $0x3e0] ss:$8 sps:$4 sm:$0xff]  }
 0x258   :  { %5002 = vmatprep.subr.bf16.mxu0 %v5083_v12 }
 0x25b   :  { %5003 = vmatpush3.bf16.msra.mxu0 %v5083_v12  ;;  %v5177_v12 = vld [vmem:[#allocation3 + $0x3f4] ss:$8 sps:$4 sm:$0xff]  }
 0x25c   :  { %4028 = vmatprep.subr.bf16.mxu0 %v5086_v35  ;;  %v5179_v35 = vld [vmem:[#allocation3 + $0x3f0] ss:$8 sps:$4 sm:$0xff]  }
 0x25e   :  { %5005 = vmatmul.mubr.msk.bf16.vlgmr.msra.gmra.mrb[8].mxu0 %vm7146_vm7, %v2086_v40  ;;  %v5135_v40 = vld [vmem:[#allocation3 + $0x384] ss:$8 sps:$4 sm:$0xff]  }
 0x25f   :  { %4029 = vmatpush1.bf16.msra.mxu0 %v5084_v54  ;;  %4167 = vmatprep.subr.bf16.mxu1 %v5135_v40  ;;  %v5182_v54 = vld [vmem:[#allocation3 + $0x104] ss:$8 sps:$4 sm:$0xff]  }
 0x260   :  { %4030 = vmatprep.subr.bf16.mxu0 %v5092_v56  ;;  %4168 = vmatpush1.bf16.msra.mxu1 %v5137_v1 }
 0x261   :  { %4169 = vmatprep.subr.bf16.mxu1 %v5141_v51 }
 0x263   :  { %4031 = vmatpush1.bf16.msra.mxu0 %v5090_v3 }
 0x264   :  { %4032 = vmatprep.subr.bf16.mxu0 %v5098_v43  ;;  %4170 = vmatpush1.bf16.msra.mxu1 %v5143_v34 }
 0x265   :  { %4171 = vmatprep.subr.bf16.mxu1 %v5147_v63 }
 0x267   :  { %4033 = vmatpush1.bf16.msra.mxu0 %v5096_v8 }
 0x268   :  { %4034 = vmatprep.subr.bf16.mxu0 %v5104_v50  ;;  %4172 = vmatpush1.bf16.msra.mxu1 %v5149_v30 }
 0x269   :  { %4173 = vmatprep.subr.bf16.mxu1 %v5153_v24 }
 0x26b   :  { %4035 = vmatpush1.bf16.msra.mxu0 %v5102_v4 }
 0x26c   :  { %4036 = vmatprep.subr.bf16.mxu0 %v5110_v22  ;;  %4174 = vmatpush1.bf16.msra.mxu1 %v5155_v39  ;;  %v4642_v22 = vld [vmem:[%s7043_s7] ss:$0 sm:$0xff] }
 0x26d   :  { %4175 = vmatprep.subr.bf16.mxu1 %v5159_v62 }
 0x26f   :  { %4037 = vmatpush1.bf16.msra.mxu0 %v5108_v11 }
 0x270   :  { %4038 = vmatprep.subr.bf16.mxu0 %v5116_v44  ;;  %4176 = vmatpush1.bf16.msra.mxu1 %v5161_v23 }
 0x271   :  { %4177 = vmatprep.subr.bf16.mxu1 %v5165_v18 }
 0x273   :  { %4039 = vmatpush1.bf16.msra.mxu0 %v5114_v58 }
 0x274   :  { %4040 = vmatprep.subr.bf16.mxu0 %v5122_v47  ;;  %4178 = vmatpush1.bf16.msra.mxu1 %v5167_v20 }
 0x275   :  { %4179 = vmatprep.subr.bf16.mxu1 %v5171_v42 }
 0x277   :  { %4041 = vmatpush1.bf16.msra.mxu0 %v5120_v48 }
 0x278   :  { %4042 = vmatprep.subr.bf16.mxu0 %v5128_v6  ;;  %4180 = vmatpush1.bf16.msra.mxu1 %v5173_v49  ;;  %v4665_v49 = vld [vmem:[%s7044_s8] ss:$0 sm:$0xff] }
 0x279   :  { %4181 = vmatprep.subr.bf16.mxu1 %v5177_v12 }
 0x27b   :  { %4043 = vmatpush1.bf16.msra.mxu0 %v5126_v61 }
 0x27c   :  { %4044 = vmatprep.subr.bf16.mxu0 %v5134_v10  ;;  %4182 = vmatpush1.bf16.msra.mxu1 %v5179_v35 }
 0x27d   :  { %4192 = vmatprep.subr.bf16.mxu1 %v5185_v26  ;;  %v4666_v26 = vld [vmem:[%s7045_s9] ss:$0 sm:$0xff] }
 0x27f   :  { %4045 = vmatpush1.bf16.msra.mxu0 %v5132_v37 }
 0x280   :  { %4046 = vmatprep.subr.bf16.mxu0 %v5140_v7 }
 0x283   :  { %4047 = vmatpush1.bf16.msra.mxu0 %v5138_v55 }
 0x284   :  { %4048 = vmatprep.subr.bf16.mxu0 %v5146_v17 }
 0x287   :  { %4049 = vmatpush1.bf16.msra.mxu0 %v5144_v60 }
 0x288   :  { %4050 = vmatprep.subr.bf16.mxu0 %v5152_v0 }
 0x28b   :  { %4051 = vmatpush1.bf16.msra.mxu0 %v5150_v31 }
 0x28c   :  { %4052 = vmatprep.subr.bf16.mxu0 %v5158_v45 }
 0x28f   :  { %4053 = vmatpush1.bf16.msra.mxu0 %v5156_v19 }
 0x290   :  { %4054 = vmatprep.subr.bf16.mxu0 %v5164_v15 }
 0x293   :  { %4055 = vmatpush1.bf16.msra.mxu0 %v5162_v53 }
 0x294   :  { %4056 = vmatprep.subr.bf16.mxu0 %v5170_v38 }
 0x297   :  { %4057 = vmatpush1.bf16.msra.mxu0 %v5168_v27 }
 0x298   :  { %4058 = vmatprep.subr.bf16.mxu0 %v5176_v9 }
 0x29b   :  { %4059 = vmatpush1.bf16.msra.mxu0 %v5174_v41 }
 0x29c   :  { %4069 = vmatprep.subr.bf16.mxu0 %v5182_v54 }
 0x321   :  { %v4956_v16 = vpop.f32.mrb[0].mxu0 }
 0x322   :  { %v4957_v3 = vpop.f32.mrb[1].mxu0 }
 0x323   :  { %v4958_v56 = vadd.f32 %v4957_v3, %v4956_v16  ;;  %v4959_v13 = vpop.f32.mrb[2].mxu0 }
 0x324   :  { %v4960_v14 = vpop.f32.mrb[3].mxu0 }
 0x325   :  { %v4961_v8 = vadd.f32 %v4960_v14, %v4959_v13  ;;  %v2295_v52 = vadd.f32 %v4958_v56, %v4642_v22 }
 0x327   :  { %v2298_v25 = vadd.f32 %v4961_v8, %v4642_v22 }
 0x329   :  { %v4962_v43 = vpop.f32.mrb[4].mxu0 }
 0x32a   :  { %v4963_v21 = vpop.f32.mrb[5].mxu0 }
 0x32b   :  { %v4964_v33 = vadd.f32 %v4963_v21, %v4962_v43  ;;  %v4965_v50 = vpop.f32.mrb[6].mxu0 }
 0x32c   :  { %v4966_v4 = vpop.f32.mrb[7].mxu0 }
 0x32d   :  { %v4967_v57 = vadd.f32 %v4966_v4, %v4965_v50  ;;  %v2303_v46 = vadd.f32 %v4964_v33, %v4642_v22 }
 0x32f   :  { %v2306_v58 = vadd.f32 %v4967_v57, %v4642_v22 }
 0x331   :  { %v5006_v11 = vpop.f32.mrb[8].mxu0 }
 0x332   :  { %v2352_v44 = vadd.f32 %v5006_v11, %v2303_v46  ;;  %v2343_v32 = vpop.f32.mrb[9].mxu0 }
 0x333   :  { %v2344_v5 = vadd.f32 %v2343_v32, %v2295_v52  ;;  %v5007_v47 = vpop.f32.mrb[10].mxu0  ;;  %v5183_v32 = vld [vmem:[#allocation3 + $0x400] ss:$8 sps:$4 sm:$0xff]  }
 0x334   :  { %v2355_v48 = vadd.f32 %v5007_v47, %v2306_v58  ;;  %v2346_v59 = vpop.f32.mrb[11].mxu0  ;;  %v2373_v10 = vmul.f32 %v2352_v44, %v2352_v44 }
 0x335   :  { %v2347_v6 = vadd.f32 %v2346_v59, %v2298_v25  ;;  %v2371_v28 = vmul.f32 %v2344_v5, %v2344_v5 }
 0x336   :  { %v2374_v40 = vmul.f32 %v2355_v48, %v2355_v48 }
 0x337   :  { %v2360_v61 = vadd.f32 %v2347_v6, %v2344_v5  ;;  %v2372_v36 = vmul.f32 %v2347_v6, %v2347_v6 }
 0x339   :  { %v2361_v29 = vadd.f32 %v2360_v61, %v2352_v44  ;;  %v2375_v37 = vadd.f32 %v2372_v36, %v2371_v28 }
 0x33b   :  { %v2362_v7 = vadd.f32 %v2361_v29, %v2355_v48  ;;  %v2376_v1 = vadd.f32 %v2375_v37, %v2373_v10  ;;  %v5188_v10 = vld [vmem:[#allocation3 + $0x114] ss:$8 sps:$4 sm:$0xff]  }
 0x33c   :  { %v5191_v29 = vld [vmem:[#allocation3 + $0x414] ss:$8 sps:$4 sm:$0xff]  }
 0x33d   :  { %v2363_v55 = vrot.slane %v2362_v7, 4  ;;  %v2377_v51 = vadd.f32 %v2376_v1, %v2374_v40  ;;  %v5189_v1 = vld [vmem:[#allocation3 + $0x410] ss:$8 sps:$4 sm:$0xff]  }
 0x33f   :  { %v2364_v17 = vadd.f32 %v2363_v55, %v2362_v7  ;;  %v2378_v34 = vrot.slane %v2377_v51, 4  ;;  %v5186_v7 = vld [vmem:[#allocation3 + $0x110] ss:$8 sps:$4 sm:$0xff]   ;;  %v5194_v55 = vld [vmem:[#allocation3 + $0x124] ss:$8 sps:$4 sm:$0xff]  }
 0x341   :  { %v2365_v60 = vrot.slane %v2364_v17, 2  ;;  %v2379_v63 = vadd.f32 %v2378_v34, %v2377_v51  ;;  %v5197_v51 = vld [vmem:[#allocation3 + $0x424] ss:$8 sps:$4 sm:$0xff]   ;;  %v5195_v34 = vld [vmem:[#allocation3 + $0x420] ss:$8 sps:$4 sm:$0xff]  }
 0x343   :  { %v2366_v0 = vadd.f32 %v2365_v60, %v2364_v17  ;;  %v2380_v30 = vrot.slane %v2379_v63, 2  ;;  %v5192_v17 = vld [vmem:[#allocation3 + $0x120] ss:$8 sps:$4 sm:$0xff]   ;;  %v5200_v60 = vld [vmem:[#allocation3 + $0x134] ss:$8 sps:$4 sm:$0xff]  }
 0x345   :  { %v2367_v31 = vrot.slane %v2366_v0, 1  ;;  %v2381_v24 = vadd.f32 %v2380_v30, %v2379_v63  ;;  %v5203_v63 = vld [vmem:[#allocation3 + $0x434] ss:$8 sps:$4 sm:$0xff]   ;;  %v5201_v30 = vld [vmem:[#allocation3 + $0x430] ss:$8 sps:$4 sm:$0xff]  }
 0x347   :  { %v2368_v45 = vadd.f32 %v2367_v31, %v2366_v0  ;;  %v2382_v39 = vrot.slane %v2381_v24, 1  ;;  %v5198_v0 = vld [vmem:[#allocation3 + $0x130] ss:$8 sps:$4 sm:$0xff]   ;;  %v5206_v31 = vld [vmem:[#allocation3 + $0x144] ss:$8 sps:$4 sm:$0xff]  }
 0x349   :  { %v2370_v19 = vmul.f32 0.03125, %v2368_v45  ;;  %v2383_v62 = vadd.f32 %v2382_v39, %v2381_v24  ;;  %v5209_v24 = vld [vmem:[#allocation3 + $0x444] ss:$8 sps:$4 sm:$0xff]   ;;  %v5204_v45 = vld [vmem:[#allocation3 + $0x140] ss:$8 sps:$4 sm:$0xff]  }
 0x34a   :  { %v5207_v39 = vld [vmem:[#allocation3 + $0x440] ss:$8 sps:$4 sm:$0xff]  }
 0x34b   :  { %v2384_v15 = vmul.f32 0.03125, %v2383_v62  ;;  %v2385_v23 = vmul.f32 %v2370_v19, %v2370_v19  ;;  %v2387_v53 = vsub.f32 %v2344_v5, %v2370_v19  ;;  %v2388_v18 = vsub.f32 %v2347_v6, %v2370_v19  ;;  %v5215_v62 = vld [vmem:[#allocation3 + $0x454] ss:$8 sps:$4 sm:$0xff]  }
 0x34c   :  { %v2389_v38 = vsub.f32 %v2352_v44, %v2370_v19  ;;  %v2390_v20 = vsub.f32 %v2355_v48, %v2370_v19  ;;  %v5180_v44 = vld [vmem:[#allocation3 + $0x100] ss:$8 sps:$4 sm:$0xff]   ;;  %v5212_v19 = vld [vmem:[#allocation3 + $0x154] ss:$8 sps:$4 sm:$0xff]  }
 0x34d   :  { %v2386_v27 = vsub.f32 %v2384_v15, %v2385_v23  ;;  %v5210_v15 = vld [vmem:[#allocation3 + $0x150] ss:$8 sps:$4 sm:$0xff]  }
 0x34e   :  { %v5213_v23 = vld [vmem:[#allocation3 + $0x450] ss:$8 sps:$4 sm:$0xff]  }
 0x34f   :  { %v2391_v42 = vadd.f32 1e-05, %v2386_v27  ;;  %v5224_v27 = vld [vmem:[#allocation3 + $0x174] ss:$8 sps:$4 sm:$0xff]  }
 0x351   :  { %5486 = vrsqrt.f32 %v2391_v42  ;;  %v5227_v42 = vld [vmem:[#allocation3 + $0x474] ss:$8 sps:$4 sm:$0xff]  }
 0x35b   :  { %v5487_v9 = vpop.eup %5486 }
 0x35c   :  { %v2393_v41 = vmul.f32 %v5487_v9, %v2387_v53  ;;  %v2394_v12 = vmul.f32 %v5487_v9, %v2388_v18  ;;  %v2395_v54 = vmul.f32 %v5487_v9, %v2389_v38  ;;  %v2396_v35 = vmul.f32 %v5487_v9, %v2390_v20  ;;  %v5218_v53 = vld [vmem:[#allocation3 + $0x164] ss:$8 sps:$4 sm:$0xff]   ;;  %v5216_v38 = vld [vmem:[#allocation3 + $0x160] ss:$8 sps:$4 sm:$0xff]   ;;  %v5222_v9 = vld [vmem:[#allocation3 + $0x170] ss:$8 sps:$4 sm:$0xff]  }
 0x35d   :  { %v5221_v18 = vld [vmem:[#allocation3 + $0x464] ss:$8 sps:$4 sm:$0xff]   ;;  %v5219_v20 = vld [vmem:[#allocation3 + $0x460] ss:$8 sps:$4 sm:$0xff]  }
 0x35e   :  { %v2403_v16 = vmul.f32 %v4665_v49, %v2393_v41  ;;  %v2404_v3 = vmul.f32 %v4665_v49, %v2394_v12  ;;  %v2405_v56 = vmul.f32 %v4665_v49, %v2395_v54  ;;  %v2406_v13 = vmul.f32 %v4665_v49, %v2396_v35  ;;  %v5225_v49 = vld [vmem:[#allocation3 + $0x470] ss:$8 sps:$4 sm:$0xff]   ;;  %v5230_v41 = vld [vmem:[#allocation3 + $0x184] ss:$8 sps:$4 sm:$0xff]   ;;  %v5228_v54 = vld [vmem:[#allocation3 + $0x180] ss:$8 sps:$4 sm:$0xff]  }
 0x35f   :  { %v5233_v12 = vld [vmem:[#allocation3 + $0x484] ss:$8 sps:$4 sm:$0xff]   ;;  %v5231_v35 = vld [vmem:[#allocation3 + $0x480] ss:$8 sps:$4 sm:$0xff]  }
 0x360   :  { %v2413_v14 = vadd.f32 %v4666_v26, %v2403_v16  ;;  %v2414_v8 = vadd.f32 %v4666_v26, %v2404_v3  ;;  %v2415_v43 = vadd.f32 %v4666_v26, %v2405_v56  ;;  %v2416_v21 = vadd.f32 %v4666_v26, %v2406_v13  ;;  %v5236_v26 = vld [vmem:[#allocation3 + $0x194] ss:$8 sps:$4 sm:$0xff]   ;;  %v5234_v3 = vld [vmem:[#allocation3 + $0x190] ss:$8 sps:$4 sm:$0xff]   ;;  %v5242_v13 = vld [vmem:[#allocation3 + $0x1a4] ss:$8 sps:$4 sm:$0xff]  }
 0x361   :  { %v5239_v16 = vld [vmem:[#allocation3 + $0x494] ss:$8 sps:$4 sm:$0xff]   ;;  %v5237_v56 = vld [vmem:[#allocation3 + $0x490] ss:$8 sps:$4 sm:$0xff]  }
 0x362   :  { %vm2417_vm4 = vcmp.ge.f32.partialorder %v2413_v14, 0.0  ;;  %vm2418_vm5 = vcmp.ge.f32.partialorder %v2414_v8, 0.0  ;;  %vm2419_vm8 = vcmp.ge.f32.partialorder %v2415_v43, 0.0  ;;  %vm2420_vm9 = vcmp.ge.f32.partialorder %v2416_v21, 0.0 }
 0x363   :  { %v2421_v33 = vmul.f32 0.01, %v2413_v14  ;;  %v2422_v50 = vmul.f32 0.01, %v2414_v8  ;;  %v2423_v4 = vmul.f32 0.01, %v2415_v43 }
 0x364   :  { %v2424_v57 = vmul.f32 0.01, %v2416_v21 }
 0x365   :  { %v2425_v22 = vsel %vm2417_vm4, %v2413_v14, %v2421_v33  ;;  %v2426_v46 = vsel %vm2418_vm5, %v2414_v8, %v2422_v50  ;;  %v2427_v11 = vsel %vm2419_vm8, %v2415_v43, %v2423_v4  ;;  %v5245_v14 = vld [vmem:[#allocation3 + $0x4a4] ss:$8 sps:$4 sm:$0xff]   ;;  %v5240_v8 = vld [vmem:[#allocation3 + $0x1a0] ss:$8 sps:$4 sm:$0xff]   ;;  %v5251_v33 = vld [vmem:[#allocation3 + $0x4b4] ss:$8 sps:$4 sm:$0xff]  }
 0x366   :  { %v2428_v52 = vsel %vm2420_vm9, %v2416_v21, %v2424_v57  ;;  %2429 = vst [vmem:[#allocation2] sm:$0xff] %v2425_v22  ;;  %2430 = vst [vmem:[#allocation2 + $0x8] sm:$0xff] %v2426_v46  ;;  %v5243_v43 = vld [vmem:[#allocation3 + $0x4a0] ss:$8 sps:$4 sm:$0xff]   ;;  %v5248_v21 = vld [vmem:[#allocation3 + $0x1b4] ss:$8 sps:$4 sm:$0xff]  }
 0x367   :  { %2431 = vst [vmem:[#allocation2 + $0x10] sm:$0xff] %v2427_v11  ;;  %2432 = vst [vmem:[#allocation2 + $0x18] sm:$0xff] %v2428_v52  ;;  %v5246_v50 = vld [vmem:[#allocation3 + $0x1b0] ss:$8 sps:$4 sm:$0xff]   ;;  %v5254_v57 = vld [vmem:[#allocation3 + $0x1c4] ss:$8 sps:$4 sm:$0xff]  }
 0x368   :  { %v5249_v4 = vld [vmem:[#allocation3 + $0x4b0] ss:$8 sps:$4 sm:$0xff]   ;;  %v5257_v22 = vld [vmem:[#allocation3 + $0x4c4] ss:$8 sps:$4 sm:$0xff]   ;;  %v5252_v46 = vld [vmem:[#allocation3 + $0x1c0] ss:$8 sps:$4 sm:$0xff]  }
 0x369   :  { %v5255_v11 = vld [vmem:[#allocation3 + $0x4c0] ss:$8 sps:$4 sm:$0xff]   ;;  %v5260_v52 = vld [vmem:[#allocation3 + $0x1d4] ss:$8 sps:$4 sm:$0xff]  }
 0x36e   :  { %v2435_v58 = vld [vmem:[#allocation2 + $0x1] ss:$16 sm:$0x3]  ;;  %v2447_v5 = vld [vmem:[#allocation2 + $0x7] ss:$16 sm:$0x3] }
 0x36f   :  { %v2465_v47 = vpack.c.bf16 %v2435_v58, %v2435_v58  ;;  %v2471_v25 = vpack.c.bf16 %v2447_v5, %v2447_v5  ;;  %v2433_v48 = vld [vmem:[#allocation2] ss:$16 sm:$0x3]  ;;  %v2445_v59 = vld [vmem:[#allocation2 + $0x6] ss:$16 sm:$0x3] }
 0x370   :  { %v2464_v6 = vpack.c.bf16 %v2433_v48, %v2433_v48  ;;  %v2470_v28 = vpack.c.bf16 %v2445_v59, %v2445_v59  ;;  %v2439_v61 = vld [vmem:[#allocation2 + $0x3] ss:$16 sm:$0x3]  ;;  %v2451_v36 = vld [vmem:[#allocation2 + $0x9] ss:$16 sm:$0x3] }
 0x371   :  { %4060 = vmatprep.mubr.bf16.mxu0 %v2465_v47  ;;  %4183 = vmatprep.mubr.bf16.mxu1 %v2471_v25  ;;  %v2467_v37 = vpack.c.bf16 %v2439_v61, %v2439_v61  ;;  %v2473_v40 = vpack.c.bf16 %v2451_v36, %v2451_v36  ;;  %v5261_v58 = vld [vmem:[#allocation3 + $0x4d0] ss:$8 sps:$4 sm:$0xff]   ;;  %v5266_v5 = vld [vmem:[#allocation3 + $0x1e4] ss:$8 sps:$4 sm:$0xff]   ;;  %v5264_v25 = vld [vmem:[#allocation3 + $0x1e0] ss:$8 sps:$4 sm:$0xff]  }
 0x372   :  { %4061 = vmatmul.mubr.bf16.vlgmr.msra.gmra.mrb[12].mxu0 %v2464_v6  ;;  %4184 = vmatmul.mubr.bf16.vlgmr.msra.gmra.mrb[0].mxu1 %v2470_v28  ;;  %v5269_v47 = vld [vmem:[#allocation3 + $0x4e4] ss:$8 sps:$4 sm:$0xff]   ;;  %v5267_v48 = vld [vmem:[#allocation3 + $0x4e0] ss:$8 sps:$4 sm:$0xff]   ;;  %v5272_v59 = vld [vmem:[#allocation3 + $0x1f4] ss:$8 sps:$4 sm:$0xff]  }
 0x373   :  { %4070 = vmatpush1.bf16.msra.mxu0 %v5180_v44  ;;  %4193 = vmatpush1.bf16.msra.mxu1 %v5183_v32  ;;  %v5263_v44 = vld [vmem:[#allocation3 + $0x4d4] ss:$8 sps:$4 sm:$0xff]   ;;  %v5258_v32 = vld [vmem:[#allocation3 + $0x1d0] ss:$8 sps:$4 sm:$0xff]   ;;  %v5278_v36 = vld [vmem:[#allocation3 + $0x204] ss:$8 sps:$4 sm:$0xff]  }
 0x374   :  { %4101 = vmatprep.mubr.bf16.mxu0 %v2467_v37  ;;  %4224 = vmatprep.mubr.bf16.mxu1 %v2473_v40  ;;  %v5275_v6 = vld [vmem:[#allocation3 + $0x4f4] ss:$8 sps:$4 sm:$0xff]   ;;  %v5270_v28 = vld [vmem:[#allocation3 + $0x1f0] ss:$8 sps:$4 sm:$0xff]  }
 0x375   :  { %4071 = vmatprep.subr.bf16.mxu0 %v5188_v10  ;;  %4194 = vmatprep.subr.bf16.mxu1 %v5191_v29  ;;  %v5273_v61 = vld [vmem:[#allocation3 + $0x4f0] ss:$8 sps:$4 sm:$0xff]   ;;  %v5281_v10 = vld [vmem:[#allocation3 + $0x504] ss:$8 sps:$4 sm:$0xff]  }
 0x376   :  { %v2437_v29 = vld [vmem:[#allocation2 + $0x2] ss:$16 sm:$0x3]  ;;  %v2449_v37 = vld [vmem:[#allocation2 + $0x8] ss:$16 sm:$0x3] }
 0x377   :  { %4072 = vmatpush1.bf16.msra.mxu0 %v5186_v7  ;;  %4195 = vmatpush1.bf16.msra.mxu1 %v5189_v1  ;;  %v2443_v40 = vld [vmem:[#allocation2 + $0x5] ss:$16 sm:$0x3]  ;;  %v5276_v7 = vld [vmem:[#allocation3 + $0x200] ss:$8 sps:$4 sm:$0xff]  }
 0x378   :  { %4073 = vmatprep.subr.bf16.mxu0 %v5194_v55  ;;  %4196 = vmatprep.subr.bf16.mxu1 %v5197_v51  ;;  %v2455_v1 = vld [vmem:[#allocation2 + $0xb] ss:$16 sm:$0x3]  ;;  %v2466_v55 = vpack.c.bf16 %v2437_v29, %v2437_v29  ;;  %v2472_v51 = vpack.c.bf16 %v2449_v37, %v2449_v37  ;;  %v5365_v29 = vld [vmem:[#allocation3 + $0x5e4] ss:$8 sps:$4 sm:$0xff]  }
 0x379   :  { %v5360_v37 = vld [vmem:[#allocation3 + $0x2e0] ss:$8 sps:$4 sm:$0xff]  }
 0x37b   :  { %4074 = vmatpush1.bf16.msra.mxu0 %v5192_v17  ;;  %4197 = vmatpush1.bf16.msra.mxu1 %v5195_v34  ;;  %v5279_v17 = vld [vmem:[#allocation3 + $0x500] ss:$8 sps:$4 sm:$0xff]   ;;  %v2469_v34 = vpack.c.bf16 %v2443_v40, %v2443_v40 }
 0x37c   :  { %4075 = vmatprep.subr.bf16.mxu0 %v5200_v60  ;;  %4198 = vmatprep.subr.bf16.mxu1 %v5203_v63  ;;  %v5284_v60 = vld [vmem:[#allocation3 + $0x214] ss:$8 sps:$4 sm:$0xff]   ;;  %v5363_v40 = vld [vmem:[#allocation3 + $0x5e0] ss:$8 sps:$4 sm:$0xff]  }
 0x37d   :  { %v5287_v63 = vld [vmem:[#allocation3 + $0x514] ss:$8 sps:$4 sm:$0xff]  }
 0x37f   :  { %4076 = vmatpush1.bf16.msra.mxu0 %v5198_v0  ;;  %4199 = vmatpush1.bf16.msra.mxu1 %v5201_v30  ;;  %v2475_v0 = vpack.c.bf16 %v2455_v1, %v2455_v1  ;;  %v5282_v30 = vld [vmem:[#allocation3 + $0x210] ss:$8 sps:$4 sm:$0xff]   ;;  %v5371_v1 = vld [vmem:[#allocation3 + $0x5f4] ss:$8 sps:$4 sm:$0xff]  }
 0x380   :  { %4077 = vmatprep.subr.bf16.mxu0 %v5206_v31  ;;  %4200 = vmatprep.subr.bf16.mxu1 %v5209_v24  ;;  %v5285_v31 = vld [vmem:[#allocation3 + $0x510] ss:$8 sps:$4 sm:$0xff]   ;;  %v5290_v24 = vld [vmem:[#allocation3 + $0x224] ss:$8 sps:$4 sm:$0xff]  }
 0x383   :  { %4078 = vmatpush1.bf16.msra.mxu0 %v5204_v45  ;;  %4201 = vmatpush1.bf16.msra.mxu1 %v5207_v39  ;;  %v5293_v45 = vld [vmem:[#allocation3 + $0x524] ss:$8 sps:$4 sm:$0xff]   ;;  %v5288_v39 = vld [vmem:[#allocation3 + $0x220] ss:$8 sps:$4 sm:$0xff]  }
 0x384   :  { %4079 = vmatprep.subr.bf16.mxu0 %v5212_v19  ;;  %4202 = vmatprep.subr.bf16.mxu1 %v5215_v62  ;;  %v5291_v19 = vld [vmem:[#allocation3 + $0x520] ss:$8 sps:$4 sm:$0xff]   ;;  %v5296_v62 = vld [vmem:[#allocation3 + $0x234] ss:$8 sps:$4 sm:$0xff]  }
 0x387   :  { %4080 = vmatpush1.bf16.msra.mxu0 %v5210_v15  ;;  %4203 = vmatpush1.bf16.msra.mxu1 %v5213_v23  ;;  %v5299_v15 = vld [vmem:[#allocation3 + $0x534] ss:$8 sps:$4 sm:$0xff]   ;;  %v5294_v23 = vld [vmem:[#allocation3 + $0x230] ss:$8 sps:$4 sm:$0xff]  }
 0x388   :  { %4081 = vmatprep.subr.bf16.mxu0 %v5218_v53  ;;  %4204 = vmatprep.subr.bf16.mxu1 %v5221_v18  ;;  %v5297_v53 = vld [vmem:[#allocation3 + $0x530] ss:$8 sps:$4 sm:$0xff]   ;;  %v5302_v18 = vld [vmem:[#allocation3 + $0x244] ss:$8 sps:$4 sm:$0xff]  }
 0x38b   :  { %4082 = vmatpush1.bf16.msra.mxu0 %v5216_v38  ;;  %4205 = vmatpush1.bf16.msra.mxu1 %v5219_v20  ;;  %v5305_v38 = vld [vmem:[#allocation3 + $0x544] ss:$8 sps:$4 sm:$0xff]   ;;  %v5300_v20 = vld [vmem:[#allocation3 + $0x240] ss:$8 sps:$4 sm:$0xff]  }
 0x38c   :  { %4083 = vmatprep.subr.bf16.mxu0 %v5224_v27  ;;  %4206 = vmatprep.subr.bf16.mxu1 %v5227_v42  ;;  %v5303_v27 = vld [vmem:[#allocation3 + $0x540] ss:$8 sps:$4 sm:$0xff]   ;;  %v5308_v42 = vld [vmem:[#allocation3 + $0x254] ss:$8 sps:$4 sm:$0xff]  }
 0x38f   :  { %4084 = vmatpush1.bf16.msra.mxu0 %v5222_v9  ;;  %4207 = vmatpush1.bf16.msra.mxu1 %v5225_v49  ;;  %v5311_v9 = vld [vmem:[#allocation3 + $0x554] ss:$8 sps:$4 sm:$0xff]   ;;  %v5306_v49 = vld [vmem:[#allocation3 + $0x250] ss:$8 sps:$4 sm:$0xff]  }
 0x390   :  { %4085 = vmatprep.subr.bf16.mxu0 %v5230_v41  ;;  %4208 = vmatprep.subr.bf16.mxu1 %v5233_v12  ;;  %v5309_v41 = vld [vmem:[#allocation3 + $0x550] ss:$8 sps:$4 sm:$0xff]   ;;  %v5314_v12 = vld [vmem:[#allocation3 + $0x264] ss:$8 sps:$4 sm:$0xff]  }
 0x393   :  { %4086 = vmatpush1.bf16.msra.mxu0 %v5228_v54  ;;  %4209 = vmatpush1.bf16.msra.mxu1 %v5231_v35  ;;  %v5317_v54 = vld [vmem:[#allocation3 + $0x564] ss:$8 sps:$4 sm:$0xff]   ;;  %v5312_v35 = vld [vmem:[#allocation3 + $0x260] ss:$8 sps:$4 sm:$0xff]  }
 0x394   :  { %4087 = vmatprep.subr.bf16.mxu0 %v5236_v26  ;;  %4210 = vmatprep.subr.bf16.mxu1 %v5239_v16  ;;  %v5315_v26 = vld [vmem:[#allocation3 + $0x560] ss:$8 sps:$4 sm:$0xff]   ;;  %v5320_v16 = vld [vmem:[#allocation3 + $0x274] ss:$8 sps:$4 sm:$0xff]  }
 0x397   :  { %4088 = vmatpush1.bf16.msra.mxu0 %v5234_v3  ;;  %4211 = vmatpush1.bf16.msra.mxu1 %v5237_v56  ;;  %v5323_v3 = vld [vmem:[#allocation3 + $0x574] ss:$8 sps:$4 sm:$0xff]   ;;  %v5318_v56 = vld [vmem:[#allocation3 + $0x270] ss:$8 sps:$4 sm:$0xff]  }
 0x398   :  { %4089 = vmatprep.subr.bf16.mxu0 %v5242_v13  ;;  %4212 = vmatprep.subr.bf16.mxu1 %v5245_v14  ;;  %v5321_v13 = vld [vmem:[#allocation3 + $0x570] ss:$8 sps:$4 sm:$0xff]   ;;  %v5326_v14 = vld [vmem:[#allocation3 + $0x284] ss:$8 sps:$4 sm:$0xff]  }
 0x39b   :  { %4090 = vmatpush1.bf16.msra.mxu0 %v5240_v8  ;;  %4213 = vmatpush1.bf16.msra.mxu1 %v5243_v43  ;;  %v5329_v8 = vld [vmem:[#allocation3 + $0x584] ss:$8 sps:$4 sm:$0xff]   ;;  %v5324_v43 = vld [vmem:[#allocation3 + $0x280] ss:$8 sps:$4 sm:$0xff]  }
 0x39c   :  { %4091 = vmatprep.subr.bf16.mxu0 %v5248_v21  ;;  %4214 = vmatprep.subr.bf16.mxu1 %v5251_v33  ;;  %v5327_v21 = vld [vmem:[#allocation3 + $0x580] ss:$8 sps:$4 sm:$0xff]   ;;  %v5332_v33 = vld [vmem:[#allocation3 + $0x294] ss:$8 sps:$4 sm:$0xff]  }
 0x39f   :  { %4092 = vmatpush1.bf16.msra.mxu0 %v5246_v50  ;;  %4215 = vmatpush1.bf16.msra.mxu1 %v5249_v4  ;;  %v5335_v50 = vld [vmem:[#allocation3 + $0x594] ss:$8 sps:$4 sm:$0xff]   ;;  %v5330_v4 = vld [vmem:[#allocation3 + $0x290] ss:$8 sps:$4 sm:$0xff]  }
 0x3a0   :  { %4093 = vmatprep.subr.bf16.mxu0 %v5254_v57  ;;  %4216 = vmatprep.subr.bf16.mxu1 %v5257_v22  ;;  %v5333_v57 = vld [vmem:[#allocation3 + $0x590] ss:$8 sps:$4 sm:$0xff]   ;;  %v5338_v22 = vld [vmem:[#allocation3 + $0x2a4] ss:$8 sps:$4 sm:$0xff]  }
 0x3a3   :  { %4094 = vmatpush1.bf16.msra.mxu0 %v5252_v46  ;;  %4217 = vmatpush1.bf16.msra.mxu1 %v5255_v11  ;;  %v5341_v46 = vld [vmem:[#allocation3 + $0x5a4] ss:$8 sps:$4 sm:$0xff]   ;;  %v5336_v11 = vld [vmem:[#allocation3 + $0x2a0] ss:$8 sps:$4 sm:$0xff]  }
 0x3a4   :  { %4095 = vmatprep.subr.bf16.mxu0 %v5260_v52  ;;  %4218 = vmatprep.subr.bf16.mxu1 %v5263_v44  ;;  %v5339_v52 = vld [vmem:[#allocation3 + $0x5a0] ss:$8 sps:$4 sm:$0xff]   ;;  %v5344_v44 = vld [vmem:[#allocation3 + $0x2b4] ss:$8 sps:$4 sm:$0xff]  }
 0x3a7   :  { %4096 = vmatpush1.bf16.msra.mxu0 %v5258_v32  ;;  %4219 = vmatpush1.bf16.msra.mxu1 %v5261_v58  ;;  %v5347_v32 = vld [vmem:[#allocation3 + $0x5b4] ss:$8 sps:$4 sm:$0xff]   ;;  %v5342_v58 = vld [vmem:[#allocation3 + $0x2b0] ss:$8 sps:$4 sm:$0xff]  }
 0x3a8   :  { %4097 = vmatprep.subr.bf16.mxu0 %v5266_v5  ;;  %4220 = vmatprep.subr.bf16.mxu1 %v5269_v47  ;;  %v5345_v5 = vld [vmem:[#allocation3 + $0x5b0] ss:$8 sps:$4 sm:$0xff]   ;;  %v5350_v47 = vld [vmem:[#allocation3 + $0x2c4] ss:$8 sps:$4 sm:$0xff]  }
 0x3ab   :  { %4098 = vmatpush1.bf16.msra.mxu0 %v5264_v25  ;;  %4221 = vmatpush1.bf16.msra.mxu1 %v5267_v48  ;;  %v5353_v25 = vld [vmem:[#allocation3 + $0x5c4] ss:$8 sps:$4 sm:$0xff]   ;;  %v5348_v48 = vld [vmem:[#allocation3 + $0x2c0] ss:$8 sps:$4 sm:$0xff]  }
 0x3ac   :  { %4099 = vmatprep.subr.bf16.mxu0 %v5272_v59  ;;  %4222 = vmatprep.subr.bf16.mxu1 %v5275_v6  ;;  %v5351_v59 = vld [vmem:[#allocation3 + $0x5c0] ss:$8 sps:$4 sm:$0xff]   ;;  %v5356_v6 = vld [vmem:[#allocation3 + $0x2d4] ss:$8 sps:$4 sm:$0xff]  }
 0x3af   :  { %4100 = vmatpush1.bf16.msra.mxu0 %v5270_v28  ;;  %4223 = vmatpush1.bf16.msra.mxu1 %v5273_v61  ;;  %v5359_v28 = vld [vmem:[#allocation3 + $0x5d4] ss:$8 sps:$4 sm:$0xff]   ;;  %v5354_v61 = vld [vmem:[#allocation3 + $0x2d0] ss:$8 sps:$4 sm:$0xff]  }
 0x3b0   :  { %4110 = vmatprep.subr.bf16.mxu0 %v5278_v36  ;;  %4233 = vmatprep.subr.bf16.mxu1 %v5281_v10  ;;  %v5357_v36 = vld [vmem:[#allocation3 + $0x5d0] ss:$8 sps:$4 sm:$0xff]   ;;  %v5362_v10 = vld [vmem:[#allocation3 + $0x2e4] ss:$8 sps:$4 sm:$0xff]  }
 0x3b2   :  { %4102 = vmatmul.mubr.bf16.vlgmr.msra.gmra.mrb[12].mxu0 %v2466_v55  ;;  %4225 = vmatmul.mubr.bf16.vlgmr.msra.gmra.mrb[0].mxu1 %v2472_v51  ;;  %v5366_v55 = vld [vmem:[#allocation3 + $0x2f0] ss:$8 sps:$4 sm:$0xff]  }
 0x3b3   :  { %4111 = vmatpush1.bf16.msra.mxu0 %v5276_v7  ;;  %4142 = vmatprep.mubr.bf16.mxu0 %v2469_v34  ;;  %v5368_v7 = vld [vmem:[#allocation3 + $0x2f4] ss:$8 sps:$4 sm:$0xff]   ;;  %v5369_v51 = vld [vmem:[#allocation3 + $0x5f0] ss:$8 sps:$4 sm:$0xff]   ;;  %v5374_v34 = vld [vmem:[#allocation3 + $0x604] ss:$8 sps:$4 sm:$0xff]  }
 0x3b4   :  { %4234 = vmatpush1.bf16.msra.mxu1 %v5279_v17  ;;  %4265 = vmatprep.mubr.bf16.mxu1 %v2475_v0  ;;  %v2441_v17 = vld [vmem:[#allocation2 + $0x4] ss:$16 sm:$0x3] }
 0x3b5   :  { %4112 = vmatprep.subr.bf16.mxu0 %v5284_v60  ;;  %4235 = vmatprep.subr.bf16.mxu1 %v5287_v63  ;;  %v2453_v60 = vld [vmem:[#allocation2 + $0xa] ss:$16 sm:$0x3]  ;;  %v2459_v63 = vld [vmem:[#allocation2 + $0xd] ss:$16 sm:$0x3]  ;;  %v2468_v0 = vpack.c.bf16 %v2441_v17, %v2441_v17 }
 0x3b6   :  { %v5450_v17 = vld [vmem:[#allocation3 + $0x7a0] ss:$8 sps:$4 sm:$0xff]  }
 0x3b7   :  { %4113 = vmatpush1.bf16.msra.mxu0 %v5282_v30  ;;  %v5372_v30 = vld [vmem:[#allocation3 + $0x600] ss:$8 sps:$4 sm:$0xff]  }
 0x3b8   :  { %4236 = vmatpush1.bf16.msra.mxu1 %v5285_v31  ;;  %4114 = vmatprep.subr.bf16.mxu0 %v5290_v24  ;;  %v2474_v31 = vpack.c.bf16 %v2453_v60, %v2453_v60  ;;  %v5377_v24 = vld [vmem:[#allocation3 + $0x614] ss:$8 sps:$4 sm:$0xff]   ;;  %v5453_v60 = vld [vmem:[#allocation3 + $0x7b0] ss:$8 sps:$4 sm:$0xff]  }
 0x3b9   :  { %4237 = vmatprep.subr.bf16.mxu1 %v5293_v45  ;;  %v2477_v45 = vpack.c.bf16 %v2459_v63, %v2459_v63  ;;  %v5458_v63 = vld [vmem:[#allocation3 + $0x7c4] ss:$8 sps:$4 sm:$0xff]  }
 0x3bb   :  { %4115 = vmatpush1.bf16.msra.mxu0 %v5288_v39  ;;  %v5375_v39 = vld [vmem:[#allocation3 + $0x610] ss:$8 sps:$4 sm:$0xff]  }
 0x3bc   :  { %4238 = vmatpush1.bf16.msra.mxu1 %v5291_v19  ;;  %4116 = vmatprep.subr.bf16.mxu0 %v5296_v62  ;;  %v5380_v19 = vld [vmem:[#allocation3 + $0x624] ss:$8 sps:$4 sm:$0xff]   ;;  %v5378_v62 = vld [vmem:[#allocation3 + $0x620] ss:$8 sps:$4 sm:$0xff]  }
 0x3bd   :  { %4239 = vmatprep.subr.bf16.mxu1 %v5299_v15  ;;  %v5383_v15 = vld [vmem:[#allocation3 + $0x634] ss:$8 sps:$4 sm:$0xff]  }
 0x3bf   :  { %4117 = vmatpush1.bf16.msra.mxu0 %v5294_v23  ;;  %v5381_v23 = vld [vmem:[#allocation3 + $0x630] ss:$8 sps:$4 sm:$0xff]  }
 0x3c0   :  { %4240 = vmatpush1.bf16.msra.mxu1 %v5297_v53  ;;  %4118 = vmatprep.subr.bf16.mxu0 %v5302_v18  ;;  %v5386_v53 = vld [vmem:[#allocation3 + $0x644] ss:$8 sps:$4 sm:$0xff]   ;;  %v5384_v18 = vld [vmem:[#allocation3 + $0x640] ss:$8 sps:$4 sm:$0xff]  }
 0x3c1   :  { %4241 = vmatprep.subr.bf16.mxu1 %v5305_v38  ;;  %v5389_v38 = vld [vmem:[#allocation3 + $0x654] ss:$8 sps:$4 sm:$0xff]  }
 0x3c3   :  { %4119 = vmatpush1.bf16.msra.mxu0 %v5300_v20  ;;  %v5387_v20 = vld [vmem:[#allocation3 + $0x650] ss:$8 sps:$4 sm:$0xff]  }
 0x3c4   :  { %4242 = vmatpush1.bf16.msra.mxu1 %v5303_v27  ;;  %4120 = vmatprep.subr.bf16.mxu0 %v5308_v42  ;;  %v5392_v27 = vld [vmem:[#allocation3 + $0x664] ss:$8 sps:$4 sm:$0xff]   ;;  %v5390_v42 = vld [vmem:[#allocation3 + $0x660] ss:$8 sps:$4 sm:$0xff]  }
 0x3c5   :  { %4243 = vmatprep.subr.bf16.mxu1 %v5311_v9  ;;  %v5395_v9 = vld [vmem:[#allocation3 + $0x674] ss:$8 sps:$4 sm:$0xff]  }
 0x3c7   :  { %4121 = vmatpush1.bf16.msra.mxu0 %v5306_v49  ;;  %v5393_v49 = vld [vmem:[#allocation3 + $0x670] ss:$8 sps:$4 sm:$0xff]  }
 0x3c8   :  { %4244 = vmatpush1.bf16.msra.mxu1 %v5309_v41  ;;  %4122 = vmatprep.subr.bf16.mxu0 %v5314_v12  ;;  %v5398_v41 = vld [vmem:[#allocation3 + $0x684] ss:$8 sps:$4 sm:$0xff]   ;;  %v5396_v12 = vld [vmem:[#allocation3 + $0x680] ss:$8 sps:$4 sm:$0xff]  }
 0x3c9   :  { %4245 = vmatprep.subr.bf16.mxu1 %v5317_v54  ;;  %v5401_v54 = vld [vmem:[#allocation3 + $0x694] ss:$8 sps:$4 sm:$0xff]  }
 0x3cb   :  { %4123 = vmatpush1.bf16.msra.mxu0 %v5312_v35  ;;  %v5399_v35 = vld [vmem:[#allocation3 + $0x690] ss:$8 sps:$4 sm:$0xff]  }
 0x3cc   :  { %4246 = vmatpush1.bf16.msra.mxu1 %v5315_v26  ;;  %4124 = vmatprep.subr.bf16.mxu0 %v5320_v16  ;;  %v5404_v26 = vld [vmem:[#allocation3 + $0x6a4] ss:$8 sps:$4 sm:$0xff]   ;;  %v5402_v16 = vld [vmem:[#allocation3 + $0x6a0] ss:$8 sps:$4 sm:$0xff]  }
 0x3cd   :  { %4247 = vmatprep.subr.bf16.mxu1 %v5323_v3  ;;  %v5407_v3 = vld [vmem:[#allocation3 + $0x6b4] ss:$8 sps:$4 sm:$0xff]  }
 0x3cf   :  { %4125 = vmatpush1.bf16.msra.mxu0 %v5318_v56  ;;  %v5405_v56 = vld [vmem:[#allocation3 + $0x6b0] ss:$8 sps:$4 sm:$0xff]  }
 0x3d0   :  { %4248 = vmatpush1.bf16.msra.mxu1 %v5321_v13  ;;  %4126 = vmatprep.subr.bf16.mxu0 %v5326_v14  ;;  %v5410_v13 = vld [vmem:[#allocation3 + $0x6c4] ss:$8 sps:$4 sm:$0xff]   ;;  %v5408_v14 = vld [vmem:[#allocation3 + $0x6c0] ss:$8 sps:$4 sm:$0xff]  }
 0x3d1   :  { %4249 = vmatprep.subr.bf16.mxu1 %v5329_v8  ;;  %v5413_v8 = vld [vmem:[#allocation3 + $0x6d4] ss:$8 sps:$4 sm:$0xff]  }
 0x3d3   :  { %4127 = vmatpush1.bf16.msra.mxu0 %v5324_v43  ;;  %v5411_v43 = vld [vmem:[#allocation3 + $0x6d0] ss:$8 sps:$4 sm:$0xff]  }
 0x3d4   :  { %4250 = vmatpush1.bf16.msra.mxu1 %v5327_v21  ;;  %4128 = vmatprep.subr.bf16.mxu0 %v5332_v33  ;;  %v5416_v21 = vld [vmem:[#allocation3 + $0x6e4] ss:$8 sps:$4 sm:$0xff]   ;;  %v5414_v33 = vld [vmem:[#allocation3 + $0x6e0] ss:$8 sps:$4 sm:$0xff]  }
 0x3d5   :  { %4251 = vmatprep.subr.bf16.mxu1 %v5335_v50  ;;  %v5419_v50 = vld [vmem:[#allocation3 + $0x6f4] ss:$8 sps:$4 sm:$0xff]  }
 0x3d7   :  { %4129 = vmatpush1.bf16.msra.mxu0 %v5330_v4  ;;  %v5417_v4 = vld [vmem:[#allocation3 + $0x6f0] ss:$8 sps:$4 sm:$0xff]  }
 0x3d8   :  { %4252 = vmatpush1.bf16.msra.mxu1 %v5333_v57  ;;  %4130 = vmatprep.subr.bf16.mxu0 %v5338_v22  ;;  %v5422_v57 = vld [vmem:[#allocation3 + $0x704] ss:$8 sps:$4 sm:$0xff]  }
 0x3d9   :  { %4253 = vmatprep.subr.bf16.mxu1 %v5341_v46  ;;  %v2457_v22 = vld [vmem:[#allocation2 + $0xc] ss:$16 sm:$0x3]  ;;  %v2463_v46 = vld [vmem:[#allocation2 + $0xf] ss:$16 sm:$0x3] }
 0x3db   :  { %4131 = vmatpush1.bf16.msra.mxu0 %v5336_v11  ;;  %v5420_v11 = vld [vmem:[#allocation3 + $0x700] ss:$8 sps:$4 sm:$0xff]  }
 0x3dc   :  { %4254 = vmatpush1.bf16.msra.mxu1 %v5339_v52  ;;  %4132 = vmatprep.subr.bf16.mxu0 %v5344_v44  ;;  %v2476_v52 = vpack.c.bf16 %v2457_v22, %v2457_v22  ;;  %v5425_v44 = vld [vmem:[#allocation3 + $0x714] ss:$8 sps:$4 sm:$0xff]  }
 0x3dd   :  { %4255 = vmatprep.subr.bf16.mxu1 %v5347_v32  ;;  %v2479_v32 = vpack.c.bf16 %v2463_v46, %v2463_v46 }
 0x3df   :  { %4133 = vmatpush1.bf16.msra.mxu0 %v5342_v58  ;;  %v5423_v58 = vld [vmem:[#allocation3 + $0x710] ss:$8 sps:$4 sm:$0xff]  }
 0x3e0   :  { %4256 = vmatpush1.bf16.msra.mxu1 %v5345_v5  ;;  %4134 = vmatprep.subr.bf16.mxu0 %v5350_v47  ;;  %v5428_v5 = vld [vmem:[#allocation3 + $0x724] ss:$8 sps:$4 sm:$0xff]   ;;  %v5426_v47 = vld [vmem:[#allocation3 + $0x720] ss:$8 sps:$4 sm:$0xff]  }
 0x3e1   :  { %4257 = vmatprep.subr.bf16.mxu1 %v5353_v25  ;;  %v5431_v25 = vld [vmem:[#allocation3 + $0x734] ss:$8 sps:$4 sm:$0xff]  }
 0x3e3   :  { %4135 = vmatpush1.bf16.msra.mxu0 %v5348_v48  ;;  %v5429_v48 = vld [vmem:[#allocation3 + $0x730] ss:$8 sps:$4 sm:$0xff]  }
 0x3e4   :  { %4258 = vmatpush1.bf16.msra.mxu1 %v5351_v59  ;;  %4136 = vmatprep.subr.bf16.mxu0 %v5356_v6  ;;  %v5434_v59 = vld [vmem:[#allocation3 + $0x744] ss:$8 sps:$4 sm:$0xff]   ;;  %v5432_v6 = vld [vmem:[#allocation3 + $0x740] ss:$8 sps:$4 sm:$0xff]  }
 0x3e5   :  { %4259 = vmatprep.subr.bf16.mxu1 %v5359_v28  ;;  %v5437_v28 = vld [vmem:[#allocation3 + $0x754] ss:$8 sps:$4 sm:$0xff]  }
 0x3e7   :  { %4137 = vmatpush1.bf16.msra.mxu0 %v5354_v61  ;;  %v5435_v61 = vld [vmem:[#allocation3 + $0x750] ss:$8 sps:$4 sm:$0xff]  }
 0x3e8   :  { %4260 = vmatpush1.bf16.msra.mxu1 %v5357_v36  ;;  %4138 = vmatprep.subr.bf16.mxu0 %v5362_v10  ;;  %v5440_v36 = vld [vmem:[#allocation3 + $0x764] ss:$8 sps:$4 sm:$0xff]   ;;  %v5438_v10 = vld [vmem:[#allocation3 + $0x760] ss:$8 sps:$4 sm:$0xff]  }
 0x3e9   :  { %4261 = vmatprep.subr.bf16.mxu1 %v5365_v29  ;;  %v5443_v29 = vld [vmem:[#allocation3 + $0x774] ss:$8 sps:$4 sm:$0xff]  }
 0x3eb   :  { %4139 = vmatpush1.bf16.msra.mxu0 %v5360_v37  ;;  %v5441_v37 = vld [vmem:[#allocation3 + $0x770] ss:$8 sps:$4 sm:$0xff]  }
 0x3ec   :  { %4262 = vmatpush1.bf16.msra.mxu1 %v5363_v40  ;;  %4140 = vmatprep.subr.bf16.mxu0 %v5368_v7  ;;  %v5446_v40 = vld [vmem:[#allocation3 + $0x784] ss:$8 sps:$4 sm:$0xff]   ;;  %v5444_v7 = vld [vmem:[#allocation3 + $0x780] ss:$8 sps:$4 sm:$0xff]  }
 0x3ed   :  { %4263 = vmatprep.subr.bf16.mxu1 %v5371_v1  ;;  %v5449_v1 = vld [vmem:[#allocation3 + $0x794] ss:$8 sps:$4 sm:$0xff]  }
 0x3ef   :  { %4141 = vmatpush1.bf16.msra.mxu0 %v5366_v55  ;;  %v5447_v55 = vld [vmem:[#allocation3 + $0x790] ss:$8 sps:$4 sm:$0xff]  }
 0x3f0   :  { %4264 = vmatpush1.bf16.msra.mxu1 %v5369_v51  ;;  %v5452_v51 = vld [vmem:[#allocation3 + $0x7a4] ss:$8 sps:$4 sm:$0xff]  }
 0x3f1   :  { %4274 = vmatprep.subr.bf16.mxu1 %v5374_v34  ;;  %v5455_v34 = vld [vmem:[#allocation3 + $0x7b4] ss:$8 sps:$4 sm:$0xff]  }
 0x3f2   :  { %4143 = vmatmul.mubr.bf16.vlgmr.msra.gmra.mrb[12].mxu0 %v2468_v0  ;;  %v5456_v0 = vld [vmem:[#allocation3 + $0x7c0] ss:$8 sps:$4 sm:$0xff]  }
 0x3f3   :  { %4266 = vmatmul.mubr.bf16.vlgmr.msra.gmra.mrb[0].mxu1 %v2474_v31  ;;  %v5459_v31 = vld [vmem:[#allocation3 + $0x7d0] ss:$8 sps:$4 sm:$0xff]  }
 0x3f4   :  { %4275 = vmatpush1.bf16.msra.mxu1 %v5372_v30  ;;  %4306 = vmatprep.mubr.bf16.mxu1 %v2477_v45  ;;  %v5461_v30 = vld [vmem:[#allocation3 + $0x7d4] ss:$8 sps:$4 sm:$0xff]   ;;  %v5462_v45 = vld [vmem:[#allocation3 + $0x7e0] ss:$8 sps:$4 sm:$0xff]  }
 0x3f5   :  { %4276 = vmatprep.subr.bf16.mxu1 %v5377_v24  ;;  %v5464_v24 = vld [vmem:[#allocation3 + $0x7e4] ss:$8 sps:$4 sm:$0xff]  }
 0x3f8   :  { %4277 = vmatpush1.bf16.msra.mxu1 %v5375_v39  ;;  %v5467_v39 = vld [vmem:[#allocation3 + $0x7f4] ss:$8 sps:$4 sm:$0xff]  }
 0x3f9   :  { %4278 = vmatprep.subr.bf16.mxu1 %v5380_v19  ;;  %v5465_v19 = vld [vmem:[#allocation3 + $0x7f0] ss:$8 sps:$4 sm:$0xff]  }
 0x3fc   :  { %4279 = vmatpush1.bf16.msra.mxu1 %v5378_v62  ;;  %v2461_v62 = vld [vmem:[#allocation2 + $0xe] ss:$16 sm:$0x3] }
 0x3fd   :  { %4280 = vmatprep.subr.bf16.mxu1 %v5383_v15  ;;  %v2478_v15 = vpack.c.bf16 %v2461_v62, %v2461_v62 }
 0x400   :  { %4281 = vmatpush1.bf16.msra.mxu1 %v5381_v23 }
 0x401   :  { %4282 = vmatprep.subr.bf16.mxu1 %v5386_v53 }
 0x404   :  { %4283 = vmatpush1.bf16.msra.mxu1 %v5384_v18 }
 0x405   :  { %4284 = vmatprep.subr.bf16.mxu1 %v5389_v38 }
 0x408   :  { %4285 = vmatpush1.bf16.msra.mxu1 %v5387_v20  ;;  %v5468_v20 = vld [vmem:[%s7050_s14 + $0x40] sm:$0xff]  }
 0x409   :  { %4286 = vmatprep.subr.bf16.mxu1 %v5392_v27  ;;  %v5469_v27 = vld [vmem:[%s7050_s14] sm:$0xff]   ;;  %4974 = vmatprep.subr.bf16.mxu0 %v5468_v20 }
 0x40a   :  { %4975 = vmatpush3.bf16.msra.mxu0 %v5469_v27 }
 0x40c   :  { %4287 = vmatpush1.bf16.msra.mxu1 %v5390_v42  ;;  %v5470_v42 = vld [vmem:[%s7050_s14 + $0x48] sm:$0xff]  }
 0x40d   :  { %4288 = vmatprep.subr.bf16.mxu1 %v5395_v9  ;;  %v5471_v9 = vld [vmem:[%s7050_s14 + $0x8] sm:$0xff]   ;;  %4976 = vmatprep.subr.bf16.mxu0 %v5470_v42 }
 0x40e   :  { %4977 = vmatpush3.bf16.msra.mxu0 %v5471_v9 }
 0x410   :  { %4289 = vmatpush1.bf16.msra.mxu1 %v5393_v49  ;;  %v5472_v49 = vld [vmem:[%s7050_s14 + $0x50] sm:$0xff]  }
 0x411   :  { %4290 = vmatprep.subr.bf16.mxu1 %v5398_v41  ;;  %v5473_v41 = vld [vmem:[%s7050_s14 + $0x10] sm:$0xff]   ;;  %4978 = vmatprep.subr.bf16.mxu0 %v5472_v49 }
 0x412   :  { %4979 = vmatpush3.bf16.msra.mxu0 %v5473_v41  ;;  %v4356_v41 = vld [vmem:[%s7048_s12] sm:$0x3] }
 0x414   :  { %4291 = vmatpush1.bf16.msra.mxu1 %v5396_v12  ;;  %v5474_v12 = vld [vmem:[%s7050_s14 + $0x58] sm:$0xff]  }
 0x415   :  { %4292 = vmatprep.subr.bf16.mxu1 %v5401_v54  ;;  %v5475_v54 = vld [vmem:[%s7050_s14 + $0x18] sm:$0xff]   ;;  %4980 = vmatprep.subr.bf16.mxu0 %v5474_v12  ;;  %v4357_v12 = vld [vmem:[%s7049_s13] sm:$0x3] }
 0x416   :  { %4981 = vmatpush3.bf16.msra.mxu0 %v5475_v54 }
 0x418   :  { %4293 = vmatpush1.bf16.msra.mxu1 %v5399_v35  ;;  %v5476_v35 = vld [vmem:[%s7050_s14 + $0x60] sm:$0xff]  }
 0x419   :  { %4294 = vmatprep.subr.bf16.mxu1 %v5404_v26  ;;  %v5477_v26 = vld [vmem:[%s7050_s14 + $0x20] sm:$0xff]   ;;  %4982 = vmatprep.subr.bf16.mxu0 %v5476_v35 }
 0x41a   :  { %4983 = vmatpush3.bf16.msra.mxu0 %v5477_v26 }
 0x41c   :  { %4295 = vmatpush1.bf16.msra.mxu1 %v5402_v16  ;;  %v5478_v16 = vld [vmem:[%s7050_s14 + $0x68] sm:$0xff]  }
 0x41d   :  { %4296 = vmatprep.subr.bf16.mxu1 %v5407_v3  ;;  %v5479_v3 = vld [vmem:[%s7050_s14 + $0x28] sm:$0xff]   ;;  %4984 = vmatprep.subr.bf16.mxu0 %v5478_v16 }
 0x41e   :  { %4985 = vmatpush3.bf16.msra.mxu0 %v5479_v3 }
 0x420   :  { %4297 = vmatpush1.bf16.msra.mxu1 %v5405_v56  ;;  %v5480_v56 = vld [vmem:[%s7050_s14 + $0x70] sm:$0xff]  }
 0x421   :  { %4298 = vmatprep.subr.bf16.mxu1 %v5410_v13  ;;  %v5481_v13 = vld [vmem:[%s7050_s14 + $0x30] sm:$0xff]   ;;  %4986 = vmatprep.subr.bf16.mxu0 %v5480_v56 }
 0x422   :  { %4987 = vmatpush3.bf16.msra.mxu0 %v5481_v13 }
 0x424   :  { %4299 = vmatpush1.bf16.msra.mxu1 %v5408_v14  ;;  %v5482_v14 = vld [vmem:[%s7050_s14 + $0x78] sm:$0xff]  }
 0x425   :  { %4300 = vmatprep.subr.bf16.mxu1 %v5413_v8  ;;  %v5483_v8 = vld [vmem:[%s7050_s14 + $0x38] sm:$0xff]   ;;  %4988 = vmatprep.subr.bf16.mxu0 %v5482_v14 }
 0x426   :  { %4989 = vmatpush3.bf16.msra.mxu0 %v5483_v8 }
 0x428   :  { %4301 = vmatpush1.bf16.msra.mxu1 %v5411_v43  ;;  %v7001_v43 = vsub.s32 0, %v5645_v2 }
 0x429   :  { %4302 = vmatprep.subr.bf16.mxu1 %v5416_v21  ;;  %v2736_v21 = vld [vmem:[%s7047_s11] sm:$0x3] }
 0x42a   :  { %v4410_v35 = vrot.slane %v4356_v41, %v7001_v43  ;;  %v4423_v13 = vrot.slane %v4357_v12, %v7001_v43 }
 0x42c   :  { %4303 = vmatpush1.bf16.msra.mxu1 %v5414_v33  ;;  %v7007_v33 = vsub.s32 1, %v5645_v2 }
 0x42d   :  { %4304 = vmatprep.subr.bf16.mxu1 %v5419_v50  ;;  %v2741_v50 = vrot.slane %v2736_v21, %v7001_v43  ;;  %v4923_v43 = vld [vmem:[%s7051_s15] ss:$0 sm:$0xff] }
 0x42e   :  { %v4414_v3 = vrot.slane %v4356_v41, %v7007_v33 }
 0x430   :  { %4305 = vmatpush1.bf16.msra.mxu1 %v5417_v4  ;;  %v2745_v4 = vrot.slane %v2736_v21, %v7007_v33  ;;  %v4427_v21 = vrot.slane %v4357_v12, %v7007_v33 }
 0x431   :  { %4315 = vmatprep.subr.bf16.mxu1 %v5422_v57 }
 0x433   :  { %4307 = vmatmul.mubr.bf16.vlgmr.msra.gmra.mrb[0].mxu1 %v2476_v52 }
 0x434   :  { %4316 = vmatpush1.bf16.msra.mxu1 %v5420_v11  ;;  %4347 = vmatprep.mubr.bf16.mxu1 %v2479_v32 }
 0x435   :  { %4317 = vmatprep.subr.bf16.mxu1 %v5425_v44 }
 0x438   :  { %4318 = vmatpush1.bf16.msra.mxu1 %v5423_v58 }
 0x439   :  { %4319 = vmatprep.subr.bf16.mxu1 %v5428_v5 }
 0x43c   :  { %4320 = vmatpush1.bf16.msra.mxu1 %v5426_v47 }
 0x43d   :  { %4321 = vmatprep.subr.bf16.mxu1 %v5431_v25 }
 0x440   :  { %4322 = vmatpush1.bf16.msra.mxu1 %v5429_v48 }
 0x441   :  { %4323 = vmatprep.subr.bf16.mxu1 %v5434_v59 }
 0x444   :  { %4324 = vmatpush1.bf16.msra.mxu1 %v5432_v6 }
 0x445   :  { %4325 = vmatprep.subr.bf16.mxu1 %v5437_v28 }
 0x448   :  { %4326 = vmatpush1.bf16.msra.mxu1 %v5435_v61 }
 0x449   :  { %4327 = vmatprep.subr.bf16.mxu1 %v5440_v36 }
 0x44c   :  { %4328 = vmatpush1.bf16.msra.mxu1 %v5438_v10 }
 0x44d   :  { %4329 = vmatprep.subr.bf16.mxu1 %v5443_v29 }
 0x450   :  { %4330 = vmatpush1.bf16.msra.mxu1 %v5441_v37 }
 0x451   :  { %4331 = vmatprep.subr.bf16.mxu1 %v5446_v40 }
 0x454   :  { %4332 = vmatpush1.bf16.msra.mxu1 %v5444_v7 }
 0x455   :  { %4333 = vmatprep.subr.bf16.mxu1 %v5449_v1 }
 0x458   :  { %4334 = vmatpush1.bf16.msra.mxu1 %v5447_v55 }
 0x459   :  { %4335 = vmatprep.subr.bf16.mxu1 %v5452_v51 }
 0x45c   :  { %4336 = vmatpush1.bf16.msra.mxu1 %v5450_v17 }
 0x45d   :  { %4337 = vmatprep.subr.bf16.mxu1 %v5455_v34 }
 0x460   :  { %4338 = vmatpush1.bf16.msra.mxu1 %v5453_v60 }
 0x461   :  { %4339 = vmatprep.subr.bf16.mxu1 %v5458_v63 }
 0x464   :  { %4340 = vmatpush1.bf16.msra.mxu1 %v5456_v0 }
 0x465   :  { %4341 = vmatprep.subr.bf16.mxu1 %v5461_v30 }
 0x468   :  { %4342 = vmatpush1.bf16.msra.mxu1 %v5459_v31 }
 0x469   :  { %4343 = vmatprep.subr.bf16.mxu1 %v5464_v24 }
 0x46c   :  { %4344 = vmatpush1.bf16.msra.mxu1 %v5462_v45 }
 0x46d   :  { %4345 = vmatprep.subr.bf16.mxu1 %v5467_v39 }
 0x470   :  { %4346 = vmatpush1.bf16.msra.mxu1 %v5465_v19 }
 0x473   :  { %4348 = vmatmul.mubr.bf16.vlgmr.msra.gmra.mrb[0].mxu1 %v2478_v15 }
 0x4c5   :  { %v4144_v23 = vpop.f32.mrb[12].mxu0 }
 0x4c6   :  { %v4146_v53 = vpop.f32.mrb[13].mxu0  ;;  %v5008_v57 = vadd.f32 %v4144_v23, %v2741_v50 }
 0x4c7   :  { %v4148_v18 = vpop.f32.mrb[14].mxu0  ;;  %v5010_v22 = vadd.f32 %v4146_v53, %v2745_v4 }
 0x4c8   :  { %v4149_v38 = vpop.f32.mrb[15].mxu0 }
 0x546   :  { %v4349_v46 = vpop.f32.mrb[0].mxu1 }
 0x547   :  { %v5009_v11 = vadd.f32 %v5008_v57, %v4349_v46  ;;  %v4351_v52 = vpop.f32.mrb[1].mxu1 }
 0x548   :  { %v5011_v44 = vadd.f32 %v5010_v22, %v4351_v52  ;;  %v4353_v32 = vpop.f32.mrb[2].mxu1 }
 0x549   :  { %v4359_v58 = vsel %vm4358_vm10, %v5009_v11, 0.0  ;;  %v4376_v5 = vmul.f32 %v5009_v11, %v5009_v11  ;;  %v4354_v47 = vpop.f32.mrb[3].mxu1 }
 0x54a   :  { %v4360_v25 = vrot.slane %v4359_v58, 4  ;;  %v4366_v48 = vsel %vm4358_vm10, %v5011_v44, 0.0  ;;  %v4377_v59 = vmul.f32 %v5011_v44, %v5011_v44 }
 0x54b   :  { %v4378_v2 = vsel %vm4358_vm10, %v4376_v5, 0.0  ;;  %v4367_v6 = vrot.slane %v4366_v48, 4 }
 0x54c   :  { %v4361_v28 = vadd.f32 %v4360_v25, %v4359_v58  ;;  %v4379_v61 = vrot.slane %v4378_v2, 4  ;;  %v4385_v36 = vsel %vm4358_vm10, %v4377_v59, 0.0 }
 0x54d   :  { %v4368_v10 = vadd.f32 %v4367_v6, %v4366_v48  ;;  %v4386_v29 = vrot.slane %v4385_v36, 4 }
 0x54e   :  { %v4362_v37 = vrot.slane %v4361_v28, 2  ;;  %v4380_v40 = vadd.f32 %v4379_v61, %v4378_v2 }
 0x54f   :  { %v4369_v7 = vrot.slane %v4368_v10, 2  ;;  %v4387_v1 = vadd.f32 %v4386_v29, %v4385_v36 }
 0x550   :  { %v4363_v55 = vadd.f32 %v4362_v37, %v4361_v28  ;;  %v4381_v51 = vrot.slane %v4380_v40, 2 }
 0x551   :  { %v4370_v17 = vadd.f32 %v4369_v7, %v4368_v10  ;;  %v4388_v34 = vrot.slane %v4387_v1, 2 }
 0x552   :  { %v4364_v60 = vrot.slane %v4363_v55, 1  ;;  %v4382_v63 = vadd.f32 %v4381_v51, %v4380_v40 }
 0x553   :  { %v4371_v0 = vrot.slane %v4370_v17, 1  ;;  %v4389_v30 = vadd.f32 %v4388_v34, %v4387_v1 }
 0x554   :  { %v4365_v31 = vadd.f32 %v4364_v60, %v4363_v55  ;;  %v4383_v24 = vrot.slane %v4382_v63, 1 }
 0x555   :  { %v4372_v45 = vadd.f32 %v4371_v0, %v4370_v17  ;;  %v4390_v39 = vrot.slane %v4389_v30, 1 }
 0x556   :  { %v4374_v19 = vmul.f32 0.5, %v4365_v31  ;;  %v4384_v62 = vadd.f32 %v4383_v24, %v4382_v63 }
 0x557   :  { %v4375_v15 = vmul.f32 0.5, %v4372_v45  ;;  %v4391_v23 = vadd.f32 %v4390_v39, %v4389_v30 }
 0x558   :  { %v4392_v53 = vmul.f32 0.5, %v4384_v62  ;;  %v4394_v18 = vmul.f32 %v4374_v19, %v4374_v19  ;;  %v4398_v54 = vsub.f32 %v5009_v11, %v4374_v19 }
 0x559   :  { %v4393_v38 = vmul.f32 0.5, %v4391_v23  ;;  %v4395_v20 = vmul.f32 %v4375_v15, %v4375_v15  ;;  %v4399_v16 = vsub.f32 %v5011_v44, %v4375_v15 }
 0x55a   :  { %v4396_v27 = vsub.f32 %v4392_v53, %v4394_v18 }
 0x55b   :  { %v4397_v42 = vsub.f32 %v4393_v38, %v4395_v20 }
 0x55c   :  { %v4400_v9 = vadd.f32 1e-05, %v4396_v27 }
 0x55d   :  { %v4401_v49 = vadd.f32 1e-05, %v4397_v42 }
 0x55e   :  { %5488 = vrsqrt.f32 %v4400_v9 }
 0x55f   :  { %5490 = vrsqrt.f32 %v4401_v49 }
 0x568   :  { %v5489_v26 = vpop.eup %5488 }
 0x569   :  { %v5491_v56 = vpop.eup %5490  ;;  %v4404_v14 = vmul.f32 %v5489_v26, %v4398_v54 }
 0x56a   :  { %v4405_v8 = vmul.f32 %v5491_v56, %v4399_v16 }
 0x56b   :  { %v4417_v50 = vmul.f32 %v4410_v35, %v4404_v14 }
 0x56c   :  { %v4418_v4 = vmul.f32 %v4414_v3, %v4405_v8 }
 0x56d   :  { %v4430_v57 = vadd.f32 %v4423_v13, %v4417_v50 }
 0x56e   :  { %v4431_v22 = vadd.f32 %v4427_v21, %v4418_v4 }
 0x56f   :  { %vm4432_vm11 = vcmp.ge.f32.partialorder %v4430_v57, 0.0  ;;  %v4434_v46 = vmul.f32 0.01, %v4430_v57 }
 0x570   :  { %vm4433_vm1 = vcmp.ge.f32.partialorder %v4431_v22, 0.0  ;;  %v4435_v11 = vmul.f32 0.01, %v4431_v22 }
 0x571   :  { %v4436_v52 = vsel %vm4432_vm11, %v4430_v57, %v4434_v46 }
 0x572   :  { %v4437_v32 = vsel %vm4433_vm1, %v4431_v22, %v4435_v11  ;;  %v4438_v58 = vpack.c.bf16 %v4436_v52, %v4436_v52 }
 0x573   :  { %v4439_v44 = vpack.c.bf16 %v4437_v32, %v4437_v32 }
 0x575   :  { %4607 = vmatprep.mubr.bf16.mxu0 %v4439_v44 }
 0x576   :  { %4608 = vmatmul.mubr.bf16.vlgmr.msra.gmra.mrb[16].mxu0 %v4438_v58 }
 0x649   :  { %v4990_v5 = vpop.f32.mrb[16].mxu0 }
 0x64a   :  { %v4991_v33 = vpop.f32.mrb[17].mxu0 }
 0x64b   :  { %v4992_v47 = vadd.f32 %v4991_v33, %v4990_v5  ;;  %v4993_v25 = vpop.f32.mrb[18].mxu0 }
 0x64c   :  { %v4994_v48 = vpop.f32.mrb[19].mxu0 }
 0x64d   :  { %v4610_v59 = vadd.f32 %v4992_v47, %v4923_v43 }
 0x64f   :  { %v4616_v2 = vmul.f32 0.01, %v4610_v59  ;;  %vm4615_vm3 = vcmp.ge.f32.partialorder %v4610_v59, 0.0 }
 0x651   :  { %v4617_v6 = vsel %vm4615_vm3, %v4610_v59, %v4616_v2 }
 0x652   :  { %4618 = vst [vmem:[#allocation6] sm:$0x3] %v4617_v6 }
 0x653   :  { %5527 = shalt.err (!%p5524_p12)
}
 0x654   :  { %s5528_s3 = scalar_lea.hbm %s7052_s16, 32 }
 0x655   :  { %p5529_p13 = scmp.ne.s32.totalorder %s7052_s16, %s5528_s3  ;;  %p5532_p0 = scmp.lt.u32.totalorder %s5528_s3, %s7052_s16 }
 0x657   :  { %p5534_p1 = pnand %p5532_p0, %p5529_p13 }
 0x659   :  { %5537 = shalt.err (!%p5534_p1)
}
 0x65a   :  { %4628 = dma.vmem_to_hbm [thread:$0]  %s4626_s21, 32, %s7052_s16, [#allocation5]  }
 0x65b   :  { %5540 = dma.done.wait [#allocation5], 32  }
 0x65c   :  { %5541 = vsyncadd [#allocation5], 4294967264 }
 0x65d   :  { %4632 = vsyncpa [#allocation4], 1 }
 0x65e   :  { %4633 = vsyncpa [#allocation5], 1 }

</bundles_post_ra>
